<compile_context>
chip_gen: v5e
topology: v5e:2x2
jax: 0.10.0
libtpu: 0.0.40
codegen_flags: <defaults>
</compile_context>

<pallas_src>
import jax
import jax.numpy as jnp
from jax import lax
from jax.experimental import pallas as pl
from jax.experimental.pallas import tpu as pltpu

HIDDEN = 128


def har_lstm_kernel(x_ref,        # (T*Bp, Cp)  f32: time-major flattened input
                    wih0_ref,     # (Cp, 4H)    f32
                    b0_ref,       # (1, 4H)     f32: bih0 + bhh0
                    whh0_ref,     # (H, 4H)     bf16
                    w1_ref,       # (2H, 4H)    bf16: [Wih1; Whh1] stacked
                    b1_ref,       # (1, 4H)     f32: bih1 + bhh1
                    wfc_ref,      # (H, NC)     bf16
                    bfc_ref,      # (1, NC)     f32
                    out_ref,      # (Bp, NC)    f32
                    gin_ref):     # scratch (T*Bp, 4H) f32
    H = HIDDEN
    TB = gin_ref.shape[0]
    Bp = out_ref.shape[0]
    T = TB // Bp

    # ---- Layer-0 input projection for ALL timesteps as one GEMM, straight
    # into VMEM scratch (never round-trips HBM).  K (= padded n_channels) is
    # tiny, so f32 operands are essentially free and keep reference precision.
    gin_ref[...] = (jnp.dot(x_ref[...], wih0_ref[...],
                            preferred_element_type=jnp.float32)
                    + b0_ref[...])

    # Hoist weight loads / bias broadcast out of the unrolled recurrence
    # (JAX does not CSE broadcast_in_dim; inside the unrolled body it would
    # be replicated T times).
    whh0 = whh0_ref[...]
    w1 = w1_ref[...]
    b1 = jnp.broadcast_to(b1_ref[...], (Bp, 4 * H))

    def gates_to_hc(gates, c_prev):
        # gates: (Bp, 4H) f32, PyTorch order [i, f, g, o]; elementwise in f32.
        i = jax.nn.sigmoid(gates[:, 0 * H:1 * H])
        f = jax.nn.sigmoid(gates[:, 1 * H:2 * H])
        g = jnp.tanh(gates[:, 2 * H:3 * H])
        o = jax.nn.sigmoid(gates[:, 3 * H:4 * H])
        c_new = f * c_prev + i * g
        h_new = o * jnp.tanh(c_new)
        return h_new, c_new

    def body(t, carry):
        h0, c0, h1, c1 = carry
        # Layer 0: input projection precomputed above; only the recurrent
        # matmul remains inside the loop.
        row = pl.multiple_of(t * Bp, Bp)
        g0 = (gin_ref[pl.ds(row, Bp), :]
              + jnp.dot(h0.astype(jnp.bfloat16), whh0,
                        preferred_element_type=jnp.float32))
        h0n, c0n = gates_to_hc(g0, c0)
        # Layer 1: single fused (Bp, 2H) @ (2H, 4H) matmul (input + recurrent).
        hcat = jnp.concatenate([h0n.astype(jnp.bfloat16),
                                h1.astype(jnp.bfloat16)], axis=1)
        g1 = jnp.dot(hcat, w1, preferred_element_type=jnp.float32) + b1
        h1n, c1n = gates_to_hc(g1, c1)
        return (h0n, c0n, h1n, c1n)

    zeros = jnp.zeros((Bp, H), jnp.float32)
    _, _, h1, _ = lax.fori_loop(0, T, body, (zeros, zeros, zeros, zeros),
                                unroll=True)

    # Final-layer last hidden state -> linear head.
    logits = (jnp.dot(h1.astype(jnp.bfloat16), wfc_ref[...],
                      preferred_element_type=jnp.float32)
              + bfc_ref[...])
    out_ref[...] = logits.astype(out_ref.dtype)


def har_lstm_forward(x, params):
    """x: (B, C, T) float32 — same layout the PyTorch module receives."""
    (wih0, whh0, bih0, bhh0,
     wih1, whh1, bih1, bhh1,
     wfc, bfc) = params

    B, C, T = x.shape
    H = HIDDEN
    NC = wfc.shape[0]
    Bp = ((B + 7) // 8) * 8          # pad batch to f32 sublane multiple
    Cp = ((C + 7) // 8) * 8          # align the layer-0 GEMM contraction dim

    x = x.astype(jnp.float32)
    # (B, C, T) -> (T*Bp, Cp): tiny one-off relayout + zero pad, done in XLA.
    x = jnp.pad(x, ((0, Bp - B), (0, Cp - C), (0, 0)))
    x_tm = jnp.transpose(x, (2, 0, 1)).reshape(T * Bp, Cp)

    # Fold biases once; zero-pad Wih0 rows to match the padded channel dim.
    wih0_p = jnp.pad(wih0.T.astype(jnp.float32), ((0, Cp - C), (0, 0)))  # (Cp,4H)
    b0 = (bih0 + bhh0)[None, :].astype(jnp.float32)
    # Stack layer-1 input & recurrent weights -> one fused matmul per step.
    w1 = jnp.concatenate([wih1, whh1], axis=1).T.astype(jnp.bfloat16)    # (2H,4H)
    b1 = (bih1 + bhh1)[None, :].astype(jnp.float32)

    args = (
        x_tm,
        wih0_p,
        b0,
        whh0.T.astype(jnp.bfloat16),
        w1,
        b1,
        wfc.T.astype(jnp.bfloat16),
        bfc[None, :].astype(jnp.float32),
    )

    vmem = pl.BlockSpec(memory_space=pltpu.MemorySpace.VMEM)
    out = pl.pallas_call(
        har_lstm_kernel,
        out_shape=jax.ShapeDtypeStruct((Bp, NC), jnp.float32),
        in_specs=[vmem] * len(args),
        out_specs=vmem,
        scratch_shapes=[pltpu.VMEM((T * Bp, 4 * H), jnp.float32)],
    )(*args)
    return out[:B]


def har_lstm_reference(x, params):
    """Pure-JAX reference mirroring torch.nn.LSTM (2 layers) + Linear, eval mode."""
    (wih0, whh0, bih0, bhh0,
     wih1, whh1, bih1, bhh1,
     wfc, bfc) = params
    H = HIDDEN
    xt = jnp.transpose(x, (0, 2, 1))  # (B, T, C)
    B = xt.shape[0]

    def cell(x_t, h, c, wih, whh, bih, bhh):
        gates = x_t @ wih.T + bih + h @ whh.T + bhh
        i = jax.nn.sigmoid(gates[:, 0 * H:1 * H])
        f = jax.nn.sigmoid(gates[:, 1 * H:2 * H])
        g = jnp.tanh(gates[:, 2 * H:3 * H])
        o = jax.nn.sigmoid(gates[:, 3 * H:4 * H])
        c_new = f * c + i * g
        h_new = o * jnp.tanh(c_new)
        return h_new, c_new

    def step(carry, x_t):
        h0, c0, h1, c1 = carry
        h0, c0 = cell(x_t, h0, c0, wih0, whh0, bih0, bhh0)
        h1, c1 = cell(h0, h1, c1, wih1, whh1, bih1, bhh1)
        return (h0, c0, h1, c1), None

    init = tuple(jnp.zeros((B, H), jnp.float32) for _ in range(4))
    (h0, c0, h1, c1), _ = lax.scan(step, init, jnp.transpose(xt, (1, 0, 2)))
    return h1 @ wfc.T + bfc


if __name__ == "__main__":
    B, C, T, H, NC = 2, 4, 8, HIDDEN, 6   # nc_input=4, n_classes=6

    key = jax.random.PRNGKey(0)
    keys = jax.random.split(key, 12)
    bound = 1.0 / jnp.sqrt(jnp.float32(H))

    def init(k, shape):
        return jax.random.uniform(k, shape, jnp.float32, -bound, bound)

    x = jax.random.normal(keys[0], (B, C, T), jnp.float32)

    params = (
        init(keys[1], (4 * H, C)),   # weight_ih_l0
        init(keys[2], (4 * H, H)),   # weight_hh_l0
        init(keys[3], (4 * H,)),     # bias_ih_l0
        init(keys[4], (4 * H,)),     # bias_hh_l0
        init(keys[5], (4 * H, H)),   # weight_ih_l1
        init(keys[6], (4 * H, H)),   # weight_hh_l1
        init(keys[7], (4 * H,)),     # bias_ih_l1
        init(keys[8], (4 * H,)),     # bias_hh_l1
        init(keys[9], (NC, H)),      # fc.weight
        init(keys[10], (NC,)),       # fc.bias
    )

    logits = jax.block_until_ready(har_lstm_forward(x, params))
    ref = jax.block_until_ready(har_lstm_reference(x, params))

    assert logits.shape == (B, NC)
    # bf16 matmul operands (f32 accumulation) => compare at bf16-level tolerance.
    assert jnp.allclose(logits, ref, atol=3e-2, rtol=3e-2), (logits, ref)
    print("KERNEL_OK")
</pallas_src>

<mosaic_0001>
module attributes {stable_mosaic.version = 11 : i64} {
  func.func @har_lstm_kernel(%arg0: memref<64x8xf32, #tpu.memory_space<vmem>>, %arg1: memref<8x512xf32, #tpu.memory_space<vmem>>, %arg2: memref<1x512xf32, #tpu.memory_space<vmem>>, %arg3: memref<128x512xbf16, #tpu.memory_space<vmem>>, %arg4: memref<256x512xbf16, #tpu.memory_space<vmem>>, %arg5: memref<1x512xf32, #tpu.memory_space<vmem>>, %arg6: memref<128x6xbf16, #tpu.memory_space<vmem>>, %arg7: memref<1x6xf32, #tpu.memory_space<vmem>>, %arg8: memref<8x6xf32, #tpu.memory_space<vmem>>, %arg9: memref<64x512xf32, #tpu.memory_space<vmem>>) attributes {dimension_semantics = [], scalar_prefetch = 0 : i64, scratch_operands = 1 : i64, tpu.core_type = #tpu.core_type<tc>} {
    %c0 = arith.constant 0 : index
    %c0_0 = arith.constant 0 : index
    %0 = vector.load %arg0[%c0, %c0_0] : memref<64x8xf32, #tpu.memory_space<vmem>>, vector<64x8xf32>
    %c0_1 = arith.constant 0 : index
    %c0_2 = arith.constant 0 : index
    %1 = vector.load %arg1[%c0_1, %c0_2] : memref<8x512xf32, #tpu.memory_space<vmem>>, vector<8x512xf32>
    %cst = arith.constant dense<0.000000e+00> : vector<64x512xf32>
    %2 = tpu.matmul %0, %1, %cst {dimension_numbers = #tpu.dot_dimension_numbers<[1], [0], [0], [1], [0, 0, 1, 1], [], []>} : vector<64x8xf32>, vector<8x512xf32>, vector<64x512xf32> -> vector<64x512xf32>
    %c0_3 = arith.constant 0 : index
    %c0_4 = arith.constant 0 : index
    %3 = vector.load %arg2[%c0_3, %c0_4] : memref<1x512xf32, #tpu.memory_space<vmem>>, vector<1x512xf32>
    %4 = vector.broadcast %3 : vector<1x512xf32> to vector<64x512xf32>
    %5 = arith.addf %2, %4 : vector<64x512xf32>
    %c0_5 = arith.constant 0 : index
    %c0_6 = arith.constant 0 : index
    %6 = vector.load %arg9[%c0_5, %c0_6] : memref<64x512xf32, #tpu.memory_space<vmem>>, vector<64x512xf32>
    tpu.vector_store %arg9[%c0_5, %c0_6], %5 {strides = array<i32>} : memref<64x512xf32, #tpu.memory_space<vmem>>, vector<64x512xf32>,
    %c0_7 = arith.constant 0 : index
    %c0_8 = arith.constant 0 : index
    %7 = vector.load %arg3[%c0_7, %c0_8] : memref<128x512xbf16, #tpu.memory_space<vmem>>, vector<128x512xbf16>
    %c0_9 = arith.constant 0 : index
    %c0_10 = arith.constant 0 : index
    %8 = vector.load %arg4[%c0_9, %c0_10] : memref<256x512xbf16, #tpu.memory_space<vmem>>, vector<256x512xbf16>
    %c0_11 = arith.constant 0 : index
    %c0_12 = arith.constant 0 : index
    %9 = vector.load %arg5[%c0_11, %c0_12] : memref<1x512xf32, #tpu.memory_space<vmem>>, vector<1x512xf32>
    %10 = vector.shape_cast %9 : vector<1x512xf32> to vector<1x512xf32>
    %11 = vector.broadcast %10 : vector<1x512xf32> to vector<8x512xf32>
    %cst_13 = arith.constant 0.000000e+00 : f32
    %12 = vector.broadcast %cst_13 : f32 to vector<8x128xf32>
    %c0_i32 = arith.constant 0 : i32
    %c8_i32 = arith.constant 8 : i32
    %13 = arith.muli %c0_i32, %c8_i32 : i32
    %14 = tpu.assume_multiple %13, 8 : i32
    %15 = arith.index_cast %14 : i32 to index
    %c0_14 = arith.constant 0 : index
    %16 = vector.load %arg9[%15, %c0_14] : memref<64x512xf32, #tpu.memory_space<vmem>>, vector<8x512xf32>
    %17 = arith.truncf %12 : vector<8x128xf32> to vector<8x128xbf16>
    %cst_15 = arith.constant dense<0.000000e+00> : vector<8x512xf32>
    %18 = tpu.matmul %17, %7, %cst_15 {dimension_numbers = #tpu.dot_dimension_numbers<[1], [0], [0], [1], [0, 0, 1, 1], [], []>} : vector<8x128xbf16>, vector<128x512xbf16>, vector<8x512xf32> -> vector<8x512xf32>
    %19 = arith.addf %16, %18 : vector<8x512xf32>
    %20 = vector.extract_strided_slice %19 {offsets = [0, 0], sizes = [8, 128], strides = [1, 1]} : vector<8x512xf32> to vector<8x128xf32>
    %21 = arith.negf %20 : vector<8x128xf32>
    %22 = math.exp %21 : vector<8x128xf32>
    %cst_16 = arith.constant 1.000000e+00 : f32
    %23 = vector.broadcast %cst_16 : f32 to vector<8x128xf32>
    %24 = arith.addf %23, %22 : vector<8x128xf32>
    %25 = arith.divf %23, %24 : vector<8x128xf32>
    %26 = vector.extract_strided_slice %19 {offsets = [0, 128], sizes = [8, 128], strides = [1, 1]} : vector<8x512xf32> to vector<8x128xf32>
    %27 = arith.negf %26 : vector<8x128xf32>
    %28 = math.exp %27 : vector<8x128xf32>
    %cst_17 = arith.constant 1.000000e+00 : f32
    %29 = vector.broadcast %cst_17 : f32 to vector<8x128xf32>
    %30 = arith.addf %29, %28 : vector<8x128xf32>
    %31 = arith.divf %29, %30 : vector<8x128xf32>
    %32 = vector.extract_strided_slice %19 {offsets = [0, 256], sizes = [8, 128], strides = [1, 1]} : vector<8x512xf32> to vector<8x128xf32>
    %33 = math.tanh %32 : vector<8x128xf32>
    %34 = vector.extract_strided_slice %19 {offsets = [0, 384], sizes = [8, 128], strides = [1, 1]} : vector<8x512xf32> to vector<8x128xf32>
    %35 = arith.negf %34 : vector<8x128xf32>
    %36 = math.exp %35 : vector<8x128xf32>
    %cst_18 = arith.constant 1.000000e+00 : f32
    %37 = vector.broadcast %cst_18 : f32 to vector<8x128xf32>
    %38 = arith.addf %37, %36 : vector<8x128xf32>
    %39 = arith.divf %37, %38 : vector<8x128xf32>
    %40 = arith.mulf %31, %12 : vector<8x128xf32>
    %41 = arith.mulf %25, %33 : vector<8x128xf32>
    %42 = arith.addf %40, %41 : vector<8x128xf32>
    %43 = math.tanh %42 : vector<8x128xf32>
    %44 = arith.mulf %39, %43 : vector<8x128xf32>
    %45 = arith.truncf %44 : vector<8x128xf32> to vector<8x128xbf16>
    %46 = arith.truncf %12 : vector<8x128xf32> to vector<8x128xbf16>
    %47 = tpu.concatenate %45, %46 in 1 : vector<8x128xbf16>, vector<8x128xbf16> -> vector<8x256xbf16>
    %cst_19 = arith.constant dense<0.000000e+00> : vector<8x512xf32>
    %48 = tpu.matmul %47, %8, %cst_19 {dimension_numbers = #tpu.dot_dimension_numbers<[1], [0], [0], [1], [0, 0, 1, 1], [], []>} : vector<8x256xbf16>, vector<256x512xbf16>, vector<8x512xf32> -> vector<8x512xf32>
    %49 = arith.addf %48, %11 : vector<8x512xf32>
    %50 = vector.extract_strided_slice %49 {offsets = [0, 0], sizes = [8, 128], strides = [1, 1]} : vector<8x512xf32> to vector<8x128xf32>
    %51 = arith.negf %50 : vector<8x128xf32>
    %52 = math.exp %51 : vector<8x128xf32>
    %cst_20 = arith.constant 1.000000e+00 : f32
    %53 = vector.broadcast %cst_20 : f32 to vector<8x128xf32>
    %54 = arith.addf %53, %52 : vector<8x128xf32>
    %55 = arith.divf %53, %54 : vector<8x128xf32>
    %56 = vector.extract_strided_slice %49 {offsets = [0, 128], sizes = [8, 128], strides = [1, 1]} : vector<8x512xf32> to vector<8x128xf32>
    %57 = arith.negf %56 : vector<8x128xf32>
    %58 = math.exp %57 : vector<8x128xf32>
    %cst_21 = arith.constant 1.000000e+00 : f32
    %59 = vector.broadcast %cst_21 : f32 to vector<8x128xf32>
    %60 = arith.addf %59, %58 : vector<8x128xf32>
    %61 = arith.divf %59, %60 : vector<8x128xf32>
    %62 = vector.extract_strided_slice %49 {offsets = [0, 256], sizes = [8, 128], strides = [1, 1]} : vector<8x512xf32> to vector<8x128xf32>
    %63 = math.tanh %62 : vector<8x128xf32>
    %64 = vector.extract_strided_slice %49 {offsets = [0, 384], sizes = [8, 128], strides = [1, 1]} : vector<8x512xf32> to vector<8x128xf32>
    %65 = arith.negf %64 : vector<8x128xf32>
    %66 = math.exp %65 : vector<8x128xf32>
    %cst_22 = arith.constant 1.000000e+00 : f32
    %67 = vector.broadcast %cst_22 : f32 to vector<8x128xf32>
    %68 = arith.addf %67, %66 : vector<8x128xf32>
    %69 = arith.divf %67, %68 : vector<8x128xf32>
    %70 = arith.mulf %61, %12 : vector<8x128xf32>
    %71 = arith.mulf %55, %63 : vector<8x128xf32>
    %72 = arith.addf %70, %71 : vector<8x128xf32>
    %73 = math.tanh %72 : vector<8x128xf32>
    %74 = arith.mulf %69, %73 : vector<8x128xf32>
    %c1_i32 = arith.constant 1 : i32
    %c8_i32_23 = arith.constant 8 : i32
    %75 = arith.muli %c1_i32, %c8_i32_23 : i32
    %76 = tpu.assume_multiple %75, 8 : i32
    %77 = arith.index_cast %76 : i32 to index
    %c0_24 = arith.constant 0 : index
    %78 = vector.load %arg9[%77, %c0_24] : memref<64x512xf32, #tpu.memory_space<vmem>>, vector<8x512xf32>
    %79 = arith.truncf %44 : vector<8x128xf32> to vector<8x128xbf16>
    %cst_25 = arith.constant dense<0.000000e+00> : vector<8x512xf32>
    %80 = tpu.matmul %79, %7, %cst_25 {dimension_numbers = #tpu.dot_dimension_numbers<[1], [0], [0], [1], [0, 0, 1, 1], [], []>} : vector<8x128xbf16>, vector<128x512xbf16>, vector<8x512xf32> -> vector<8x512xf32>
    %81 = arith.addf %78, %80 : vector<8x512xf32>
    %82 = vector.extract_strided_slice %81 {offsets = [0, 0], sizes = [8, 128], strides = [1, 1]} : vector<8x512xf32> to vector<8x128xf32>
    %83 = arith.negf %82 : vector<8x128xf32>
    %84 = math.exp %83 : vector<8x128xf32>
    %cst_26 = arith.constant 1.000000e+00 : f32
    %85 = vector.broadcast %cst_26 : f32 to vector<8x128xf32>
    %86 = arith.addf %85, %84 : vector<8x128xf32>
    %87 = arith.divf %85, %86 : vector<8x128xf32>
    %88 = vector.extract_strided_slice %81 {offsets = [0, 128], sizes = [8, 128], strides = [1, 1]} : vector<8x512xf32> to vector<8x128xf32>
    %89 = arith.negf %88 : vector<8x128xf32>
    %90 = math.exp %89 : vector<8x128xf32>
    %cst_27 = arith.constant 1.000000e+00 : f32
    %91 = vector.broadcast %cst_27 : f32 to vector<8x128xf32>
    %92 = arith.addf %91, %90 : vector<8x128xf32>
    %93 = arith.divf %91, %92 : vector<8x128xf32>
    %94 = vector.extract_strided_slice %81 {offsets = [0, 256], sizes = [8, 128], strides = [1, 1]} : vector<8x512xf32> to vector<8x128xf32>
    %95 = math.tanh %94 : vector<8x128xf32>
    %96 = vector.extract_strided_slice %81 {offsets = [0, 384], sizes = [8, 128], strides = [1, 1]} : vector<8x512xf32> to vector<8x128xf32>
    %97 = arith.negf %96 : vector<8x128xf32>
    %98 = math.exp %97 : vector<8x128xf32>
    %cst_28 = arith.constant 1.000000e+00 : f32
    %99 = vector.broadcast %cst_28 : f32 to vector<8x128xf32>
    %100 = arith.addf %99, %98 : vector<8x128xf32>
    %101 = arith.divf %99, %100 : vector<8x128xf32>
    %102 = arith.mulf %93, %42 : vector<8x128xf32>
    %103 = arith.mulf %87, %95 : vector<8x128xf32>
    %104 = arith.addf %102, %103 : vector<8x128xf32>
    %105 = math.tanh %104 : vector<8x128xf32>
    %106 = arith.mulf %101, %105 : vector<8x128xf32>
    %107 = arith.truncf %106 : vector<8x128xf32> to vector<8x128xbf16>
    %108 = arith.truncf %74 : vector<8x128xf32> to vector<8x128xbf16>
    %109 = tpu.concatenate %107, %108 in 1 : vector<8x128xbf16>, vector<8x128xbf16> -> vector<8x256xbf16>
    %cst_29 = arith.constant dense<0.000000e+00> : vector<8x512xf32>
    %110 = tpu.matmul %109, %8, %cst_29 {dimension_numbers = #tpu.dot_dimension_numbers<[1], [0], [0], [1], [0, 0, 1, 1], [], []>} : vector<8x256xbf16>, vector<256x512xbf16>, vector<8x512xf32> -> vector<8x512xf32>
    %111 = arith.addf %110, %11 : vector<8x512xf32>
    %112 = vector.extract_strided_slice %111 {offsets = [0, 0], sizes = [8, 128], strides = [1, 1]} : vector<8x512xf32> to vector<8x128xf32>
    %113 = arith.negf %112 : vector<8x128xf32>
    %114 = math.exp %113 : vector<8x128xf32>
    %cst_30 = arith.constant 1.000000e+00 : f32
    %115 = vector.broadcast %cst_30 : f32 to vector<8x128xf32>
    %116 = arith.addf %115, %114 : vector<8x128xf32>
    %117 = arith.divf %115, %116 : vector<8x128xf32>
    %118 = vector.extract_strided_slice %111 {offsets = [0, 128], sizes = [8, 128], strides = [1, 1]} : vector<8x512xf32> to vector<8x128xf32>
    %119 = arith.negf %118 : vector<8x128xf32>
    %120 = math.exp %119 : vector<8x128xf32>
    %cst_31 = arith.constant 1.000000e+00 : f32
    %121 = vector.broadcast %cst_31 : f32 to vector<8x128xf32>
    %122 = arith.addf %121, %120 : vector<8x128xf32>
    %123 = arith.divf %121, %122 : vector<8x128xf32>
    %124 = vector.extract_strided_slice %111 {offsets = [0, 256], sizes = [8, 128], strides = [1, 1]} : vector<8x512xf32> to vector<8x128xf32>
    %125 = math.tanh %124 : vector<8x128xf32>
    %126 = vector.extract_strided_slice %111 {offsets = [0, 384], sizes = [8, 128], strides = [1, 1]} : vector<8x512xf32> to vector<8x128xf32>
    %127 = arith.negf %126 : vector<8x128xf32>
    %128 = math.exp %127 : vector<8x128xf32>
    %cst_32 = arith.constant 1.000000e+00 : f32
    %129 = vector.broadcast %cst_32 : f32 to vector<8x128xf32>
    %130 = arith.addf %129, %128 : vector<8x128xf32>
    %131 = arith.divf %129, %130 : vector<8x128xf32>
    %132 = arith.mulf %123, %72 : vector<8x128xf32>
    %133 = arith.mulf %117, %125 : vector<8x128xf32>
    %134 = arith.addf %132, %133 : vector<8x128xf32>
    %135 = math.tanh %134 : vector<8x128xf32>
    %136 = arith.mulf %131, %135 : vector<8x128xf32>
    %c2_i32 = arith.constant 2 : i32
    %c8_i32_33 = arith.constant 8 : i32
    %137 = arith.muli %c2_i32, %c8_i32_33 : i32
    %138 = tpu.assume_multiple %137, 8 : i32
    %139 = arith.index_cast %138 : i32 to index
    %c0_34 = arith.constant 0 : index
    %140 = vector.load %arg9[%139, %c0_34] : memref<64x512xf32, #tpu.memory_space<vmem>>, vector<8x512xf32>
    %141 = arith.truncf %106 : vector<8x128xf32> to vector<8x128xbf16>
    %cst_35 = arith.constant dense<0.000000e+00> : vector<8x512xf32>
    %142 = tpu.matmul %141, %7, %cst_35 {dimension_numbers = #tpu.dot_dimension_numbers<[1], [0], [0], [1], [0, 0, 1, 1], [], []>} : vector<8x128xbf16>, vector<128x512xbf16>, vector<8x512xf32> -> vector<8x512xf32>
    %143 = arith.addf %140, %142 : vector<8x512xf32>
    %144 = vector.extract_strided_slice %143 {offsets = [0, 0], sizes = [8, 128], strides = [1, 1]} : vector<8x512xf32> to vector<8x128xf32>
    %145 = arith.negf %144 : vector<8x128xf32>
    %146 = math.exp %145 : vector<8x128xf32>
    %cst_36 = arith.constant 1.000000e+00 : f32
    %147 = vector.broadcast %cst_36 : f32 to vector<8x128xf32>
    %148 = arith.addf %147, %146 : vector<8x128xf32>
    %149 = arith.divf %147, %148 : vector<8x128xf32>
    %150 = vector.extract_strided_slice %143 {offsets = [0, 128], sizes = [8, 128], strides = [1, 1]} : vector<8x512xf32> to vector<8x128xf32>
    %151 = arith.negf %150 : vector<8x128xf32>
    %152 = math.exp %151 : vector<8x128xf32>
    %cst_37 = arith.constant 1.000000e+00 : f32
    %153 = vector.broadcast %cst_37 : f32 to vector<8x128xf32>
    %154 = arith.addf %153, %152 : vector<8x128xf32>
    %155 = arith.divf %153, %154 : vector<8x128xf32>
    %156 = vector.extract_strided_slice %143 {offsets = [0, 256], sizes = [8, 128], strides = [1, 1]} : vector<8x512xf32> to vector<8x128xf32>
    %157 = math.tanh %156 : vector<8x128xf32>
    %158 = vector.extract_strided_slice %143 {offsets = [0, 384], sizes = [8, 128], strides = [1, 1]} : vector<8x512xf32> to vector<8x128xf32>
    %159 = arith.negf %158 : vector<8x128xf32>
    %160 = math.exp %159 : vector<8x128xf32>
    %cst_38 = arith.constant 1.000000e+00 : f32
    %161 = vector.broadcast %cst_38 : f32 to vector<8x128xf32>
    %162 = arith.addf %161, %160 : vector<8x128xf32>
    %163 = arith.divf %161, %162 : vector<8x128xf32>
    %164 = arith.mulf %155, %104 : vector<8x128xf32>
    %165 = arith.mulf %149, %157 : vector<8x128xf32>
    %166 = arith.addf %164, %165 : vector<8x128xf32>
    %167 = math.tanh %166 : vector<8x128xf32>
    %168 = arith.mulf %163, %167 : vector<8x128xf32>
    %169 = arith.truncf %168 : vector<8x128xf32> to vector<8x128xbf16>
    %170 = arith.truncf %136 : vector<8x128xf32> to vector<8x128xbf16>
    %171 = tpu.concatenate %169, %170 in 1 : vector<8x128xbf16>, vector<8x128xbf16> -> vector<8x256xbf16>
    %cst_39 = arith.constant dense<0.000000e+00> : vector<8x512xf32>
    %172 = tpu.matmul %171, %8, %cst_39 {dimension_numbers = #tpu.dot_dimension_numbers<[1], [0], [0], [1], [0, 0, 1, 1], [], []>} : vector<8x256xbf16>, vector<256x512xbf16>, vector<8x512xf32> -> vector<8x512xf32>
    %173 = arith.addf %172, %11 : vector<8x512xf32>
    %174 = vector.extract_strided_slice %173 {offsets = [0, 0], sizes = [8, 128], strides = [1, 1]} : vector<8x512xf32> to vector<8x128xf32>
    %175 = arith.negf %174 : vector<8x128xf32>
    %176 = math.exp %175 : vector<8x128xf32>
    %cst_40 = arith.constant 1.000000e+00 : f32
    %177 = vector.broadcast %cst_40 : f32 to vector<8x128xf32>
    %178 = arith.addf %177, %176 : vector<8x128xf32>
    %179 = arith.divf %177, %178 : vector<8x128xf32>
    %180 = vector.extract_strided_slice %173 {offsets = [0, 128], sizes = [8, 128], strides = [1, 1]} : vector<8x512xf32> to vector<8x128xf32>
    %181 = arith.negf %180 : vector<8x128xf32>
    %182 = math.exp %181 : vector<8x128xf32>
    %cst_41 = arith.constant 1.000000e+00 : f32
    %183 = vector.broadcast %cst_41 : f32 to vector<8x128xf32>
    %184 = arith.addf %183, %182 : vector<8x128xf32>
    %185 = arith.divf %183, %184 : vector<8x128xf32>
    %186 = vector.extract_strided_slice %173 {offsets = [0, 256], sizes = [8, 128], strides = [1, 1]} : vector<8x512xf32> to vector<8x128xf32>
    %187 = math.tanh %186 : vector<8x128xf32>
    %188 = vector.extract_strided_slice %173 {offsets = [0, 384], sizes = [8, 128], strides = [1, 1]} : vector<8x512xf32> to vector<8x128xf32>
    %189 = arith.negf %188 : vector<8x128xf32>
    %190 = math.exp %189 : vector<8x128xf32>
    %cst_42 = arith.constant 1.000000e+00 : f32
    %191 = vector.broadcast %cst_42 : f32 to vector<8x128xf32>
    %192 = arith.addf %191, %190 : vector<8x128xf32>
    %193 = arith.divf %191, %192 : vector<8x128xf32>
    %194 = arith.mulf %185, %134 : vector<8x128xf32>
    %195 = arith.mulf %179, %187 : vector<8x128xf32>
    %196 = arith.addf %194, %195 : vector<8x128xf32>
    %197 = math.tanh %196 : vector<8x128xf32>
    %198 = arith.mulf %193, %197 : vector<8x128xf32>
    %c3_i32 = arith.constant 3 : i32
    %c8_i32_43 = arith.constant 8 : i32
    %199 = arith.muli %c3_i32, %c8_i32_43 : i32
    %200 = tpu.assume_multiple %199, 8 : i32
    %201 = arith.index_cast %200 : i32 to index
    %c0_44 = arith.constant 0 : index
    %202 = vector.load %arg9[%201, %c0_44] : memref<64x512xf32, #tpu.memory_space<vmem>>, vector<8x512xf32>
    %203 = arith.truncf %168 : vector<8x128xf32> to vector<8x128xbf16>
    %cst_45 = arith.constant dense<0.000000e+00> : vector<8x512xf32>
    %204 = tpu.matmul %203, %7, %cst_45 {dimension_numbers = #tpu.dot_dimension_numbers<[1], [0], [0], [1], [0, 0, 1, 1], [], []>} : vector<8x128xbf16>, vector<128x512xbf16>, vector<8x512xf32> -> vector<8x512xf32>
    %205 = arith.addf %202, %204 : vector<8x512xf32>
    %206 = vector.extract_strided_slice %205 {offsets = [0, 0], sizes = [8, 128], strides = [1, 1]} : vector<8x512xf32> to vector<8x128xf32>
    %207 = arith.negf %206 : vector<8x128xf32>
    %208 = math.exp %207 : vector<8x128xf32>
    %cst_46 = arith.constant 1.000000e+00 : f32
    %209 = vector.broadcast %cst_46 : f32 to vector<8x128xf32>
    %210 = arith.addf %209, %208 : vector<8x128xf32>
    %211 = arith.divf %209, %210 : vector<8x128xf32>
    %212 = vector.extract_strided_slice %205 {offsets = [0, 128], sizes = [8, 128], strides = [1, 1]} : vector<8x512xf32> to vector<8x128xf32>
    %213 = arith.negf %212 : vector<8x128xf32>
    %214 = math.exp %213 : vector<8x128xf32>
    %cst_47 = arith.constant 1.000000e+00 : f32
    %215 = vector.broadcast %cst_47 : f32 to vector<8x128xf32>
    %216 = arith.addf %215, %214 : vector<8x128xf32>
    %217 = arith.divf %215, %216 : vector<8x128xf32>
    %218 = vector.extract_strided_slice %205 {offsets = [0, 256], sizes = [8, 128], strides = [1, 1]} : vector<8x512xf32> to vector<8x128xf32>
    %219 = math.tanh %218 : vector<8x128xf32>
    %220 = vector.extract_strided_slice %205 {offsets = [0, 384], sizes = [8, 128], strides = [1, 1]} : vector<8x512xf32> to vector<8x128xf32>
    %221 = arith.negf %220 : vector<8x128xf32>
    %222 = math.exp %221 : vector<8x128xf32>
    %cst_48 = arith.constant 1.000000e+00 : f32
    %223 = vector.broadcast %cst_48 : f32 to vector<8x128xf32>
    %224 = arith.addf %223, %222 : vector<8x128xf32>
    %225 = arith.divf %223, %224 : vector<8x128xf32>
    %226 = arith.mulf %217, %166 : vector<8x128xf32>
    %227 = arith.mulf %211, %219 : vector<8x128xf32>
    %228 = arith.addf %226, %227 : vector<8x128xf32>
    %229 = math.tanh %228 : vector<8x128xf32>
    %230 = arith.mulf %225, %229 : vector<8x128xf32>
    %231 = arith.truncf %230 : vector<8x128xf32> to vector<8x128xbf16>
    %232 = arith.truncf %198 : vector<8x128xf32> to vector<8x128xbf16>
    %233 = tpu.concatenate %231, %232 in 1 : vector<8x128xbf16>, vector<8x128xbf16> -> vector<8x256xbf16>
    %cst_49 = arith.constant dense<0.000000e+00> : vector<8x512xf32>
    %234 = tpu.matmul %233, %8, %cst_49 {dimension_numbers = #tpu.dot_dimension_numbers<[1], [0], [0], [1], [0, 0, 1, 1], [], []>} : vector<8x256xbf16>, vector<256x512xbf16>, vector<8x512xf32> -> vector<8x512xf32>
    %235 = arith.addf %234, %11 : vector<8x512xf32>
    %236 = vector.extract_strided_slice %235 {offsets = [0, 0], sizes = [8, 128], strides = [1, 1]} : vector<8x512xf32> to vector<8x128xf32>
    %237 = arith.negf %236 : vector<8x128xf32>
    %238 = math.exp %237 : vector<8x128xf32>
    %cst_50 = arith.constant 1.000000e+00 : f32
    %239 = vector.broadcast %cst_50 : f32 to vector<8x128xf32>
    %240 = arith.addf %239, %238 : vector<8x128xf32>
    %241 = arith.divf %239, %240 : vector<8x128xf32>
    %242 = vector.extract_strided_slice %235 {offsets = [0, 128], sizes = [8, 128], strides = [1, 1]} : vector<8x512xf32> to vector<8x128xf32>
    %243 = arith.negf %242 : vector<8x128xf32>
    %244 = math.exp %243 : vector<8x128xf32>
    %cst_51 = arith.constant 1.000000e+00 : f32
    %245 = vector.broadcast %cst_51 : f32 to vector<8x128xf32>
    %246 = arith.addf %245, %244 : vector<8x128xf32>
    %247 = arith.divf %245, %246 : vector<8x128xf32>
    %248 = vector.extract_strided_slice %235 {offsets = [0, 256], sizes = [8, 128], strides = [1, 1]} : vector<8x512xf32> to vector<8x128xf32>
    %249 = math.tanh %248 : vector<8x128xf32>
    %250 = vector.extract_strided_slice %235 {offsets = [0, 384], sizes = [8, 128], strides = [1, 1]} : vector<8x512xf32> to vector<8x128xf32>
    %251 = arith.negf %250 : vector<8x128xf32>
    %252 = math.exp %251 : vector<8x128xf32>
    %cst_52 = arith.constant 1.000000e+00 : f32
    %253 = vector.broadcast %cst_52 : f32 to vector<8x128xf32>
    %254 = arith.addf %253, %252 : vector<8x128xf32>
    %255 = arith.divf %253, %254 : vector<8x128xf32>
    %256 = arith.mulf %247, %196 : vector<8x128xf32>
    %257 = arith.mulf %241, %249 : vector<8x128xf32>
    %258 = arith.addf %256, %257 : vector<8x128xf32>
    %259 = math.tanh %258 : vector<8x128xf32>
    %260 = arith.mulf %255, %259 : vector<8x128xf32>
    %c4_i32 = arith.constant 4 : i32
    %c8_i32_53 = arith.constant 8 : i32
    %261 = arith.muli %c4_i32, %c8_i32_53 : i32
    %262 = tpu.assume_multiple %261, 8 : i32
    %263 = arith.index_cast %262 : i32 to index
    %c0_54 = arith.constant 0 : index
    %264 = vector.load %arg9[%263, %c0_54] : memref<64x512xf32, #tpu.memory_space<vmem>>, vector<8x512xf32>
    %265 = arith.truncf %230 : vector<8x128xf32> to vector<8x128xbf16>
    %cst_55 = arith.constant dense<0.000000e+00> : vector<8x512xf32>
    %266 = tpu.matmul %265, %7, %cst_55 {dimension_numbers = #tpu.dot_dimension_numbers<[1], [0], [0], [1], [0, 0, 1, 1], [], []>} : vector<8x128xbf16>, vector<128x512xbf16>, vector<8x512xf32> -> vector<8x512xf32>
    %267 = arith.addf %264, %266 : vector<8x512xf32>
    %268 = vector.extract_strided_slice %267 {offsets = [0, 0], sizes = [8, 128], strides = [1, 1]} : vector<8x512xf32> to vector<8x128xf32>
    %269 = arith.negf %268 : vector<8x128xf32>
    %270 = math.exp %269 : vector<8x128xf32>
    %cst_56 = arith.constant 1.000000e+00 : f32
    %271 = vector.broadcast %cst_56 : f32 to vector<8x128xf32>
    %272 = arith.addf %271, %270 : vector<8x128xf32>
    %273 = arith.divf %271, %272 : vector<8x128xf32>
    %274 = vector.extract_strided_slice %267 {offsets = [0, 128], sizes = [8, 128], strides = [1, 1]} : vector<8x512xf32> to vector<8x128xf32>
    %275 = arith.negf %274 : vector<8x128xf32>
    %276 = math.exp %275 : vector<8x128xf32>
    %cst_57 = arith.constant 1.000000e+00 : f32
    %277 = vector.broadcast %cst_57 : f32 to vector<8x128xf32>
    %278 = arith.addf %277, %276 : vector<8x128xf32>
    %279 = arith.divf %277, %278 : vector<8x128xf32>
    %280 = vector.extract_strided_slice %267 {offsets = [0, 256], sizes = [8, 128], strides = [1, 1]} : vector<8x512xf32> to vector<8x128xf32>
    %281 = math.tanh %280 : vector<8x128xf32>
    %282 = vector.extract_strided_slice %267 {offsets = [0, 384], sizes = [8, 128], strides = [1, 1]} : vector<8x512xf32> to vector<8x128xf32>
    %283 = arith.negf %282 : vector<8x128xf32>
    %284 = math.exp %283 : vector<8x128xf32>
    %cst_58 = arith.constant 1.000000e+00 : f32
    %285 = vector.broadcast %cst_58 : f32 to vector<8x128xf32>
    %286 = arith.addf %285, %284 : vector<8x128xf32>
    %287 = arith.divf %285, %286 : vector<8x128xf32>
    %288 = arith.mulf %279, %228 : vector<8x128xf32>
    %289 = arith.mulf %273, %281 : vector<8x128xf32>
    %290 = arith.addf %288, %289 : vector<8x128xf32>
    %291 = math.tanh %290 : vector<8x128xf32>
    %292 = arith.mulf %287, %291 : vector<8x128xf32>
    %293 = arith.truncf %292 : vector<8x128xf32> to vector<8x128xbf16>
    %294 = arith.truncf %260 : vector<8x128xf32> to vector<8x128xbf16>
    %295 = tpu.concatenate %293, %294 in 1 : vector<8x128xbf16>, vector<8x128xbf16> -> vector<8x256xbf16>
    %cst_59 = arith.constant dense<0.000000e+00> : vector<8x512xf32>
    %296 = tpu.matmul %295, %8, %cst_59 {dimension_numbers = #tpu.dot_dimension_numbers<[1], [0], [0], [1], [0, 0, 1, 1], [], []>} : vector<8x256xbf16>, vector<256x512xbf16>, vector<8x512xf32> -> vector<8x512xf32>
    %297 = arith.addf %296, %11 : vector<8x512xf32>
    %298 = vector.extract_strided_slice %297 {offsets = [0, 0], sizes = [8, 128], strides = [1, 1]} : vector<8x512xf32> to vector<8x128xf32>
    %299 = arith.negf %298 : vector<8x128xf32>
    %300 = math.exp %299 : vector<8x128xf32>
    %cst_60 = arith.constant 1.000000e+00 : f32
    %301 = vector.broadcast %cst_60 : f32 to vector<8x128xf32>
    %302 = arith.addf %301, %300 : vector<8x128xf32>
    %303 = arith.divf %301, %302 : vector<8x128xf32>
    %304 = vector.extract_strided_slice %297 {offsets = [0, 128], sizes = [8, 128], strides = [1, 1]} : vector<8x512xf32> to vector<8x128xf32>
    %305 = arith.negf %304 : vector<8x128xf32>
    %306 = math.exp %305 : vector<8x128xf32>
    %cst_61 = arith.constant 1.000000e+00 : f32
    %307 = vector.broadcast %cst_61 : f32 to vector<8x128xf32>
    %308 = arith.addf %307, %306 : vector<8x128xf32>
    %309 = arith.divf %307, %308 : vector<8x128xf32>
    %310 = vector.extract_strided_slice %297 {offsets = [0, 256], sizes = [8, 128], strides = [1, 1]} : vector<8x512xf32> to vector<8x128xf32>
    %311 = math.tanh %310 : vector<8x128xf32>
    %312 = vector.extract_strided_slice %297 {offsets = [0, 384], sizes = [8, 128], strides = [1, 1]} : vector<8x512xf32> to vector<8x128xf32>
    %313 = arith.negf %312 : vector<8x128xf32>
    %314 = math.exp %313 : vector<8x128xf32>
    %cst_62 = arith.constant 1.000000e+00 : f32
    %315 = vector.broadcast %cst_62 : f32 to vector<8x128xf32>
    %316 = arith.addf %315, %314 : vector<8x128xf32>
    %317 = arith.divf %315, %316 : vector<8x128xf32>
    %318 = arith.mulf %309, %258 : vector<8x128xf32>
    %319 = arith.mulf %303, %311 : vector<8x128xf32>
    %320 = arith.addf %318, %319 : vector<8x128xf32>
    %321 = math.tanh %320 : vector<8x128xf32>
    %322 = arith.mulf %317, %321 : vector<8x128xf32>
    %c5_i32 = arith.constant 5 : i32
    %c8_i32_63 = arith.constant 8 : i32
    %323 = arith.muli %c5_i32, %c8_i32_63 : i32
    %324 = tpu.assume_multiple %323, 8 : i32
    %325 = arith.index_cast %324 : i32 to index
    %c0_64 = arith.constant 0 : index
    %326 = vector.load %arg9[%325, %c0_64] : memref<64x512xf32, #tpu.memory_space<vmem>>, vector<8x512xf32>
    %327 = arith.truncf %292 : vector<8x128xf32> to vector<8x128xbf16>
    %cst_65 = arith.constant dense<0.000000e+00> : vector<8x512xf32>
    %328 = tpu.matmul %327, %7, %cst_65 {dimension_numbers = #tpu.dot_dimension_numbers<[1], [0], [0], [1], [0, 0, 1, 1], [], []>} : vector<8x128xbf16>, vector<128x512xbf16>, vector<8x512xf32> -> vector<8x512xf32>
    %329 = arith.addf %326, %328 : vector<8x512xf32>
    %330 = vector.extract_strided_slice %329 {offsets = [0, 0], sizes = [8, 128], strides = [1, 1]} : vector<8x512xf32> to vector<8x128xf32>
    %331 = arith.negf %330 : vector<8x128xf32>
    %332 = math.exp %331 : vector<8x128xf32>
    %cst_66 = arith.constant 1.000000e+00 : f32
    %333 = vector.broadcast %cst_66 : f32 to vector<8x128xf32>
    %334 = arith.addf %333, %332 : vector<8x128xf32>
    %335 = arith.divf %333, %334 : vector<8x128xf32>
    %336 = vector.extract_strided_slice %329 {offsets = [0, 128], sizes = [8, 128], strides = [1, 1]} : vector<8x512xf32> to vector<8x128xf32>
    %337 = arith.negf %336 : vector<8x128xf32>
    %338 = math.exp %337 : vector<8x128xf32>
    %cst_67 = arith.constant 1.000000e+00 : f32
    %339 = vector.broadcast %cst_67 : f32 to vector<8x128xf32>
    %340 = arith.addf %339, %338 : vector<8x128xf32>
    %341 = arith.divf %339, %340 : vector<8x128xf32>
    %342 = vector.extract_strided_slice %329 {offsets = [0, 256], sizes = [8, 128], strides = [1, 1]} : vector<8x512xf32> to vector<8x128xf32>
    %343 = math.tanh %342 : vector<8x128xf32>
    %344 = vector.extract_strided_slice %329 {offsets = [0, 384], sizes = [8, 128], strides = [1, 1]} : vector<8x512xf32> to vector<8x128xf32>
    %345 = arith.negf %344 : vector<8x128xf32>
    %346 = math.exp %345 : vector<8x128xf32>
    %cst_68 = arith.constant 1.000000e+00 : f32
    %347 = vector.broadcast %cst_68 : f32 to vector<8x128xf32>
    %348 = arith.addf %347, %346 : vector<8x128xf32>
    %349 = arith.divf %347, %348 : vector<8x128xf32>
    %350 = arith.mulf %341, %290 : vector<8x128xf32>
    %351 = arith.mulf %335, %343 : vector<8x128xf32>
    %352 = arith.addf %350, %351 : vector<8x128xf32>
    %353 = math.tanh %352 : vector<8x128xf32>
    %354 = arith.mulf %349, %353 : vector<8x128xf32>
    %355 = arith.truncf %354 : vector<8x128xf32> to vector<8x128xbf16>
    %356 = arith.truncf %322 : vector<8x128xf32> to vector<8x128xbf16>
    %357 = tpu.concatenate %355, %356 in 1 : vector<8x128xbf16>, vector<8x128xbf16> -> vector<8x256xbf16>
    %cst_69 = arith.constant dense<0.000000e+00> : vector<8x512xf32>
    %358 = tpu.matmul %357, %8, %cst_69 {dimension_numbers = #tpu.dot_dimension_numbers<[1], [0], [0], [1], [0, 0, 1, 1], [], []>} : vector<8x256xbf16>, vector<256x512xbf16>, vector<8x512xf32> -> vector<8x512xf32>
    %359 = arith.addf %358, %11 : vector<8x512xf32>
    %360 = vector.extract_strided_slice %359 {offsets = [0, 0], sizes = [8, 128], strides = [1, 1]} : vector<8x512xf32> to vector<8x128xf32>
    %361 = arith.negf %360 : vector<8x128xf32>
    %362 = math.exp %361 : vector<8x128xf32>
    %cst_70 = arith.constant 1.000000e+00 : f32
    %363 = vector.broadcast %cst_70 : f32 to vector<8x128xf32>
    %364 = arith.addf %363, %362 : vector<8x128xf32>
    %365 = arith.divf %363, %364 : vector<8x128xf32>
    %366 = vector.extract_strided_slice %359 {offsets = [0, 128], sizes = [8, 128], strides = [1, 1]} : vector<8x512xf32> to vector<8x128xf32>
    %367 = arith.negf %366 : vector<8x128xf32>
    %368 = math.exp %367 : vector<8x128xf32>
    %cst_71 = arith.constant 1.000000e+00 : f32
    %369 = vector.broadcast %cst_71 : f32 to vector<8x128xf32>
    %370 = arith.addf %369, %368 : vector<8x128xf32>
    %371 = arith.divf %369, %370 : vector<8x128xf32>
    %372 = vector.extract_strided_slice %359 {offsets = [0, 256], sizes = [8, 128], strides = [1, 1]} : vector<8x512xf32> to vector<8x128xf32>
    %373 = math.tanh %372 : vector<8x128xf32>
    %374 = vector.extract_strided_slice %359 {offsets = [0, 384], sizes = [8, 128], strides = [1, 1]} : vector<8x512xf32> to vector<8x128xf32>
    %375 = arith.negf %374 : vector<8x128xf32>
    %376 = math.exp %375 : vector<8x128xf32>
    %cst_72 = arith.constant 1.000000e+00 : f32
    %377 = vector.broadcast %cst_72 : f32 to vector<8x128xf32>
    %378 = arith.addf %377, %376 : vector<8x128xf32>
    %379 = arith.divf %377, %378 : vector<8x128xf32>
    %380 = arith.mulf %371, %320 : vector<8x128xf32>
    %381 = arith.mulf %365, %373 : vector<8x128xf32>
    %382 = arith.addf %380, %381 : vector<8x128xf32>
    %383 = math.tanh %382 : vector<8x128xf32>
    %384 = arith.mulf %379, %383 : vector<8x128xf32>
    %c6_i32 = arith.constant 6 : i32
    %c8_i32_73 = arith.constant 8 : i32
    %385 = arith.muli %c6_i32, %c8_i32_73 : i32
    %386 = tpu.assume_multiple %385, 8 : i32
    %387 = arith.index_cast %386 : i32 to index
    %c0_74 = arith.constant 0 : index
    %388 = vector.load %arg9[%387, %c0_74] : memref<64x512xf32, #tpu.memory_space<vmem>>, vector<8x512xf32>
    %389 = arith.truncf %354 : vector<8x128xf32> to vector<8x128xbf16>
    %cst_75 = arith.constant dense<0.000000e+00> : vector<8x512xf32>
    %390 = tpu.matmul %389, %7, %cst_75 {dimension_numbers = #tpu.dot_dimension_numbers<[1], [0], [0], [1], [0, 0, 1, 1], [], []>} : vector<8x128xbf16>, vector<128x512xbf16>, vector<8x512xf32> -> vector<8x512xf32>
    %391 = arith.addf %388, %390 : vector<8x512xf32>
    %392 = vector.extract_strided_slice %391 {offsets = [0, 0], sizes = [8, 128], strides = [1, 1]} : vector<8x512xf32> to vector<8x128xf32>
    %393 = arith.negf %392 : vector<8x128xf32>
    %394 = math.exp %393 : vector<8x128xf32>
    %cst_76 = arith.constant 1.000000e+00 : f32
    %395 = vector.broadcast %cst_76 : f32 to vector<8x128xf32>
    %396 = arith.addf %395, %394 : vector<8x128xf32>
    %397 = arith.divf %395, %396 : vector<8x128xf32>
    %398 = vector.extract_strided_slice %391 {offsets = [0, 128], sizes = [8, 128], strides = [1, 1]} : vector<8x512xf32> to vector<8x128xf32>
    %399 = arith.negf %398 : vector<8x128xf32>
    %400 = math.exp %399 : vector<8x128xf32>
    %cst_77 = arith.constant 1.000000e+00 : f32
    %401 = vector.broadcast %cst_77 : f32 to vector<8x128xf32>
    %402 = arith.addf %401, %400 : vector<8x128xf32>
    %403 = arith.divf %401, %402 : vector<8x128xf32>
    %404 = vector.extract_strided_slice %391 {offsets = [0, 256], sizes = [8, 128], strides = [1, 1]} : vector<8x512xf32> to vector<8x128xf32>
    %405 = math.tanh %404 : vector<8x128xf32>
    %406 = vector.extract_strided_slice %391 {offsets = [0, 384], sizes = [8, 128], strides = [1, 1]} : vector<8x512xf32> to vector<8x128xf32>
    %407 = arith.negf %406 : vector<8x128xf32>
    %408 = math.exp %407 : vector<8x128xf32>
    %cst_78 = arith.constant 1.000000e+00 : f32
    %409 = vector.broadcast %cst_78 : f32 to vector<8x128xf32>
    %410 = arith.addf %409, %408 : vector<8x128xf32>
    %411 = arith.divf %409, %410 : vector<8x128xf32>
    %412 = arith.mulf %403, %352 : vector<8x128xf32>
    %413 = arith.mulf %397, %405 : vector<8x128xf32>
    %414 = arith.addf %412, %413 : vector<8x128xf32>
    %415 = math.tanh %414 : vector<8x128xf32>
    %416 = arith.mulf %411, %415 : vector<8x128xf32>
    %417 = arith.truncf %416 : vector<8x128xf32> to vector<8x128xbf16>
    %418 = arith.truncf %384 : vector<8x128xf32> to vector<8x128xbf16>
    %419 = tpu.concatenate %417, %418 in 1 : vector<8x128xbf16>, vector<8x128xbf16> -> vector<8x256xbf16>
    %cst_79 = arith.constant dense<0.000000e+00> : vector<8x512xf32>
    %420 = tpu.matmul %419, %8, %cst_79 {dimension_numbers = #tpu.dot_dimension_numbers<[1], [0], [0], [1], [0, 0, 1, 1], [], []>} : vector<8x256xbf16>, vector<256x512xbf16>, vector<8x512xf32> -> vector<8x512xf32>
    %421 = arith.addf %420, %11 : vector<8x512xf32>
    %422 = vector.extract_strided_slice %421 {offsets = [0, 0], sizes = [8, 128], strides = [1, 1]} : vector<8x512xf32> to vector<8x128xf32>
    %423 = arith.negf %422 : vector<8x128xf32>
    %424 = math.exp %423 : vector<8x128xf32>
    %cst_80 = arith.constant 1.000000e+00 : f32
    %425 = vector.broadcast %cst_80 : f32 to vector<8x128xf32>
    %426 = arith.addf %425, %424 : vector<8x128xf32>
    %427 = arith.divf %425, %426 : vector<8x128xf32>
    %428 = vector.extract_strided_slice %421 {offsets = [0, 128], sizes = [8, 128], strides = [1, 1]} : vector<8x512xf32> to vector<8x128xf32>
    %429 = arith.negf %428 : vector<8x128xf32>
    %430 = math.exp %429 : vector<8x128xf32>
    %cst_81 = arith.constant 1.000000e+00 : f32
    %431 = vector.broadcast %cst_81 : f32 to vector<8x128xf32>
    %432 = arith.addf %431, %430 : vector<8x128xf32>
    %433 = arith.divf %431, %432 : vector<8x128xf32>
    %434 = vector.extract_strided_slice %421 {offsets = [0, 256], sizes = [8, 128], strides = [1, 1]} : vector<8x512xf32> to vector<8x128xf32>
    %435 = math.tanh %434 : vector<8x128xf32>
    %436 = vector.extract_strided_slice %421 {offsets = [0, 384], sizes = [8, 128], strides = [1, 1]} : vector<8x512xf32> to vector<8x128xf32>
    %437 = arith.negf %436 : vector<8x128xf32>
    %438 = math.exp %437 : vector<8x128xf32>
    %cst_82 = arith.constant 1.000000e+00 : f32
    %439 = vector.broadcast %cst_82 : f32 to vector<8x128xf32>
    %440 = arith.addf %439, %438 : vector<8x128xf32>
    %441 = arith.divf %439, %440 : vector<8x128xf32>
    %442 = arith.mulf %433, %382 : vector<8x128xf32>
    %443 = arith.mulf %427, %435 : vector<8x128xf32>
    %444 = arith.addf %442, %443 : vector<8x128xf32>
    %445 = math.tanh %444 : vector<8x128xf32>
    %446 = arith.mulf %441, %445 : vector<8x128xf32>
    %c7_i32 = arith.constant 7 : i32
    %c8_i32_83 = arith.constant 8 : i32
    %447 = arith.muli %c7_i32, %c8_i32_83 : i32
    %448 = tpu.assume_multiple %447, 8 : i32
    %449 = arith.index_cast %448 : i32 to index
    %c0_84 = arith.constant 0 : index
    %450 = vector.load %arg9[%449, %c0_84] : memref<64x512xf32, #tpu.memory_space<vmem>>, vector<8x512xf32>
    %451 = arith.truncf %416 : vector<8x128xf32> to vector<8x128xbf16>
    %cst_85 = arith.constant dense<0.000000e+00> : vector<8x512xf32>
    %452 = tpu.matmul %451, %7, %cst_85 {dimension_numbers = #tpu.dot_dimension_numbers<[1], [0], [0], [1], [0, 0, 1, 1], [], []>} : vector<8x128xbf16>, vector<128x512xbf16>, vector<8x512xf32> -> vector<8x512xf32>
    %453 = arith.addf %450, %452 : vector<8x512xf32>
    %454 = vector.extract_strided_slice %453 {offsets = [0, 0], sizes = [8, 128], strides = [1, 1]} : vector<8x512xf32> to vector<8x128xf32>
    %455 = arith.negf %454 : vector<8x128xf32>
    %456 = math.exp %455 : vector<8x128xf32>
    %cst_86 = arith.constant 1.000000e+00 : f32
    %457 = vector.broadcast %cst_86 : f32 to vector<8x128xf32>
    %458 = arith.addf %457, %456 : vector<8x128xf32>
    %459 = arith.divf %457, %458 : vector<8x128xf32>
    %460 = vector.extract_strided_slice %453 {offsets = [0, 128], sizes = [8, 128], strides = [1, 1]} : vector<8x512xf32> to vector<8x128xf32>
    %461 = arith.negf %460 : vector<8x128xf32>
    %462 = math.exp %461 : vector<8x128xf32>
    %cst_87 = arith.constant 1.000000e+00 : f32
    %463 = vector.broadcast %cst_87 : f32 to vector<8x128xf32>
    %464 = arith.addf %463, %462 : vector<8x128xf32>
    %465 = arith.divf %463, %464 : vector<8x128xf32>
    %466 = vector.extract_strided_slice %453 {offsets = [0, 256], sizes = [8, 128], strides = [1, 1]} : vector<8x512xf32> to vector<8x128xf32>
    %467 = math.tanh %466 : vector<8x128xf32>
    %468 = vector.extract_strided_slice %453 {offsets = [0, 384], sizes = [8, 128], strides = [1, 1]} : vector<8x512xf32> to vector<8x128xf32>
    %469 = arith.negf %468 : vector<8x128xf32>
    %470 = math.exp %469 : vector<8x128xf32>
    %cst_88 = arith.constant 1.000000e+00 : f32
    %471 = vector.broadcast %cst_88 : f32 to vector<8x128xf32>
    %472 = arith.addf %471, %470 : vector<8x128xf32>
    %473 = arith.divf %471, %472 : vector<8x128xf32>
    %474 = arith.mulf %465, %414 : vector<8x128xf32>
    %475 = arith.mulf %459, %467 : vector<8x128xf32>
    %476 = arith.addf %474, %475 : vector<8x128xf32>
    %477 = math.tanh %476 : vector<8x128xf32>
    %478 = arith.mulf %473, %477 : vector<8x128xf32>
    %479 = arith.truncf %478 : vector<8x128xf32> to vector<8x128xbf16>
    %480 = arith.truncf %446 : vector<8x128xf32> to vector<8x128xbf16>
    %481 = tpu.concatenate %479, %480 in 1 : vector<8x128xbf16>, vector<8x128xbf16> -> vector<8x256xbf16>
    %cst_89 = arith.constant dense<0.000000e+00> : vector<8x512xf32>
    %482 = tpu.matmul %481, %8, %cst_89 {dimension_numbers = #tpu.dot_dimension_numbers<[1], [0], [0], [1], [0, 0, 1, 1], [], []>} : vector<8x256xbf16>, vector<256x512xbf16>, vector<8x512xf32> -> vector<8x512xf32>
    %483 = arith.addf %482, %11 : vector<8x512xf32>
    %484 = vector.extract_strided_slice %483 {offsets = [0, 0], sizes = [8, 128], strides = [1, 1]} : vector<8x512xf32> to vector<8x128xf32>
    %485 = arith.negf %484 : vector<8x128xf32>
    %486 = math.exp %485 : vector<8x128xf32>
    %cst_90 = arith.constant 1.000000e+00 : f32
    %487 = vector.broadcast %cst_90 : f32 to vector<8x128xf32>
    %488 = arith.addf %487, %486 : vector<8x128xf32>
    %489 = arith.divf %487, %488 : vector<8x128xf32>
    %490 = vector.extract_strided_slice %483 {offsets = [0, 128], sizes = [8, 128], strides = [1, 1]} : vector<8x512xf32> to vector<8x128xf32>
    %491 = arith.negf %490 : vector<8x128xf32>
    %492 = math.exp %491 : vector<8x128xf32>
    %cst_91 = arith.constant 1.000000e+00 : f32
    %493 = vector.broadcast %cst_91 : f32 to vector<8x128xf32>
    %494 = arith.addf %493, %492 : vector<8x128xf32>
    %495 = arith.divf %493, %494 : vector<8x128xf32>
    %496 = vector.extract_strided_slice %483 {offsets = [0, 256], sizes = [8, 128], strides = [1, 1]} : vector<8x512xf32> to vector<8x128xf32>
    %497 = math.tanh %496 : vector<8x128xf32>
    %498 = vector.extract_strided_slice %483 {offsets = [0, 384], sizes = [8, 128], strides = [1, 1]} : vector<8x512xf32> to vector<8x128xf32>
    %499 = arith.negf %498 : vector<8x128xf32>
    %500 = math.exp %499 : vector<8x128xf32>
    %cst_92 = arith.constant 1.000000e+00 : f32
    %501 = vector.broadcast %cst_92 : f32 to vector<8x128xf32>
    %502 = arith.addf %501, %500 : vector<8x128xf32>
    %503 = arith.divf %501, %502 : vector<8x128xf32>
    %504 = arith.mulf %495, %444 : vector<8x128xf32>
    %505 = arith.mulf %489, %497 : vector<8x128xf32>
    %506 = arith.addf %504, %505 : vector<8x128xf32>
    %507 = math.tanh %506 : vector<8x128xf32>
    %508 = arith.mulf %503, %507 : vector<8x128xf32>
    %c8_i32_93 = arith.constant 8 : i32
    %509 = arith.truncf %508 : vector<8x128xf32> to vector<8x128xbf16>
    %c0_94 = arith.constant 0 : index
    %c0_95 = arith.constant 0 : index
    %510 = vector.load %arg6[%c0_94, %c0_95] : memref<128x6xbf16, #tpu.memory_space<vmem>>, vector<128x6xbf16>
    %cst_96 = arith.constant dense<0.000000e+00> : vector<8x6xf32>
    %511 = tpu.matmul %509, %510, %cst_96 {dimension_numbers = #tpu.dot_dimension_numbers<[1], [0], [0], [1], [0, 0, 1, 1], [], []>} : vector<8x128xbf16>, vector<128x6xbf16>, vector<8x6xf32> -> vector<8x6xf32>
    %c0_97 = arith.constant 0 : index
    %c0_98 = arith.constant 0 : index
    %512 = vector.load %arg7[%c0_97, %c0_98] : memref<1x6xf32, #tpu.memory_space<vmem>>, vector<1x6xf32>
    %513 = vector.broadcast %512 : vector<1x6xf32> to vector<8x6xf32>
    %514 = arith.addf %511, %513 : vector<8x6xf32>
    %c0_99 = arith.constant 0 : index
    %c0_100 = arith.constant 0 : index
    %515 = vector.load %arg8[%c0_99, %c0_100] : memref<8x6xf32, #tpu.memory_space<vmem>>, vector<8x6xf32>
    tpu.vector_store %arg8[%c0_99, %c0_100], %514 {strides = array<i32>} : memref<8x6xf32, #tpu.memory_space<vmem>>, vector<8x6xf32>,
    return
  }
}

</mosaic_0001>

<bundles_post_ra>
// kernel: tpu_custom_call.1
= control target key start
LH: loop header
LB: loop body
LE: loop exit
PB: predicated region body
PF: predicated region fallthrough
CT: control target
= control target key end

     0   :  { %13 = vsyncpa [#allocation4], 0  ;;  %s6028_s0 = inlined_call_operand.vmem [shape: f32[64,8], index: 0, kind: input, shape index: {}]   ;;  %s6029_s1 = inlined_call_operand.vmem [shape: f32[8,512], index: 1, kind: input, shape index: {}]   ;;  %s6030_s2 = inlined_call_operand.vmem [shape: f32[1,512], index: 2, kind: input, shape index: {}]   ;;  %s6031_s3 = inlined_call_operand.hbm [shape: bf16[128,512], index: 3, kind: input, shape index: {}]   ;;  %s6032_s4 = inlined_call_operand.hbm [shape: bf16[256,512], index: 4, kind: input, shape index: {}]   ;;  %s6033_s5 = inlined_call_operand.vmem [shape: f32[1,512], index: 5, kind: input, shape index: {}]   ;;  %s6034_s6 = inlined_call_operand.vmem [shape: bf16[128,6], index: 6, kind: input, shape index: {}]   ;;  %s6035_s7 = inlined_call_operand.vmem [shape: f32[1,6], index: 7, kind: input, shape index: {}]   ;;  %s6036_s8 = inlined_call_operand.hbm [shape: f32[8,6], index: 8, kind: output, shape index: {}]  }
   0x1   :  { %14 = vsyncpa [#allocation7], 0 }
   0x2   :  { %15 = vsyncpa [#allocation5], 0  ;;  %s26_s29 = sshll.u32 %s6031_s3, 4  ;;  %s4304_s30 = smov [#allocation3]   ;;  %s27_s29 = int_to_ptr.hbm [resolvable:$true] %s26_s29 }
   0x3   :  { %s28_s9 = sshll.u32 %s4304_s30, 4  ;;  %s39_s12 = sshll.u32 %s6032_s4, 4  ;;  %s29_s9 = int_to_ptr.vmem [resolvable:$true] %s28_s9  ;;  %s40_s12 = int_to_ptr.hbm [resolvable:$true] %s39_s12 }
   0x4   :  { %s4305_s13 = smov 256   ;;  %s4306_s14 = smov 16  }
   0x5   :  { %34 = dma.hbm_to_vmem [thread:$0]  %s27_s29, 4096, %s29_s9, [#allocation4], %s4305_s13, %s4305_s13, %s4306_s14  }
   0x6   :  { %s4307_s15 = smov [#allocation6]  }
   0x7   :  { %s41_s16 = sshll.u32 %s4307_s15, 4  ;;  %s42_s16 = int_to_ptr.vmem [resolvable:$true] %s41_s16 }
   0x8   :  { %47 = dma.hbm_to_vmem [thread:$0]  %s40_s12, 8192, %s42_s16, [#allocation7], %s4305_s13, %s4305_s13, %s4306_s14  }
   0x9   :  { %4298 = dma.done.wait [#allocation4], 4096  }
   0xa   :  { %4299 = vsyncadd [#allocation4], 4294963200 }
   0xb   :  { %4300 = dma.done.wait [#allocation7], 8192  }
   0xc   :  { %4301 = vsyncadd [#allocation7], 4294959104  ;;  %v71_v0 = vld [vmem:[%s6029_s1] sm:$0xff]  ;;  %vm85_vm0 = vcmask 64512   ;;  %v4370_v2 = vld [vmem:[%s6028_s0 + $0x28] sm:$0xff]  ;;  %s4309_s9 = smov [#allocation8]  }
   0xd   :  { %v63_v1 = vld [vmem:[%s6028_s0] sm:$0xff]  ;;  %125 = vmatpush.msra.mxu0 %v71_v0  ;;  %3960 = vmatpush.msra.mxu1 %v71_v0  ;;  %v4375_v3 = vld [vmem:[%s6028_s0 + $0x30] sm:$0xff]  ;;  %v4380_v4 = vld [vmem:[%s6028_s0 + $0x38] sm:$0xff]  ;;  %s3340_s10 = sshll.u32 %s4309_s9, 4  ;;  %s3342_s13 = sshll.u32 %s6036_s8, 4  ;;  %s3341_s10 = int_to_ptr.vmem [resolvable:$true] %s3340_s10  ;;  %s3343_s13 = int_to_ptr.hbm [resolvable:$true] %s3342_s13 }
   0xe   :  { %3961 = vmatpush.msra.mxu2 %v71_v0  ;;  %3962 = vmatpush.msra.mxu3 %v71_v0  ;;  %v72_v5 = vld [vmem:[%s6029_s1 + $0x8] sm:$0xff]  ;;  %v74_v6 = vld [vmem:[%s6029_s1 + $0x18] sm:$0xff]  ;;  %v73_v7 = vld [vmem:[%s6029_s1 + $0x10] sm:$0xff] }
   0xf   :  { %3360 = vmatmul.msk.f32.vlgmr.msra.gmra.mxu0 %vm85_vm0, %v63_v1  ;;  %3365 = vmatmul.msk.f32.vlgmr.msra.gmra.mxu1 %vm85_vm0, %v4370_v2  ;;  %v3884_v8 = vld [vmem:[#allocation3 + $0xe4] sm:$0xf]  ;;  %v3508_v9 = vld [vmem:[#allocation3 + $0xf0] sm:$0xf0]  ;;  %v3506_v10 = vld [vmem:[#allocation3 + $0xe0] sm:$0xf] }
  0x10   :  { %3366 = vmatmul.msk.f32.vlgmr.msra.gmra.mxu2 %vm85_vm0, %v4375_v3  ;;  %3367 = vmatmul.msk.f32.vlgmr.msra.gmra.mxu3 %vm85_vm0, %v4380_v4  ;;  %v4398_v11 = vor.u32 %v3884_v8, %v3508_v9  ;;  %v3886_v12 = vld [vmem:[#allocation3 + $0xec] sm:$0xf0]  ;;  %v3490_v14 = vld [vmem:[#allocation3 + $0xc0] sm:$0xf]  ;;  %v3885_v15 = vld [vmem:[#allocation3 + $0xec] sm:$0xf] }
  0x11   :  { %166 = vmatpush.msrb.mxu1 %v72_v5  ;;  %248 = vmatpush.msrb.mxu3 %v74_v6  ;;  %v4400_v13 = vor.u32 %v3886_v12, %v3506_v10  ;;  %v3516_v16 = vld [vmem:[#allocation3 + $0xf8] sm:$0xf0]  ;;  %v3882_v17 = vld [vmem:[#allocation3 + $0xcc] sm:$0xf0]  ;;  %v3880_v19 = vld [vmem:[#allocation3 + $0xc4] sm:$0xf] }
  0x12   :  { %6253 = vst [vmem:[#allocation12_spill] sm:$0xff] %v4398_v11  ;;  %207 = vmatpush.msrb.mxu2 %v73_v7  ;;  %v4403_v18 = vor.u32 %v3885_v15, %v3516_v16  ;;  %v3492_v20 = vld [vmem:[#allocation3 + $0xd0] sm:$0xf0]  ;;  %v64_v21 = vld [vmem:[%s6028_s0 + $0x8] sm:$0xff]  ;;  %v3500_v24 = vld [vmem:[#allocation3 + $0xd8] sm:$0xf0]  ;;  %v4412_v26 = vor.u32 %v3882_v17, %v3490_v14 }
  0x13   :  { %592 = vmatpush.bf16.msra.mxu1 %v4398_v11  ;;  %579 = vmatpush.bf16.msrb.mxu0 %v4400_v13  ;;  %v4409_v22 = vor.u32 %v3880_v19, %v3492_v20  ;;  %v3881_v23 = vld [vmem:[#allocation3 + $0xcc] sm:$0xf]  ;;  %v3514_v25 = vld [vmem:[#allocation3 + $0xe8] sm:$0xf]  ;;  %v3887_v28 = vld [vmem:[#allocation3 + $0xf4] sm:$0xf0] }
  0x14   :  { %6254 = vst [vmem:[#allocation13_spill] sm:$0xff] %v4403_v18  ;;  %618 = vmatpush.bf16.msra.mxu3 %v4403_v18  ;;  %v4414_v27 = vor.u32 %v3881_v23, %v3500_v24  ;;  %v3876_v29 = vld [vmem:[#allocation3 + $0xa4] sm:$0xf]  ;;  %v3474_v30 = vld [vmem:[#allocation3 + $0xa0] sm:$0xf]  ;;  %v4417_v32 = vor.u32 %v3887_v28, %v3514_v25  ;;  %v65_v47 = vld [vmem:[%s6028_s0 + $0x10] sm:$0xff] }
  0x15   :  { %6255 = vst [vmem:[#allocation14_spill] sm:$0xff] %v4409_v22  ;;  %v3878_v31 = vld [vmem:[#allocation3 + $0xac] sm:$0xf0]  ;;  %v3476_v33 = vld [vmem:[#allocation3 + $0xb0] sm:$0xf0]  ;;  %v66_v17 = vld [vmem:[%s6028_s0 + $0x18] sm:$0xff] }
  0x16   :  { %6256 = vst [vmem:[#allocation15_spill] sm:$0xff] %v4414_v27  ;;  %v4421_v34 = vor.u32 %v3876_v29, %v3476_v33  ;;  %v3877_v35 = vld [vmem:[#allocation3 + $0xac] sm:$0xf]  ;;  %v3484_v36 = vld [vmem:[#allocation3 + $0xb8] sm:$0xf0]  ;;  %v4426_v39 = vor.u32 %v3878_v31, %v3474_v30  ;;  %605 = vmatpush.bf16.msra.mxu2 %v4417_v32 }
  0x17   :  { %593 = vmatpush.bf16.msra.mxu1 %v4409_v22  ;;  %3361 = vmatmul.msk.f32.gmra.mxu0 %vm85_vm0, %v64_v21  ;;  %v3498_v37 = vld [vmem:[#allocation3 + $0xc8] sm:$0xf]  ;;  %v3883_v38 = vld [vmem:[#allocation3 + $0xd4] sm:$0xf0]  ;;  %v4429_v40 = vor.u32 %v3877_v35, %v3484_v36  ;;  %v3872_v41 = vld [vmem:[#allocation3 + $0x84] sm:$0xf] }
  0x18   :  { %3368 = vmatmul.msk.f32.vlgmr.msrb.gmra.mxu1 %vm85_vm0, %v63_v1  ;;  %6257 = vst [vmem:[#allocation16_spill] sm:$0xff] %v4421_v34  ;;  %3376 = vmatmul.msk.f32.vlgmr.msrb.gmra.mxu2 %vm85_vm0, %v63_v1  ;;  %v3460_v42 = vld [vmem:[#allocation3 + $0x90] sm:$0xf0]  ;;  %v3458_v43 = vld [vmem:[#allocation3 + $0x80] sm:$0xf]  ;;  %v4433_v45 = vor.u32 %v3883_v38, %v3498_v37 }
  0x19   :  { %3384 = vmatmul.msk.f32.vlgmr.msrb.gmra.mxu3 %vm85_vm0, %v63_v1  ;;  %580 = vmatpush.bf16.msrb.mxu0 %v4412_v26  ;;  %6258 = vst [vmem:[#allocation17_spill] sm:$0xff] %v4426_v39  ;;  %v3874_v44 = vld [vmem:[#allocation3 + $0x8c] sm:$0xf0]  ;;  %v4435_v46 = vor.u32 %v3872_v41, %v3460_v42  ;;  %v3873_v48 = vld [vmem:[#allocation3 + $0x8c] sm:$0xf] }
  0x1a   :  { %619 = vmatpush.bf16.msra.mxu3 %v4414_v27  ;;  %6259 = vst [vmem:[#allocation18_spill] sm:$0xff] %v4429_v40  ;;  %v3468_v49 = vld [vmem:[#allocation3 + $0x98] sm:$0xf0]  ;;  %v3482_v50 = vld [vmem:[#allocation3 + $0xa8] sm:$0xf]  ;;  %v4441_v53 = vor.u32 %v3874_v44, %v3458_v43  ;;  %606 = vmatpush.bf16.msra.mxu2 %v4433_v45  ;;  %v67_v43 = vld [vmem:[%s6028_s0 + $0x20] sm:$0xff] }
  0x1b   :  { %594 = vmatpush.bf16.msra.mxu1 %v4421_v34  ;;  %6260 = vst [vmem:[#allocation19_spill] sm:$0xff] %v4435_v46  ;;  %v3879_v51 = vld [vmem:[#allocation3 + $0xb4] sm:$0xf0]  ;;  %v3868_v52 = vld [vmem:[#allocation3 + $0x64] sm:$0xf]  ;;  %v4444_v56 = vor.u32 %v3873_v48, %v3468_v49 }
  0x1c   :  { %6261 = vst [vmem:[#allocation20_spill] sm:$0xff] %v4441_v53  ;;  %v3442_v54 = vld [vmem:[#allocation3 + $0x60] sm:$0xf]  ;;  %v3870_v55 = vld [vmem:[#allocation3 + $0x6c] sm:$0xf0]  ;;  %v4448_v58 = vor.u32 %v3879_v51, %v3482_v50 }
  0x1d   :  { %581 = vmatpush.bf16.msrb.mxu0 %v4426_v39  ;;  %6262 = vst [vmem:[#allocation21_spill] sm:$0xff] %v4444_v56  ;;  %v3444_v57 = vld [vmem:[#allocation3 + $0x70] sm:$0xf0]  ;;  %v3869_v60 = vld [vmem:[#allocation3 + $0x6c] sm:$0xf]  ;;  %v4457_v5 = vor.u32 %v3870_v55, %v3442_v54 }
  0x1e   :  { %620 = vmatpush.bf16.msra.mxu3 %v4429_v40  ;;  %6263 = vst [vmem:[#allocation22_spill] sm:$0xff] %v4448_v58  ;;  %v4450_v59 = vor.u32 %v3868_v52, %v3444_v57  ;;  %v3452_v61 = vld [vmem:[#allocation3 + $0x78] sm:$0xf0]  ;;  %v3466_v62 = vld [vmem:[#allocation3 + $0x88] sm:$0xf]  ;;  %607 = vmatpush.bf16.msra.mxu2 %v4448_v58 }
  0x1f   :  { %595 = vmatpush.bf16.msra.mxu1 %v4435_v46  ;;  %3362 = vmatmul.msk.f32.gmra.mxu0 %vm85_vm0, %v65_v47  ;;  %v3875_v63 = vld [vmem:[#allocation3 + $0x94] sm:$0xf0]  ;;  %v3864_v0 = vld [vmem:[#allocation3 + $0x44] sm:$0xf]  ;;  %v3428_v1 = vld [vmem:[#allocation3 + $0x50] sm:$0xf0]  ;;  %v4460_v7 = vor.u32 %v3869_v60, %v3452_v61 }
  0x20   :  { %6264 = vst [vmem:[#allocation23_spill] sm:$0xff] %v4450_v59  ;;  %3369 = vmatmul.msk.f32.gmra.mxu1 %vm85_vm0, %v64_v21  ;;  %3377 = vmatmul.msk.f32.gmra.mxu2 %vm85_vm0, %v64_v21  ;;  %v3426_v6 = vld [vmem:[#allocation3 + $0x40] sm:$0xf]  ;;  %v3866_v8 = vld [vmem:[#allocation3 + $0x4c] sm:$0xf0]  ;;  %v4464_v9 = vor.u32 %v3875_v63, %v3466_v62  ;;  %v4466_v10 = vor.u32 %v3864_v0, %v3428_v1  ;;  %v6037_v63 = vmov 0  }
  0x21   :  { %3385 = vmatmul.msk.f32.gmra.mxu3 %vm85_vm0, %v64_v21  ;;  %582 = vmatpush.bf16.msrb.mxu0 %v4441_v53  ;;  %6265 = vst [vmem:[#allocation24_spill] sm:$0xff] %v4457_v5  ;;  %v3865_v12 = vld [vmem:[#allocation3 + $0x4c] sm:$0xf]  ;;  %v3436_v14 = vld [vmem:[#allocation3 + $0x58] sm:$0xf0]  ;;  %v4472_v19 = vor.u32 %v3866_v8, %v3426_v6 }
  0x22   :  { %621 = vmatpush.bf16.msra.mxu3 %v4444_v56  ;;  %6266 = vst [vmem:[#allocation25_spill] sm:$0xff] %v4460_v7  ;;  %v3450_v15 = vld [vmem:[#allocation3 + $0x68] sm:$0xf]  ;;  %v3871_v16 = vld [vmem:[#allocation3 + $0x74] sm:$0xf0]  ;;  %v4475_v20 = vor.u32 %v3865_v12, %v3436_v14  ;;  %608 = vmatpush.bf16.msra.mxu2 %v4464_v9 }
  0x23   :  { %596 = vmatpush.bf16.msra.mxu1 %v4450_v59  ;;  %6267 = vst [vmem:[#allocation26_spill] sm:$0xff] %v4464_v9  ;;  %v3410_v21 = vld [vmem:[#allocation3 + $0x20] sm:$0xf]  ;;  %v3862_v23 = vld [vmem:[#allocation3 + $0x2c] sm:$0xf0]  ;;  %v4479_v24 = vor.u32 %v3871_v16, %v3450_v15 }
  0x24   :  { %6268 = vst [vmem:[#allocation27_spill] sm:$0xff] %v4466_v10  ;;  %v3860_v25 = vld [vmem:[#allocation3 + $0x24] sm:$0xf]  ;;  %v3412_v28 = vld [vmem:[#allocation3 + $0x30] sm:$0xf0]  ;;  %v4486_v30 = vor.u32 %v3862_v23, %v3410_v21 }
  0x25   :  { %583 = vmatpush.bf16.msrb.mxu0 %v4457_v5  ;;  %6269 = vst [vmem:[#allocation28_spill] sm:$0xff] %v4472_v19  ;;  %v3434_v29 = vld [vmem:[#allocation3 + $0x48] sm:$0xf]  ;;  %v4489_v31 = vor.u32 %v3860_v25, %v3412_v28  ;;  %v3867_v33 = vld [vmem:[#allocation3 + $0x54] sm:$0xf0] }
  0x26   :  { %622 = vmatpush.bf16.msra.mxu3 %v4460_v7  ;;  %6270 = vst [vmem:[#allocation29_spill] sm:$0xff] %v4475_v20  ;;  %v3861_v35 = vld [vmem:[#allocation3 + $0x2c] sm:$0xf]  ;;  %v3420_v36 = vld [vmem:[#allocation3 + $0x38] sm:$0xf0]  ;;  %609 = vmatpush.bf16.msra.mxu2 %v4479_v24  ;;  %v4492_v41 = vor.u32 %v3867_v33, %v3434_v29 }
  0x27   :  { %597 = vmatpush.bf16.msra.mxu1 %v4466_v10  ;;  %6271 = vst [vmem:[#allocation30_spill] sm:$0xff] %v4479_v24  ;;  %3363 = vmatmul.msk.f32.gmra.mxu0 %vm85_vm0, %v66_v17  ;;  %v3394_v37 = vld [vmem:[#allocation3] sm:$0xf]  ;;  %v3858_v38 = vld [vmem:[#allocation3 + $0xc] sm:$0xf0]  ;;  %v4494_v42 = vor.u32 %v3861_v35, %v3420_v36 }
  0x28   :  { %3370 = vmatmul.msk.f32.gmra.mxu1 %vm85_vm0, %v65_v47  ;;  %3378 = vmatmul.msk.f32.gmra.mxu2 %vm85_vm0, %v65_v47  ;;  %6272 = vst [vmem:[#allocation31_spill] sm:$0xff] %v4486_v30  ;;  %v4501_v44 = vor.u32 %v3858_v38, %v3394_v37  ;;  %v3863_v48 = vld [vmem:[#allocation3 + $0x34] sm:$0xf0]  ;;  %v3856_v50 = vld [vmem:[#allocation3 + $0x4] sm:$0xf] }
  0x29   :  { %3386 = vmatmul.msk.f32.gmra.mxu3 %vm85_vm0, %v65_v47  ;;  %584 = vmatpush.bf16.msrb.mxu0 %v4472_v19  ;;  %6273 = vst [vmem:[#allocation32_spill] sm:$0xff] %v4489_v31  ;;  %v3418_v47 = vld [vmem:[#allocation3 + $0x28] sm:$0xf]  ;;  %v3396_v51 = vld [vmem:[#allocation3 + $0x10] sm:$0xf0] }
  0x2a   :  { %623 = vmatpush.bf16.msra.mxu3 %v4475_v20  ;;  %6274 = vst [vmem:[#allocation33_spill] sm:$0xff] %v4492_v41  ;;  %610 = vmatpush.bf16.msra.mxu2 %v4492_v41  ;;  %v4507_v49 = vor.u32 %v3863_v48, %v3418_v47  ;;  %v3402_v52 = vld [vmem:[#allocation3 + $0x8] sm:$0xf]  ;;  %v4512_v54 = vor.u32 %v3856_v50, %v3396_v51  ;;  %v3859_v55 = vld [vmem:[#allocation3 + $0x14] sm:$0xf0] }
  0x2b   :  { %598 = vmatpush.bf16.msra.mxu1 %v4489_v31  ;;  %6275 = vst [vmem:[#allocation34_spill] sm:$0xff] %v4501_v44  ;;  %v3857_v57 = vld [vmem:[#allocation3 + $0xc] sm:$0xf]  ;;  %v3404_v60 = vld [vmem:[#allocation3 + $0x18] sm:$0xf0]  ;;  %v4515_v61 = vor.u32 %v3859_v55, %v3402_v52 }
  0x2c   :  { %6276 = vst [vmem:[#allocation35_spill] sm:$0xff] %v4507_v49  ;;  %v4517_v62 = vor.u32 %v3857_v57, %v3404_v60  ;;  %v3950_v0 = vld [vmem:[#allocation6 + $0x1ec] sm:$0xf0]  ;;  %v3948_v1 = vld [vmem:[#allocation6 + $0x1e4] sm:$0xf] }
  0x2d   :  { %585 = vmatpush.bf16.msrb.mxu0 %v4486_v30  ;;  %6277 = vst [vmem:[#allocation36_spill] sm:$0xff] %v4512_v54  ;;  %v3749_v12 = vld [vmem:[#allocation6 + $0x1c0] sm:$0xf]  ;;  %v3944_v14 = vld [vmem:[#allocation6 + $0x1c4] sm:$0xf] }
  0x2e   :  { %624 = vmatpush.bf16.msra.mxu3 %v4494_v42  ;;  %611 = vmatpush.bf16.msra.mxu2 %v4507_v49  ;;  %6278 = vst [vmem:[#allocation37_spill] sm:$0xff] %v4515_v61  ;;  %v3751_v21 = vld [vmem:[#allocation6 + $0x1d0] sm:$0xf0]  ;;  %v3733_v25 = vld [vmem:[#allocation6 + $0x1a0] sm:$0xf] }
  0x2f   :  { %3364 = vmatmul.msk.f32.gmra.mxu0 %vm85_vm0, %v67_v43  ;;  %6279 = vst [vmem:[#allocation38_spill] sm:$0xff] %v4517_v62  ;;  %599 = vmatpush.bf16.msra.mxu1 %v4512_v54  ;;  %v4559_v23 = vor.u32 %v3944_v14, %v3751_v21  ;;  %v3942_v28 = vld [vmem:[#allocation6 + $0x1ac] sm:$0xf0]  ;;  %v3940_v29 = vld [vmem:[#allocation6 + $0x1a4] sm:$0xf] }
  0x30   :  { %3371 = vmatmul.msk.f32.gmra.mxu1 %vm85_vm0, %v66_v17  ;;  %3379 = vmatmul.msk.f32.gmra.mxu2 %vm85_vm0, %v66_v17  ;;  %v4562_v33 = vor.u32 %v3942_v28, %v3733_v25  ;;  %v3735_v35 = vld [vmem:[#allocation6 + $0x1b0] sm:$0xf0]  ;;  %v4567_v36 = vld [vmem:[%s6030_s2] sm:$0xf]  ;;  %v3938_v50 = vld [vmem:[#allocation6 + $0x18c] sm:$0xf0] }
  0x31   :  { %3387 = vmatmul.msk.f32.gmra.mxu3 %vm85_vm0, %v66_v17  ;;  %586 = vmatpush.bf16.msrb.mxu0 %v4501_v44  ;;  %6284 = vst [vmem:[#allocation43_spill] sm:$0xff] %v4559_v23  ;;  %v4570_v37 = vor.u32 %v3940_v29, %v3735_v35  ;;  %v4573_v38 = vperm.slane %v4567_v36, 0  ;;  %v3717_v48 = vld [vmem:[#allocation6 + $0x180] sm:$0xf]  ;;  %v3936_v51 = vld [vmem:[#allocation6 + $0x184] sm:$0xf] }
  0x32   :  { %625 = vmatpush.bf16.msra.mxu3 %v4517_v62  ;;  %612 = vmatpush.bf16.msra.mxu2 %v4515_v61  ;;  %6285 = vst [vmem:[#allocation44_spill] sm:$0xff] %v4562_v33  ;;  %v4583_v57 = vor.u32 %v3938_v50, %v3717_v48  ;;  %v3719_v60 = vld [vmem:[#allocation6 + $0x190] sm:$0xf0]  ;;  %v3685_v29 = vld [vmem:[#allocation6 + $0x140] sm:$0xf]  ;;  %v4651_v19 = vperm.slane %v4567_v36, 2 }
  0x33   :  { %6286 = vst [vmem:[#allocation45_spill] sm:$0xff] %v4570_v37  ;;  %v3703_v14 = vld [vmem:[#allocation6 + $0x170] sm:$0xf0]  ;;  %v3930_v35 = vld [vmem:[#allocation6 + $0x14c] sm:$0xf0]  ;;  %v4654_v24 = vperm.slane %v4567_v36, 3 }
  0x34   :  { %6287 = vst [vmem:[#allocation46_spill] sm:$0xff] %v4573_v38  ;;  %v3928_v48 = vld [vmem:[#allocation6 + $0x144] sm:$0xf]  ;;  %v3949_v49 = vld [vmem:[#allocation6 + $0x1ec] sm:$0xf] }
  0x35   :  { %6290 = vst [vmem:[#allocation49_spill] sm:$0xff] %v4583_v57  ;;  %v3775_v30 = vld [vmem:[#allocation6 + $0x1f8] sm:$0xf0]  ;;  %v3741_v9 = vld [vmem:[#allocation6 + $0x1a8] sm:$0xf] }
  0x36   :  { %v4638_v41 = vor.u32 %v3949_v49, %v3775_v30  ;;  %v3945_v30 = vld [vmem:[#allocation6 + $0x1cc] sm:$0xf]  ;;  %v3759_v49 = vld [vmem:[#allocation6 + $0x1d8] sm:$0xf0]  ;;  %6314 = vst [vmem:[#allocation72_spill] sm:$0xff] %v4651_v19 }
  0x37   :  { %587 = vmatmul.bf16.vlgmr.msrb.gmra.mxu0 %v6037_v63  ;;  %6315 = vst [vmem:[#allocation73_spill] sm:$0xff] %v4654_v24  ;;  %v3943_v53 = vld [vmem:[#allocation6 + $0x1b4] sm:$0xf0] }
  0x38   :  { %3372 = vmatmul.msk.f32.gmra.mxu1 %vm85_vm0, %v67_v43  ;;  %3380 = vmatmul.msk.f32.gmra.mxu2 %vm85_vm0, %v67_v43  ;;  %6309 = vst [vmem:[#allocation68_spill] sm:$0xff] %v4638_v41  ;;  %v4677_v39 = vor.u32 %v3943_v53, %v3741_v9  ;;  %v3725_v53 = vld [vmem:[#allocation6 + $0x188] sm:$0xf]  ;;  %v3939_v9 = vld [vmem:[#allocation6 + $0x194] sm:$0xf0] }
  0x39   :  { %3388 = vmatmul.msk.f32.gmra.mxu3 %vm85_vm0, %v67_v43 }
  0x3a   :  { %6323 = vst [vmem:[#allocation81_spill] sm:$0xff] %v4677_v39 }
  0x40   :  { %3373 = vmatmul.msk.f32.gmra.mxu1 %vm85_vm0, %v4370_v2  ;;  %3381 = vmatmul.msk.f32.gmra.mxu2 %vm85_vm0, %v4370_v2 }
  0x41   :  { %3389 = vmatmul.msk.f32.gmra.mxu3 %vm85_vm0, %v4370_v2  ;;  %v3765_v2 = vld [vmem:[#allocation6 + $0x1e0] sm:$0xf] }
  0x42   :  { %v4547_v6 = vor.u32 %v3950_v0, %v3765_v2  ;;  %v4588_v0 = vor.u32 %v3936_v51, %v3719_v60  ;;  %v3687_v60 = vld [vmem:[#allocation6 + $0x150] sm:$0xf0] }
  0x44   :  { %6280 = vst [vmem:[#allocation39_spill] sm:$0xff] %v4547_v6  ;;  %1032 = vmatpush.bf16.msrb.mxu1 %v4547_v6 }
  0x45   :  { %6292 = vst [vmem:[#allocation51_spill] sm:$0xff] %v4588_v0 }
  0x48   :  { %3374 = vmatmul.msk.f32.gmra.mxu1 %vm85_vm0, %v4375_v3  ;;  %3382 = vmatmul.msk.f32.gmra.mxu2 %vm85_vm0, %v4375_v3 }
  0x49   :  { %3390 = vmatmul.msk.f32.gmra.mxu3 %vm85_vm0, %v4375_v3  ;;  %v3767_v3 = vld [vmem:[#allocation6 + $0x1f0] sm:$0xf0] }
  0x4a   :  { %v4549_v8 = vor.u32 %v3948_v1, %v3767_v3  ;;  %v3701_v1 = vld [vmem:[#allocation6 + $0x160] sm:$0xf]  ;;  %v3934_v3 = vld [vmem:[#allocation6 + $0x16c] sm:$0xf0] }
  0x4c   :  { %6281 = vst [vmem:[#allocation40_spill] sm:$0xff] %v4549_v8  ;;  %1058 = vmatpush.bf16.msrb.mxu3 %v4549_v8 }
  0x50   :  { %3375 = vmatmul.msk.f32.gmra.mxu1 %vm85_vm0, %v4380_v4  ;;  %3383 = vmatmul.msk.f32.gmra.mxu2 %vm85_vm0, %v4380_v4 }
  0x51   :  { %3391 = vmatmul.msk.f32.gmra.mxu3 %vm85_vm0, %v4380_v4  ;;  %v3946_v4 = vld [vmem:[#allocation6 + $0x1cc] sm:$0xf0] }
  0x52   :  { %v4557_v17 = vor.u32 %v3946_v4, %v3749_v12  ;;  %1059 = vmatpush.bf16.msrb.mxu3 %v4559_v23  ;;  %v3932_v12 = vld [vmem:[#allocation6 + $0x164] sm:$0xf]  ;;  %v4592_v4 = vor.u32 %v3934_v3, %v3701_v1  ;;  %v4608_v1 = vor.u32 %v3928_v48, %v3687_v60  ;;  %v3669_v3 = vld [vmem:[#allocation6 + $0x120] sm:$0xf]  ;;  %v3922_v60 = vld [vmem:[#allocation6 + $0x10c] sm:$0xf0] }
  0x53   :  { %v4594_v21 = vor.u32 %v3932_v12, %v3703_v14  ;;  %v3926_v12 = vld [vmem:[#allocation6 + $0x12c] sm:$0xf0]  ;;  %v3924_v14 = vld [vmem:[#allocation6 + $0x124] sm:$0xf]  ;;  %v3653_v48 = vld [vmem:[#allocation6 + $0x100] sm:$0xf] }
  0x54   :  { %6283 = vst [vmem:[#allocation42_spill] sm:$0xff] %v4557_v17  ;;  %1033 = vmatpush.bf16.msrb.mxu1 %v4557_v17 }
  0x55   :  { %6293 = vst [vmem:[#allocation52_spill] sm:$0xff] %v4592_v4 }
  0x56   :  { %1060 = vmatpush.bf16.msrb.mxu3 %v4570_v37  ;;  %6294 = vst [vmem:[#allocation53_spill] sm:$0xff] %v4594_v21 }
  0x57   :  { %6298 = vst [vmem:[#allocation57_spill] sm:$0xff] %v4608_v1 }
  0x58   :  { %600 = vmatmul.bf16.vlgmr.msra.gmra.mxu1 %v6037_v63  ;;  %613 = vmatmul.bf16.vlgmr.msra.gmra.mxu2 %v6037_v63 }
  0x59   :  { %626 = vmatmul.bf16.vlgmr.msra.gmra.mxu3 %v6037_v63  ;;  %1034 = vmatpush.bf16.msrb.mxu1 %v4562_v33  ;;  %v4612_v63 = vor.u32 %v3926_v12, %v3669_v3  ;;  %v4625_v12 = vor.u32 %v3922_v60, %v3653_v48  ;;  %v3637_v48 = vld [vmem:[#allocation6 + $0xe0] sm:$0xf]  ;;  %v3916_v60 = vld [vmem:[#allocation6 + $0xe4] sm:$0xf] }
  0x5a   :  { %1061 = vmatpush.bf16.msrb.mxu3 %v4588_v0 }
  0x5b   :  { %6299 = vst [vmem:[#allocation58_spill] sm:$0xff] %v4612_v63 }
  0x5c   :  { %6304 = vst [vmem:[#allocation63_spill] sm:$0xff] %v4625_v12 }
  0x5d   :  { %1035 = vmatpush.bf16.msrb.mxu1 %v4583_v57 }
  0x5e   :  { %1062 = vmatpush.bf16.msrb.mxu3 %v4594_v21 }
  0x61   :  { %1036 = vmatpush.bf16.msrb.mxu1 %v4592_v4 }
  0x62   :  { %1063 = vmatpush.bf16.msrb.mxu3 %v4608_v1 }
  0x8c   :  { %v4553_v15 = vpop.f32.mrf.mxu0  ;;  %v4555_v16 = vpop.f32.mrf.mxu1 }
  0x8d   :  { %6282 = vst [vmem:[#allocation41_spill] sm:$0xff] %v4555_v16  ;;  %v4617_v16 = vperm.slane %v4567_v36, 1 }
  0x8f   :  { %6301 = vst [vmem:[#allocation60_spill] sm:$0xff] %v4617_v16 }
  0x93   :  { %v4576_v43 = vpop.f32.mrf.mxu2  ;;  %v4578_v47 = vpop.f32.mrf.mxu3 }
  0x94   :  { %6288 = vst [vmem:[#allocation47_spill] sm:$0xff] %v4576_v43  ;;  %v130_v52 = vpop.f32.mrf.mxu0 }
  0x95   :  { %6289 = vst [vmem:[#allocation48_spill] sm:$0xff] %v4578_v47  ;;  %v4581_v55 = vpop.f32.mrf.mxu1  ;;  %v4586_v2 = vadd.f32 %v130_v52, %v4573_v38  ;;  %v4606_v52 = vor.u32 %v3930_v35, %v3685_v29  ;;  %v3671_v47 = vld [vmem:[#allocation6 + $0x130] sm:$0xf0] }
  0x96   :  { %v4614_v43 = vor.u32 %v3924_v14, %v3671_v47  ;;  %v3655_v47 = vld [vmem:[#allocation6 + $0x110] sm:$0xf0]  ;;  %v3773_v14 = vld [vmem:[#allocation6 + $0x1e8] sm:$0xf] }
  0x97   :  { %6291 = vst [vmem:[#allocation50_spill] sm:$0xff] %v4586_v2  ;;  %1037 = vmatpush.bf16.msrb.mxu1 %v4606_v52 }
  0x98   :  { %6297 = vst [vmem:[#allocation56_spill] sm:$0xff] %v4606_v52  ;;  %1064 = vmatpush.bf16.msrb.mxu3 %v4614_v43 }
  0x99   :  { %6300 = vst [vmem:[#allocation59_spill] sm:$0xff] %v4614_v43 }
  0x9b   :  { %v4597_v25 = vpop.f32.mrf.mxu2  ;;  %1038 = vmatpush.bf16.msrb.mxu1 %v4612_v63 }
  0x9c   :  { %v4599_v28 = vpop.f32.mrf.mxu3  ;;  %v4602_v50 = vpop.f32.mrf.mxu0 }
  0x9d   :  { %6295 = vst [vmem:[#allocation54_spill] sm:$0xff] %v4602_v50  ;;  %v4604_v51 = vpop.f32.mrf.mxu1  ;;  %v3920_v50 = vld [vmem:[#allocation6 + $0x104] sm:$0xf] }
  0x9e   :  { %6296 = vst [vmem:[#allocation55_spill] sm:$0xff] %v4604_v51  ;;  %v3951_v51 = vld [vmem:[#allocation6 + $0x1f4] sm:$0xf0] }
  0x9f   :  { %1039 = vmatpush.bf16.msrb.mxu1 %v4625_v12 }
  0xa3   :  { %v4620_v29 = vpop.f32.mrf.mxu2 }
  0xa4   :  { %6302 = vst [vmem:[#allocation61_spill] sm:$0xff] %v4620_v29  ;;  %v4622_v35 = vpop.f32.mrf.mxu3  ;;  %v136_v2 = vpop.f32.mrf.mxu0  ;;  %v4633_v29 = vor.u32 %v3920_v50, %v3655_v47  ;;  %v3639_v50 = vld [vmem:[#allocation6 + $0xf0] sm:$0xf0]  ;;  %v3947_v47 = vld [vmem:[#allocation6 + $0x1d4] sm:$0xf0] }
  0xa5   :  { %6303 = vst [vmem:[#allocation62_spill] sm:$0xff] %v4622_v35  ;;  %v174_v3 = vpop.f32.mrf.mxu1  ;;  %v4628_v61 = vadd.f32 %v136_v2, %v4573_v38  ;;  %v4635_v35 = vor.u32 %v3951_v51, %v3773_v14  ;;  %v3918_v2 = vld [vmem:[#allocation6 + $0xec] sm:$0xf0]  ;;  %v3757_v51 = vld [vmem:[#allocation6 + $0x1c8] sm:$0xf]  ;;  %v4645_v14 = vor.u32 %v3916_v60, %v3639_v50 }
  0xa6   :  { %v4631_v44 = vadd.f32 %v174_v3, %v4617_v16  ;;  %6307 = vst [vmem:[#allocation66_spill] sm:$0xff] %v4633_v29  ;;  %1065 = vmatpush.bf16.msrb.mxu3 %v4633_v29  ;;  %v4643_v3 = vor.u32 %v3918_v2, %v3637_v48  ;;  %v4657_v48 = vor.u32 %v3945_v30, %v3759_v49  ;;  %v3621_v50 = vld [vmem:[#allocation6 + $0xc0] sm:$0xf] }
  0xa7   :  { %6305 = vst [vmem:[#allocation64_spill] sm:$0xff] %v4628_v61  ;;  %1084 = vmatpush.bf16.msra.mxu1 %v4635_v35  ;;  %v4647_v61 = vor.u32 %v3947_v47, %v3757_v51  ;;  %1045 = vmatpush.bf16.msrb.mxu2 %v4645_v14  ;;  %v3914_v51 = vld [vmem:[#allocation6 + $0xcc] sm:$0xf0]  ;;  %v3912_v47 = vld [vmem:[#allocation6 + $0xc4] sm:$0xf] }
  0xa8   :  { %6306 = vst [vmem:[#allocation65_spill] sm:$0xff] %v4631_v44  ;;  %v6313_v44 = vmov 0   ;;  %1019 = vmatpush.bf16.msra.mxu0 %v4643_v3  ;;  %v4673_v49 = vor.u32 %v3914_v51, %v3621_v50  ;;  %v3937_v51 = vld [vmem:[#allocation6 + $0x18c] sm:$0xf] }
  0xa9   :  { %6308 = vst [vmem:[#allocation67_spill] sm:$0xff] %v4635_v35  ;;  %1040 = vmatmul.bf16.vlgmr.msrb.gmra.mxu1 %v6313_v44  ;;  %1066 = vmatmul.bf16.vlgmr.msrb.gmra.mxu3 %v6313_v44 }
  0xaa   :  { %1110 = vmatpush.bf16.msra.mxu3 %v4638_v41  ;;  %6310 = vst [vmem:[#allocation69_spill] sm:$0xff] %v4643_v3 }
  0xab   :  { %6311 = vst [vmem:[#allocation70_spill] sm:$0xff] %v4645_v14  ;;  %v215_v2 = vpop.f32.mrf.mxu2  ;;  %1085 = vmatpush.bf16.msra.mxu1 %v4647_v61  ;;  %v3623_v14 = vld [vmem:[#allocation6 + $0xd0] sm:$0xf0] }
  0xac   :  { %6312 = vst [vmem:[#allocation71_spill] sm:$0xff] %v4647_v61  ;;  %v256_v60 = vpop.f32.mrf.mxu3  ;;  %v4663_v5 = vadd.f32 %v215_v2, %v4651_v19  ;;  %v4668_v3 = vpop.f32.mrf.mxu0  ;;  %v4675_v58 = vor.u32 %v3912_v47, %v3623_v14  ;;  %v3941_v2 = vld [vmem:[#allocation6 + $0x1ac] sm:$0xf]  ;;  %v3605_v61 = vld [vmem:[#allocation6 + $0xa0] sm:$0xf]  ;;  %1020 = vmatpush.bf16.msra.mxu0 %v4673_v49  ;;  %v4689_v47 = vor.u32 %v3939_v9, %v3725_v53 }
  0xad   :  { %6316 = vst [vmem:[#allocation74_spill] sm:$0xff] %v4657_v48  ;;  %v4666_v36 = vadd.f32 %v256_v60, %v4654_v24  ;;  %v4670_v30 = vpop.f32.mrf.mxu1  ;;  %v3591_v9 = vld [vmem:[#allocation6 + $0x90] sm:$0xf0] }
  0xae   :  { %6317 = vst [vmem:[#allocation75_spill] sm:$0xff] %v4663_v5  ;;  %1111 = vmatpush.bf16.msra.mxu3 %v4657_v48  ;;  %v3743_v5 = vld [vmem:[#allocation6 + $0x1b8] sm:$0xf0]  ;;  %1046 = vmatpush.bf16.msrb.mxu2 %v4675_v58 }
  0xaf   :  { %6318 = vst [vmem:[#allocation76_spill] sm:$0xff] %v4666_v36  ;;  %v4680_v60 = vor.u32 %v3941_v2, %v3743_v5  ;;  %v3607_v36 = vld [vmem:[#allocation6 + $0xb0] sm:$0xf0]  ;;  %1086 = vmatpush.bf16.msra.mxu1 %v4677_v39  ;;  %v3727_v5 = vld [vmem:[#allocation6 + $0x198] sm:$0xf0] }
  0xb0   :  { %6319 = vst [vmem:[#allocation77_spill] sm:$0xff] %v4668_v3  ;;  %v3910_v3 = vld [vmem:[#allocation6 + $0xac] sm:$0xf0]  ;;  %v4692_v2 = vor.u32 %v3937_v51, %v3727_v5  ;;  %v3709_v51 = vld [vmem:[#allocation6 + $0x168] sm:$0xf] }
  0xb1   :  { %6320 = vst [vmem:[#allocation78_spill] sm:$0xff] %v4670_v30  ;;  %v3908_v30 = vld [vmem:[#allocation6 + $0xa4] sm:$0xf]  ;;  %v4684_v50 = vor.u32 %v3910_v3, %v3605_v61  ;;  %v3589_v61 = vld [vmem:[#allocation6 + $0x80] sm:$0xf] }
  0xb2   :  { %6321 = vst [vmem:[#allocation79_spill] sm:$0xff] %v4673_v49  ;;  %v4686_v14 = vor.u32 %v3908_v30, %v3607_v36  ;;  %1112 = vmatpush.bf16.msra.mxu3 %v4680_v60  ;;  %v3906_v3 = vld [vmem:[#allocation6 + $0x8c] sm:$0xf0]  ;;  %v3904_v36 = vld [vmem:[#allocation6 + $0x84] sm:$0xf] }
  0xb3   :  { %6322 = vst [vmem:[#allocation80_spill] sm:$0xff] %v4675_v58  ;;  %1021 = vmatpush.bf16.msra.mxu0 %v4684_v50  ;;  %v4694_v49 = vpop.f32.mrf.mxu2  ;;  %1087 = vmatpush.bf16.msra.mxu1 %v4689_v47  ;;  %v4701_v53 = vor.u32 %v3906_v3, %v3589_v61  ;;  %v3935_v5 = vld [vmem:[#allocation6 + $0x174] sm:$0xf0]  ;;  %v3573_v61 = vld [vmem:[#allocation6 + $0x60] sm:$0xf] }
  0xb4   :  { %6324 = vst [vmem:[#allocation82_spill] sm:$0xff] %v4680_v60  ;;  %v4696_v58 = vpop.f32.mrf.mxu3  ;;  %1047 = vmatpush.bf16.msrb.mxu2 %v4686_v14  ;;  %v588_v60 = vpop.f32.mrf.mxu0  ;;  %v3902_v3 = vld [vmem:[#allocation6 + $0x6c] sm:$0xf0] }
  0xb5   :  { %6325 = vst [vmem:[#allocation83_spill] sm:$0xff] %v4684_v50  ;;  %v180_v30 = vpop.f32.mrf.mxu1  ;;  %v3933_v50 = vld [vmem:[#allocation6 + $0x16c] sm:$0xf] }
  0xb6   :  { %6326 = vst [vmem:[#allocation84_spill] sm:$0xff] %v4686_v14  ;;  %1113 = vmatpush.bf16.msra.mxu3 %v4692_v2  ;;  %v4708_v14 = vor.u32 %v3935_v5, %v3709_v51  ;;  %v3693_v5 = vld [vmem:[#allocation6 + $0x148] sm:$0xf] }
  0xb7   :  { %6327 = vst [vmem:[#allocation85_spill] sm:$0xff] %v4689_v47  ;;  %v3711_v47 = vld [vmem:[#allocation6 + $0x178] sm:$0xf0]  ;;  %1022 = vmatpush.bf16.msra.mxu0 %v4701_v53 }
  0xb8   :  { %6328 = vst [vmem:[#allocation86_spill] sm:$0xff] %v4692_v2  ;;  %v4711_v39 = vor.u32 %v3933_v50, %v3711_v47  ;;  %1088 = vmatpush.bf16.msra.mxu1 %v4708_v14  ;;  %v3929_v2 = vld [vmem:[#allocation6 + $0x14c] sm:$0xf]  ;;  %v3695_v47 = vld [vmem:[#allocation6 + $0x158] sm:$0xf0] }
  0xb9   :  { %6329 = vst [vmem:[#allocation87_spill] sm:$0xff] %v4694_v49  ;;  %v4704_v49 = vadd.f32 %v180_v30, %v4617_v16  ;;  %v4716_v30 = vor.u32 %v3902_v3, %v3573_v61 }
  0xba   :  { %6330 = vst [vmem:[#allocation88_spill] sm:$0xff] %v4696_v58  ;;  %v4706_v58 = vor.u32 %v3904_v36, %v3591_v9  ;;  %1114 = vmatpush.bf16.msra.mxu3 %v4711_v39  ;;  %v3900_v36 = vld [vmem:[#allocation6 + $0x64] sm:$0xf]  ;;  %v3575_v9 = vld [vmem:[#allocation6 + $0x70] sm:$0xf0] }
  0xbb   :  { %6331 = vst [vmem:[#allocation89_spill] sm:$0xff] %v4701_v53  ;;  %v4718_v51 = vor.u32 %v3900_v36, %v3575_v9  ;;  %1023 = vmatpush.bf16.msra.mxu0 %v4716_v30 }
  0xbc   :  { %6332 = vst [vmem:[#allocation90_spill] sm:$0xff] %v4704_v49  ;;  %1048 = vmatpush.bf16.msrb.mxu2 %v4706_v58  ;;  %v3931_v49 = vld [vmem:[#allocation6 + $0x154] sm:$0xf0]  ;;  %v262_v53 = vpop.f32.mrf.mxu3  ;;  %v590_v9 = vpop.f32.mrf.mxu0 }
  0xbd   :  { %6333 = vst [vmem:[#allocation91_spill] sm:$0xff] %v4706_v58  ;;  %v4721_v50 = vor.u32 %v3931_v49, %v3693_v5  ;;  %v221_v58 = vpop.f32.mrf.mxu2  ;;  %v4730_v3 = vadd.f32 %v262_v53, %v4654_v24  ;;  %v4732_v36 = vpop.f32.mrf.mxu1  ;;  %v3557_v49 = vld [vmem:[#allocation6 + $0x40] sm:$0xf]  ;;  %v3898_v5 = vld [vmem:[#allocation6 + $0x4c] sm:$0xf0] }
  0xbe   :  { %6334 = vst [vmem:[#allocation92_spill] sm:$0xff] %v4708_v14  ;;  %v4724_v14 = vor.u32 %v3929_v2, %v3695_v47  ;;  %v4727_v61 = vadd.f32 %v221_v58, %v4651_v19  ;;  %v3559_v2 = vld [vmem:[#allocation6 + $0x50] sm:$0xf0]  ;;  %v3677_v47 = vld [vmem:[#allocation6 + $0x128] sm:$0xf]  ;;  %v128_v58 = vadd.f32 %v4553_v15, %v4573_v38 }
  0xbf   :  { %6335 = vst [vmem:[#allocation93_spill] sm:$0xff] %v4711_v39  ;;  %1089 = vmatpush.bf16.msra.mxu1 %v4721_v50  ;;  %v4736_v39 = vor.u32 %v3898_v5, %v3557_v49  ;;  %v3925_v9 = vld [vmem:[#allocation6 + $0x12c] sm:$0xf]  ;;  %v3541_v49 = vld [vmem:[#allocation6 + $0x20] sm:$0xf] }
  0xc0   :  { %6336 = vst [vmem:[#allocation94_spill] sm:$0xff] %v4716_v30  ;;  %1049 = vmatpush.bf16.msrb.mxu2 %v4718_v51  ;;  %v3896_v30 = vld [vmem:[#allocation6 + $0x44] sm:$0xf]  ;;  %1115 = vmatpush.bf16.msra.mxu3 %v4724_v14  ;;  %v3894_v5 = vld [vmem:[#allocation6 + $0x2c] sm:$0xf0] }
  0xc1   :  { %6337 = vst [vmem:[#allocation95_spill] sm:$0xff] %v4718_v51  ;;  %v3927_v51 = vld [vmem:[#allocation6 + $0x134] sm:$0xf0]  ;;  %v4740_v53 = vor.u32 %v3896_v30, %v3559_v2  ;;  %1024 = vmatpush.bf16.msra.mxu0 %v4736_v39  ;;  %v4750_v15 = vor.u32 %v3894_v5, %v3541_v49  ;;  %v3892_v30 = vld [vmem:[#allocation6 + $0x24] sm:$0xf] }
  0xc2   :  { %6338 = vst [vmem:[#allocation96_spill] sm:$0xff] %v4721_v50  ;;  %v631_v50 = vadd.f32 %v588_v60, %v128_v58  ;;  %v3661_v2 = vld [vmem:[#allocation6 + $0x108] sm:$0xf]  ;;  %v3921_v58 = vld [vmem:[#allocation6 + $0x10c] sm:$0xf] }
  0xc3   :  { %6339 = vst [vmem:[#allocation97_spill] sm:$0xff] %v4724_v14  ;;  %v3525_v49 = vld [vmem:[#allocation6] sm:$0xf]  ;;  %v3890_v5 = vld [vmem:[#allocation6 + $0xc] sm:$0xf0] }
  0xc4   :  { %6340 = vst [vmem:[#allocation98_spill] sm:$0xff] %v4727_v61  ;;  %v4742_v61 = vor.u32 %v3927_v51, %v3677_v47  ;;  %1050 = vmatpush.bf16.msrb.mxu2 %v4740_v53  ;;  %v3543_v51 = vld [vmem:[#allocation6 + $0x30] sm:$0xf0]  ;;  %v3923_v47 = vld [vmem:[#allocation6 + $0x114] sm:$0xf0] }
  0xc5   :  { %6341 = vst [vmem:[#allocation99_spill] sm:$0xff] %v4730_v3  ;;  %v4752_v38 = vpop.f32.mrf.mxu2  ;;  %1025 = vmatpush.bf16.msra.mxu0 %v4750_v15  ;;  %v4757_v60 = vor.u32 %v3892_v30, %v3543_v51  ;;  %v3888_v30 = vld [vmem:[#allocation6 + $0x4] sm:$0xf]  ;;  %v3527_v51 = vld [vmem:[#allocation6 + $0x10] sm:$0xf0] }
  0xc6   :  { %6342 = vst [vmem:[#allocation100_spill] sm:$0xff] %v4732_v36  ;;  %v3679_v36 = vld [vmem:[#allocation6 + $0x138] sm:$0xf0]  ;;  %1090 = vmatpush.bf16.msra.mxu1 %v4742_v61 }
  0xc7   :  { %6343 = vst [vmem:[#allocation101_spill] sm:$0xff] %v4736_v39  ;;  %v4745_v3 = vor.u32 %v3925_v9, %v3679_v36  ;;  %v4754_v39 = vpop.f32.mrf.mxu3  ;;  %v4759_v36 = vor.u32 %v3923_v47, %v3661_v2  ;;  %v3663_v9 = vld [vmem:[#allocation6 + $0x118] sm:$0xf0]  ;;  %v3645_v2 = vld [vmem:[#allocation6 + $0xe8] sm:$0xf] }
  0xc8   :  { %6344 = vst [vmem:[#allocation102_spill] sm:$0xff] %v4740_v53  ;;  %v3520_v53 = vmul.f32 -1.442695, %v631_v50  ;;  %1051 = vmatpush.bf16.msrb.mxu2 %v4757_v60  ;;  %v4771_v50 = vor.u32 %v3888_v30, %v3527_v51  ;;  %v3919_v47 = vld [vmem:[#allocation6 + $0xf4] sm:$0xf0] }
  0xc9   :  { %6345 = vst [vmem:[#allocation103_spill] sm:$0xff] %v4742_v61  ;;  %1116 = vmatpush.bf16.msra.mxu3 %v4745_v3  ;;  %v3647_v14 = vld [vmem:[#allocation6 + $0xf8] sm:$0xf0] }
  0xca   :  { %6346 = vst [vmem:[#allocation104_spill] sm:$0xff] %v4745_v3  ;;  %v186_v3 = vpop.f32.mrf.mxu1  ;;  %1091 = vmatpush.bf16.msra.mxu1 %v4759_v36  ;;  %3970 = vpow2.f32 %v3520_v53 }
  0xcb   :  { %6347 = vst [vmem:[#allocation105_spill] sm:$0xff] %v4750_v15  ;;  %v4762_v61 = vadd.f32 %v186_v3, %v4617_v16  ;;  %v3917_v15 = vld [vmem:[#allocation6 + $0xec] sm:$0xf]  ;;  %v4775_v3 = vor.u32 %v3919_v47, %v3645_v2 }
  0xcc   :  { %6348 = vst [vmem:[#allocation106_spill] sm:$0xff] %v4752_v38  ;;  %v4766_v38 = vor.u32 %v3921_v58, %v3663_v9  ;;  %v4777_v58 = vor.u32 %v3917_v15, %v3647_v14  ;;  %1052 = vmatpush.bf16.msrb.mxu2 %v4771_v50  ;;  %v3629_v9 = vld [vmem:[#allocation6 + $0xc8] sm:$0xf]  ;;  %v3631_v14 = vld [vmem:[#allocation6 + $0xd8] sm:$0xf0] }
  0xcd   :  { %6349 = vst [vmem:[#allocation107_spill] sm:$0xff] %v4754_v39  ;;  %v4768_v39 = vor.u32 %v3890_v5, %v3525_v49  ;;  %1092 = vmatmul.bf16.vlgmr.msra.gmra.mxu1 %v6313_v44  ;;  %v3915_v49 = vld [vmem:[#allocation6 + $0xd4] sm:$0xf0]  ;;  %v3913_v5 = vld [vmem:[#allocation6 + $0xcc] sm:$0xf]  ;;  %v227_v15 = vpop.f32.mrf.mxu2 }
  0xce   :  { %6350 = vst [vmem:[#allocation108_spill] sm:$0xff] %v4757_v60  ;;  %1206 = vmatpush.bf16.msrb.mxu1 %v4398_v11  ;;  %1117 = vmatpush.bf16.msra.mxu3 %v4766_v38  ;;  %v4785_v30 = vor.u32 %v3915_v49, %v3629_v9  ;;  %v4787_v2 = vor.u32 %v3913_v5, %v3631_v14  ;;  %v3613_v9 = vld [vmem:[#allocation6 + $0xa8] sm:$0xf]  ;;  %v3911_v49 = vld [vmem:[#allocation6 + $0xb4] sm:$0xf0] }
  0xcf   :  { %6351 = vst [vmem:[#allocation109_spill] sm:$0xff] %v4759_v36  ;;  %1026 = vmatpush.bf16.msra.mxu0 %v4768_v39  ;;  %v268_v51 = vpop.f32.mrf.mxu3  ;;  %v4791_v53 = vadd.f32 %v227_v15, %v4651_v19  ;;  %v3615_v5 = vld [vmem:[#allocation6 + $0xb8] sm:$0xf0]  ;;  %v3893_v11 = vld [vmem:[#allocation6 + $0x2c] sm:$0xf] }
  0xd0   :  { %6352 = vst [vmem:[#allocation110_spill] sm:$0xff] %v4762_v61  ;;  %1097 = vmatpush.bf16.msra.mxu2 %v4777_v58  ;;  %v4794_v47 = vadd.f32 %v268_v51, %v4654_v24  ;;  %v3971_v14 = vpop.eup %3970  ;;  %v3597_v51 = vld [vmem:[#allocation6 + $0x88] sm:$0xf] }
  0xd1   :  { %6353 = vst [vmem:[#allocation111_spill] sm:$0xff] %v4766_v38  ;;  %1118 = vmatmul.bf16.vlgmr.msra.gmra.mxu3 %v6313_v44  ;;  %v4802_v44 = vor.u32 %v3911_v49, %v3613_v9  ;;  %v3599_v9 = vld [vmem:[#allocation6 + $0x98] sm:$0xf0] }
  0xd2   :  { %6354 = vst [vmem:[#allocation112_spill] sm:$0xff] %v4768_v39  ;;  %1232 = vmatpush.bf16.msrb.mxu3 %v4403_v18  ;;  %1207 = vmatpush.bf16.msrb.mxu1 %v4409_v22  ;;  %v4796_v61 = vpop.f32.mrf.mxu1  ;;  %v3909_v22 = vld [vmem:[#allocation6 + $0xac] sm:$0xf]  ;;  %v3581_v18 = vld [vmem:[#allocation6 + $0x68] sm:$0xf] }
  0xd3   :  { %6355 = vst [vmem:[#allocation113_spill] sm:$0xff] %v4771_v50  ;;  %1071 = vmatpush.bf16.msrb.mxu0 %v4775_v3  ;;  %v4804_v15 = vor.u32 %v3909_v22, %v3615_v5  ;;  %v169_v22 = vadd.f32 %v4581_v55, %v4617_v16 }
  0xd4   :  { %6356 = vst [vmem:[#allocation114_spill] sm:$0xff] %v4775_v3  ;;  %1098 = vmatpush.bf16.msra.mxu2 %v4787_v2 }
  0xd5   :  { %6357 = vst [vmem:[#allocation115_spill] sm:$0xff] %v4777_v58  ;;  %v4816_v49 = vpop.f32.mrf.mxu2 }
  0xd6   :  { %6358 = vst [vmem:[#allocation116_spill] sm:$0xff] %v4785_v30  ;;  %1233 = vmatpush.bf16.msrb.mxu3 %v4414_v27  ;;  %1208 = vmatpush.bf16.msrb.mxu1 %v4421_v34 }
  0xd7   :  { %6359 = vst [vmem:[#allocation117_spill] sm:$0xff] %v4787_v2  ;;  %1072 = vmatpush.bf16.msrb.mxu0 %v4785_v30  ;;  %v4818_v5 = vpop.f32.mrf.mxu3 }
  0xd8   :  { %6360 = vst [vmem:[#allocation118_spill] sm:$0xff] %v4791_v53  ;;  %v3905_v53 = vld [vmem:[#allocation6 + $0x8c] sm:$0xf]  ;;  %1099 = vmatpush.bf16.msra.mxu2 %v4804_v15 }
  0xd9   :  { %6361 = vst [vmem:[#allocation119_spill] sm:$0xff] %v4794_v47  ;;  %v4808_v47 = vadd.f32 1.0, %v3971_v14 }
  0xda   :  { %6362 = vst [vmem:[#allocation120_spill] sm:$0xff] %v4796_v61  ;;  %1234 = vmatpush.bf16.msrb.mxu3 %v4429_v40  ;;  %v3907_v61 = vld [vmem:[#allocation6 + $0x94] sm:$0xf0]  ;;  %1209 = vmatpush.bf16.msrb.mxu1 %v4435_v46  ;;  %v4820_v40 = vor.u32 %v3905_v53, %v3599_v9  ;;  %v601_v27 = vpop.f32.mrf.mxu1 }
  0xdb   :  { %6363 = vst [vmem:[#allocation121_spill] sm:$0xff] %v4802_v44  ;;  %1073 = vmatpush.bf16.msrb.mxu0 %v4802_v44  ;;  %v4812_v34 = vor.u32 %v3907_v61, %v3597_v51  ;;  %v632_v14 = vadd.f32 %v601_v27, %v169_v22  ;;  %v3903_v46 = vld [vmem:[#allocation6 + $0x74] sm:$0xf0]  ;;  %v3901_v61 = vld [vmem:[#allocation6 + $0x6c] sm:$0xf]  ;;  %3972 = vrcp.f32 %v4808_v47  ;;  %vm644_vm2 = vweird.f32 %v4808_v47 }
  0xdc   :  { %6364 = vst [vmem:[#allocation122_spill] sm:$0xff] %v4804_v15  ;;  %1100 = vmatpush.bf16.msra.mxu2 %v4820_v40  ;;  %v4827_v55 = vor.u32 %v3903_v46, %v3581_v18  ;;  %v3583_v51 = vld [vmem:[#allocation6 + $0x78] sm:$0xf0]  ;;  %v3565_v27 = vld [vmem:[#allocation6 + $0x48] sm:$0xf] }
  0xdd   :  { %6365 = vst [vmem:[#allocation123_spill] sm:$0xff] %v4812_v34  ;;  %v3521_v53 = vmul.f32 -1.442695, %v632_v14  ;;  %v4829_v9 = vor.u32 %v3901_v61, %v3583_v51  ;;  %v3899_v22 = vld [vmem:[#allocation6 + $0x54] sm:$0xf0]  ;;  %v614_v14 = vpop.f32.mrf.mxu2 }
  0xde   :  { %6366 = vst [vmem:[#allocation124_spill] sm:$0xff] %v4816_v49  ;;  %1235 = vmatpush.bf16.msrb.mxu3 %v4444_v56  ;;  %1210 = vmatpush.bf16.msrb.mxu1 %v4450_v59  ;;  %v3897_v49 = vld [vmem:[#allocation6 + $0x4c] sm:$0xf]  ;;  %v4837_v18 = vor.u32 %v3899_v22, %v3565_v27  ;;  %v3567_v46 = vld [vmem:[#allocation6 + $0x58] sm:$0xf0] }
  0xdf   :  { %6367 = vst [vmem:[#allocation125_spill] sm:$0xff] %v4818_v5  ;;  %1074 = vmatpush.bf16.msrb.mxu0 %v4812_v34  ;;  %3974 = vpow2.f32 %v3521_v53  ;;  %v251_v5 = vadd.f32 %v4599_v28, %v4654_v24  ;;  %v627_v61 = vpop.f32.mrf.mxu3  ;;  %v4839_v51 = vor.u32 %v3897_v49, %v3567_v46  ;;  %v3549_v28 = vld [vmem:[#allocation6 + $0x28] sm:$0xf]  ;;  %v3895_v56 = vld [vmem:[#allocation6 + $0x34] sm:$0xf0] }
  0xe0   :  { %6368 = vst [vmem:[#allocation126_spill] sm:$0xff] %v4820_v40  ;;  %1101 = vmatpush.bf16.msra.mxu2 %v4829_v9  ;;  %v4847_v27 = vor.u32 %v3895_v56, %v3549_v28  ;;  %v3551_v49 = vld [vmem:[#allocation6 + $0x38] sm:$0xf0] }
  0xe1   :  { %6369 = vst [vmem:[#allocation127_spill] sm:$0xff] %v4827_v55  ;;  %v4841_v53 = vpop.eup %3972  ;;  %v3535_v56 = vld [vmem:[#allocation6 + $0x18] sm:$0xf0] }
  0xe2   :  { %6370 = vst [vmem:[#allocation128_spill] sm:$0xff] %v4829_v9  ;;  %1236 = vmatpush.bf16.msrb.mxu3 %v4460_v7  ;;  %1211 = vmatpush.bf16.msrb.mxu1 %v4466_v10  ;;  %v634_v7 = vadd.f32 %v627_v61, %v251_v5  ;;  %v603_v59 = vpop.f32.mrf.mxu1  ;;  %v640_v5 = vmul.f32 %v4841_v53, %v4808_v47  ;;  %v3891_v61 = vld [vmem:[#allocation6 + $0x14] sm:$0xf0]  ;;  %vm645_vm1 = vweird.f32 %v4841_v53 }
  0xe3   :  { %1075 = vmatpush.bf16.msrb.mxu0 %v4827_v55  ;;  %6371 = vst [vmem:[#allocation129_spill] sm:$0xff] %v4837_v18  ;;  %v4851_v59 = vor.u32 %v3893_v11, %v3551_v49  ;;  %vm4878_vm4 = vmor %vm644_vm2, %vm645_vm1 }
  0xe4   :  { %6372 = vst [vmem:[#allocation130_spill] sm:$0xff] %v4839_v51  ;;  %v3522_v24 = vmul.f32 -1.442695, %v634_v7  ;;  %1102 = vmatpush.bf16.msra.mxu2 %v4839_v51  ;;  %v3533_v7 = vld [vmem:[#allocation6 + $0x8] sm:$0xf]  ;;  %v641_v28 = vsub.f32 1.0, %v640_v5 }
  0xe5   :  { %6373 = vst [vmem:[#allocation131_spill] sm:$0xff] %v4847_v27  ;;  %v3975_v22 = vpop.eup %3974  ;;  %v616_v10 = vpop.f32.mrf.mxu2  ;;  %v4857_v11 = vor.u32 %v3891_v61, %v3533_v7  ;;  %v650_v61 = vand.u32 2147483648, %v4808_v47 }
  0xe6   :  { %1237 = vmatpush.bf16.msrb.mxu3 %v4475_v20  ;;  %1212 = vmatpush.bf16.msrb.mxu1 %v4489_v31  ;;  %6374 = vst [vmem:[#allocation132_spill] sm:$0xff] %v4851_v59  ;;  %v657_v46 = vadd.f32 1.0, %v3975_v22  ;;  %3976 = vpow2.f32 %v3522_v24  ;;  %v3889_v20 = vld [vmem:[#allocation6 + $0xc] sm:$0xf]  ;;  %v210_v24 = vadd.f32 %v4597_v25, %v4651_v19  ;;  %v642_v10 = vmul.f32 %v4841_v53, %v641_v28 }
  0xe7   :  { %1076 = vmatpush.bf16.msrb.mxu0 %v4837_v18  ;;  %v629_v31 = vpop.f32.mrf.mxu3  ;;  %6375 = vst [vmem:[#allocation133_spill] sm:$0xff] %v4857_v11  ;;  %v4859_v49 = vor.u32 %v3889_v20, %v3535_v56  ;;  %v648_v28 = vand.u32 2147483647, %v4808_v47  ;;  %v651_v47 = vor.u32 1.1754944e-38, %v650_v61 }
  0xe8   :  { %3978 = vrcp.f32 %v657_v46  ;;  %1103 = vmatpush.bf16.msra.mxu2 %v4851_v59  ;;  %v643_v7 = vadd.f32 %v4841_v53, %v642_v10  ;;  %vm663_vm5 = vweird.f32 %v657_v46 }
  0xe9   :  { %6376 = vst [vmem:[#allocation134_spill] sm:$0xff] %v4859_v49  ;;  %vm649_vm7 = vcmp.eq.f32.partialorder %v648_v28, 8.507059e+37  ;;  %v6382_v28 = vld [vmem:[#allocation81_spill] sm:$0xff] }
  0xea   :  { %1238 = vmatpush.bf16.msrb.mxu3 %v4494_v42  ;;  %1213 = vmatpush.bf16.msrb.mxu1 %v4512_v54  ;;  %v633_v54 = vadd.f32 %v614_v14, %v210_v24  ;;  %v669_v14 = vand.u32 2147483648, %v657_v46  ;;  %v667_v24 = vand.u32 2147483647, %v657_v46  ;;  %v647_v10 = vsel %vm4878_vm4, %v4841_v53, %v643_v7 }
  0xeb   :  { %1077 = vmatpush.bf16.msrb.mxu0 %v4847_v27 }
  0xec   :  { %v3977_v22 = vpop.eup %3976  ;;  %1104 = vmatpush.bf16.msra.mxu2 %v4859_v49  ;;  %vm668_vm8 = vcmp.eq.f32.partialorder %v667_v24, 8.507059e+37  ;;  %v6383_v24 = vld [vmem:[#allocation82_spill] sm:$0xff] }
  0xed   :  { %v677_v31 = vadd.f32 1.0, %v3977_v22 }
  0xee   :  { %1327 = vmatpush.bf16.msra.mxu1 %v4547_v6  ;;  %1239 = vmatpush.bf16.msrb.mxu3 %v4517_v62  ;;  %v3979_v20 = vpop.eup %3978 }
  0xef   :  { %1078 = vmatpush.bf16.msrb.mxu0 %v4857_v11  ;;  %v659_v5 = vmul.f32 %v3979_v20, %v657_v46  ;;  %3980 = vrcp.f32 %v677_v31  ;;  %vm664_vm3 = vweird.f32 %v3979_v20  ;;  %vm683_vm10 = vweird.f32 %v677_v31 }
  0xf0   :  { %3982 = vtanh.f32 %v633_v54  ;;  %vm665_vm6 = vmor %vm663_vm5, %vm664_vm3  ;;  %v687_v61 = vand.u32 2147483647, %v677_v31  ;;  %v6384_v54 = vld [vmem:[#allocation20_spill] sm:$0xff] }
  0xf1   :  { %v660_v25 = vsub.f32 1.0, %v659_v5 }
  0xf2   :  { %1353 = vmatpush.bf16.msra.mxu3 %v4549_v8  ;;  %1328 = vmatpush.bf16.msra.mxu1 %v4557_v17  ;;  %v652_v17 = vsel %vm649_vm7, %v651_v47, %v647_v10  ;;  %vm688_vm12 = vcmp.eq.f32.partialorder %v687_v61, 8.507059e+37  ;;  %v6386_v10 = vld [vmem:[#allocation85_spill] sm:$0xff]  ;;  %v6389_v47 = vld [vmem:[#allocation30_spill] sm:$0xff]  ;;  %v6394_v61 = vld [vmem:[#allocation96_spill] sm:$0xff] }
  0xf3   :  { %v661_v56 = vmul.f32 %v3979_v20, %v660_v25 }
  0xf5   :  { %v3981_v22 = vpop.eup %3980  ;;  %v662_v5 = vadd.f32 %v3979_v20, %v661_v56  ;;  %v6381_v56 = vld [vmem:[#allocation22_spill] sm:$0xff] }
  0xf6   :  { %1354 = vmatpush.bf16.msra.mxu3 %v4559_v23  ;;  %1329 = vmatpush.bf16.msra.mxu1 %v4562_v33  ;;  %v3983_v25 = vpop.eup %3982  ;;  %v670_v33 = vor.u32 1.1754944e-38, %v669_v14  ;;  %v679_v23 = vmul.f32 %v3981_v22, %v677_v31  ;;  %vm684_vm9 = vweird.f32 %v3981_v22 }
  0xf7   :  { %v694_v62 = vmul.f32 %v3983_v25, %v652_v17  ;;  %vm685_vm11 = vmor %vm683_vm10, %vm684_vm9  ;;  %v6388_v25 = vld [vmem:[#allocation24_spill] sm:$0xff] }
  0xf8   :  { %v680_v46 = vsub.f32 1.0, %v679_v23 }
  0xfa   :  { %1355 = vmatpush.bf16.msra.mxu3 %v4570_v37  ;;  %1330 = vmatpush.bf16.msra.mxu1 %v4583_v57  ;;  %v666_v37 = vsel %vm665_vm6, %v3979_v20, %v662_v5  ;;  %v681_v53 = vmul.f32 %v3981_v22, %v680_v46  ;;  %v689_v20 = vand.u32 2147483648, %v677_v31  ;;  %v6380_v31 = vld [vmem:[#allocation17_spill] sm:$0xff]  ;;  %v6387_v5 = vld [vmem:[#allocation86_spill] sm:$0xff]  ;;  %v6390_v46 = vld [vmem:[#allocation92_spill] sm:$0xff] }
  0xfb   :  { %v671_v8 = vsel %vm668_vm8, %v670_v33, %v666_v37  ;;  %v6379_v37 = vld [vmem:[#allocation71_spill] sm:$0xff] }
  0xfc   :  { %v693_v6 = vmul.f32 0.0, %v671_v8  ;;  %v682_v14 = vadd.f32 %v3981_v22, %v681_v53  ;;  %v690_v17 = vor.u32 1.1754944e-38, %v689_v20  ;;  %v6391_v53 = vld [vmem:[#allocation93_spill] sm:$0xff] }
  0xfd   :  { %v6393_v20 = vld [vmem:[#allocation33_spill] sm:$0xff] }
  0xfe   :  { %1356 = vmatpush.bf16.msra.mxu3 %v4588_v0  ;;  %1331 = vmatpush.bf16.msra.mxu1 %v4592_v4  ;;  %v4888_v7 = vadd.f32 %v694_v62, %v693_v6  ;;  %v686_v8 = vsel %vm685_vm11, %v3981_v22, %v682_v14  ;;  %v6385_v22 = vld [vmem:[#allocation26_spill] sm:$0xff]  ;;  %v6392_v14 = vld [vmem:[#allocation28_spill] sm:$0xff] }
  0xff   :  { %v691_v6 = vsel %vm688_vm12, %v690_v17, %v686_v8  ;;  %v6395_v8 = vld [vmem:[#allocation97_spill] sm:$0xff]  ;;  %v6396_v17 = vld [vmem:[#allocation31_spill] sm:$0xff] }
 0x100   :  { %3984 = vtanh.f32 %v4888_v7 }
 0x102   :  { %1357 = vmatpush.bf16.msra.mxu3 %v4594_v21  ;;  %1332 = vmatpush.bf16.msra.mxu1 %v4606_v52 }
 0x106   :  { %1358 = vmatpush.bf16.msra.mxu3 %v4608_v1  ;;  %1333 = vmatpush.bf16.msra.mxu1 %v4612_v63  ;;  %v3985_v62 = vpop.eup %3984 }
 0x107   :  { %v697_v23 = vmul.f32 %v3985_v62, %v691_v6  ;;  %v6397_v62 = vld [vmem:[#allocation35_spill] sm:$0xff] }
 0x108   :  { %v6398_v6 = vld [vmem:[#allocation103_spill] sm:$0xff] }
 0x109   :  { %v698_v33 = vpack.c.bf16 %v697_v23, %v697_v23  ;;  %v6399_v23 = vld [vmem:[#allocation104_spill] sm:$0xff] }
 0x10a   :  { %1359 = vmatpush.bf16.msra.mxu3 %v4614_v43  ;;  %1334 = vmatpush.bf16.msra.mxu1 %v4625_v12  ;;  %v6414_v12 = vld [vmem:[#allocation105_spill] sm:$0xff] }
 0x10b   :  { %1027 = vmatmul.bf16.vlgmr.msra.gmra.mxu0 %v698_v33  ;;  %1053 = vmatmul.bf16.vlgmr.msrb.gmra.mxu2 %v698_v33 }
 0x10c   :  { %1214 = vmatmul.bf16.vlgmr.msrb.gmra.mxu1 %v698_v33  ;;  %1240 = vmatmul.bf16.vlgmr.msrb.gmra.mxu3 %v698_v33 }
 0x10d   :  { %1193 = vmatpush.bf16.msra.mxu0 %v4400_v13  ;;  %1219 = vmatpush.bf16.msrb.mxu2 %v4417_v32 }
 0x10e   :  { %1360 = vmatpush.bf16.msra.mxu3 %v4633_v29  ;;  %1379 = vmatpush.bf16.msrb.mxu1 %v4635_v35  ;;  %v6412_v35 = vld [vmem:[#allocation101_spill] sm:$0xff]  ;;  %v6413_v29 = vld [vmem:[#allocation102_spill] sm:$0xff] }
 0x111   :  { %1194 = vmatpush.bf16.msra.mxu0 %v4412_v26  ;;  %1220 = vmatpush.bf16.msrb.mxu2 %v4433_v45 }
 0x112   :  { %1405 = vmatpush.bf16.msrb.mxu3 %v4638_v41  ;;  %1380 = vmatpush.bf16.msrb.mxu1 %v6379_v37  ;;  %v6409_v37 = vld [vmem:[#allocation91_spill] sm:$0xff] }
 0x115   :  { %1195 = vmatpush.bf16.msra.mxu0 %v6380_v31  ;;  %1221 = vmatpush.bf16.msrb.mxu2 %v6381_v56 }
 0x116   :  { %1406 = vmatpush.bf16.msrb.mxu3 %v4657_v48  ;;  %1381 = vmatpush.bf16.msrb.mxu1 %v6382_v28  ;;  %v6408_v48 = vld [vmem:[#allocation89_spill] sm:$0xff] }
 0x119   :  { %1196 = vmatpush.bf16.msra.mxu0 %v6384_v54  ;;  %1222 = vmatpush.bf16.msrb.mxu2 %v6385_v22 }
 0x11a   :  { %1407 = vmatpush.bf16.msrb.mxu3 %v6383_v24  ;;  %1382 = vmatpush.bf16.msrb.mxu1 %v6386_v10  ;;  %v6403_v10 = vld [vmem:[#allocation70_spill] sm:$0xff]  ;;  %v6407_v24 = vld [vmem:[#allocation84_spill] sm:$0xff] }
 0x11b   :  { %1079 = vmatmul.bf16.vlgmr.msrb.gmra.mxu0 %v698_v33  ;;  %1105 = vmatmul.bf16.vlgmr.msra.gmra.mxu2 %v698_v33 }
 0x11d   :  { %1197 = vmatpush.bf16.msra.mxu0 %v6388_v25  ;;  %1223 = vmatpush.bf16.msrb.mxu2 %v6389_v47 }
 0x11e   :  { %1408 = vmatpush.bf16.msrb.mxu3 %v6387_v5  ;;  %1383 = vmatpush.bf16.msrb.mxu1 %v6390_v46  ;;  %v6400_v5 = vld [vmem:[#allocation34_spill] sm:$0xff]  ;;  %v6401_v46 = vld [vmem:[#allocation37_spill] sm:$0xff] }
 0x121   :  { %1198 = vmatpush.bf16.msra.mxu0 %v6392_v14  ;;  %1224 = vmatpush.bf16.msrb.mxu2 %v6393_v20 }
 0x122   :  { %1409 = vmatpush.bf16.msrb.mxu3 %v6391_v53  ;;  %1384 = vmatpush.bf16.msrb.mxu1 %v6394_v61  ;;  %v6402_v53 = vld [vmem:[#allocation69_spill] sm:$0xff]  ;;  %v6405_v61 = vld [vmem:[#allocation80_spill] sm:$0xff] }
 0x125   :  { %1199 = vmatpush.bf16.msra.mxu0 %v6396_v17  ;;  %1225 = vmatpush.bf16.msrb.mxu2 %v6397_v62 }
 0x126   :  { %1410 = vmatpush.bf16.msrb.mxu3 %v6395_v8  ;;  %1385 = vmatpush.bf16.msrb.mxu1 %v6398_v6  ;;  %v6404_v8 = vld [vmem:[#allocation79_spill] sm:$0xff]  ;;  %v1041_v6 = vpop.f32.mrf.mxu1 }
 0x129   :  { %1200 = vmatpush.bf16.msra.mxu0 %v6400_v5  ;;  %1226 = vmatpush.bf16.msrb.mxu2 %v6401_v46 }
 0x12a   :  { %1411 = vmatpush.bf16.msrb.mxu3 %v6399_v23  ;;  %1386 = vmatpush.bf16.msrb.mxu1 %v4759_v36  ;;  %v6406_v23 = vld [vmem:[#allocation83_spill] sm:$0xff]  ;;  %v6410_v36 = vld [vmem:[#allocation94_spill] sm:$0xff] }
 0x12c   :  { %1201 = vmatmul.bf16.vlgmr.msra.gmra.mxu0 %v698_v33  ;;  %1227 = vmatmul.bf16.vlgmr.msrb.gmra.mxu2 %v698_v33  ;;  %v1067_v28 = vpop.f32.mrf.mxu3 }
 0x12d   :  { %1314 = vmatpush.bf16.msrb.mxu0 %v6402_v53  ;;  %1340 = vmatpush.bf16.msra.mxu2 %v6403_v10 }
 0x12e   :  { %1412 = vmatpush.bf16.msrb.mxu3 %v4766_v38  ;;  %v1043_v41 = vpop.f32.mrf.mxu1  ;;  %v6411_v38 = vld [vmem:[#allocation95_spill] sm:$0xff] }
 0x131   :  { %1315 = vmatpush.bf16.msrb.mxu0 %v6404_v8  ;;  %1341 = vmatpush.bf16.msra.mxu2 %v6405_v61 }
 0x134   :  { %v1069_v33 = vpop.f32.mrf.mxu3 }
 0x135   :  { %1316 = vmatpush.bf16.msrb.mxu0 %v6406_v23  ;;  %1342 = vmatpush.bf16.msra.mxu2 %v6407_v24 }
 0x139   :  { %1317 = vmatpush.bf16.msrb.mxu0 %v6408_v48  ;;  %1343 = vmatpush.bf16.msra.mxu2 %v6409_v37 }
 0x13d   :  { %1318 = vmatpush.bf16.msrb.mxu0 %v6410_v36  ;;  %1344 = vmatpush.bf16.msra.mxu2 %v6411_v38 }
 0x141   :  { %1319 = vmatpush.bf16.msrb.mxu0 %v6412_v35  ;;  %1345 = vmatpush.bf16.msra.mxu2 %v6413_v29 }
 0x145   :  { %1320 = vmatpush.bf16.msrb.mxu0 %v6414_v12  ;;  %1346 = vmatpush.bf16.msra.mxu2 %v4757_v60 }
 0x149   :  { %1321 = vmatpush.bf16.msrb.mxu0 %v4768_v39  ;;  %1347 = vmatpush.bf16.msra.mxu2 %v4771_v50 }
 0x14a   :  { %v4950_v41 = vpop.f32.mrf.mxu1 }
 0x14d   :  { %1366 = vmatpush.bf16.msra.mxu0 %v4775_v3  ;;  %1392 = vmatpush.bf16.msrb.mxu2 %v4777_v58 }
 0x151   :  { %1367 = vmatpush.bf16.msra.mxu0 %v4785_v30  ;;  %1393 = vmatpush.bf16.msrb.mxu2 %v4787_v2 }
 0x152   :  { %v1095_v33 = vpop.f32.mrf.mxu1 }
 0x153   :  { %v402_v33 = vld [vmem:[%s6033_s5] sm:$0xf] }
 0x154   :  { %v1119_v50 = vpop.f32.mrf.mxu3 }
 0x155   :  { %1368 = vmatpush.bf16.msra.mxu0 %v4802_v44  ;;  %1394 = vmatpush.bf16.msrb.mxu2 %v4804_v15  ;;  %v6417_v15 = vld [vmem:[#allocation55_spill] sm:$0xff] }
 0x156   :  { %v172_v44 = vadd.f32 %v6417_v15, %v4617_v16 }
 0x159   :  { %1369 = vmatpush.bf16.msra.mxu0 %v4812_v34  ;;  %1395 = vmatpush.bf16.msrb.mxu2 %v4820_v40 }
 0x15c   :  { %v1121_v2 = vpop.f32.mrf.mxu3 }
 0x15d   :  { %1370 = vmatpush.bf16.msra.mxu0 %v4827_v55  ;;  %1396 = vmatpush.bf16.msrb.mxu2 %v4829_v9  ;;  %v4967_v55 = vperm.slane %v402_v33, 0  ;;  %v4970_v2 = vperm.slane %v402_v33, 1 }
 0x15f   :  { %6415 = vst [vmem:[#allocation17_spill] sm:$0xff] %v4967_v55 }
 0x160   :  { %6416 = vst [vmem:[#allocation22_spill] sm:$0xff] %v4970_v2 }
 0x161   :  { %1371 = vmatpush.bf16.msra.mxu0 %v4837_v18  ;;  %1397 = vmatpush.bf16.msrb.mxu2 %v4839_v51 }
 0x165   :  { %1372 = vmatpush.bf16.msra.mxu0 %v4847_v27  ;;  %1398 = vmatpush.bf16.msrb.mxu2 %v4851_v59 }
 0x169   :  { %1373 = vmatpush.bf16.msra.mxu0 %v4857_v11  ;;  %1399 = vmatpush.bf16.msrb.mxu2 %v4859_v49 }
 0x188   :  { %v1028_v9 = vpop.f32.mrf.mxu0 }
 0x189   :  { %v1029_v18 = vadd.f32 %v1028_v9, %v4967_v55  ;;  %v1215_v40 = vpop.f32.mrf.mxu1 }
 0x18a   :  { %v1246_v3 = vadd.f32 %v1215_v40, %v172_v44  ;;  %v4983_v44 = vperm.slane %v402_v33, 2 }
 0x18b   :  { %v1042_v51 = vadd.f32 %v1041_v6, %v1029_v18 }
 0x18c   :  { %v3783_v6 = vmul.f32 -1.442695, %v1246_v3  ;;  %6421 = vst [vmem:[#allocation26_spill] sm:$0xff] %v4983_v44 }
 0x18d   :  { %v3779_v27 = vmul.f32 -1.442695, %v1042_v51 }
 0x18e   :  { %v1054_v34 = vpop.f32.mrf.mxu2 }
 0x18f   :  { %3986 = vpow2.f32 %v3779_v27  ;;  %v1055_v11 = vadd.f32 %v1054_v34, %v4970_v2  ;;  %v1241_v59 = vpop.f32.mrf.mxu3  ;;  %v6419_v2 = vld [vmem:[#allocation62_spill] sm:$0xff] }
 0x190   :  { %v1030_v49 = vpop.f32.mrf.mxu0 }
 0x191   :  { %v1068_v30 = vadd.f32 %v1067_v28, %v1055_v11  ;;  %v1217_v58 = vpop.f32.mrf.mxu1  ;;  %v6418_v49 = vld [vmem:[#allocation73_spill] sm:$0xff]  ;;  %v4980_v11 = vperm.slane %v402_v33, 3 }
 0x192   :  { %v254_v55 = vadd.f32 %v6419_v2, %v6418_v49 }
 0x193   :  { %v3780_v39 = vmul.f32 -1.442695, %v1068_v30  ;;  %6420 = vst [vmem:[#allocation20_spill] sm:$0xff] %v4980_v11 }
 0x194   :  { %v1248_v58 = vadd.f32 %v1241_v59, %v254_v55 }
 0x195   :  { %v3987_v60 = vpop.eup %3986  ;;  %3988 = vpow2.f32 %v3780_v39 }
 0x196   :  { %v4975_v9 = vadd.f32 1.0, %v3987_v60  ;;  %v1056_v18 = vpop.f32.mrf.mxu2 }
 0x197   :  { %v1243_v51 = vpop.f32.mrf.mxu3 }
 0x198   :  { %3990 = vrcp.f32 %v4975_v9  ;;  %v1080_v27 = vpop.f32.mrf.mxu0  ;;  %vm1132_vm0 = vweird.f32 %v4975_v9 }
 0x199   :  { %3992 = vpow2.f32 %v3783_v6  ;;  %v3784_v6 = vmul.f32 -1.442695, %v1248_v58  ;;  %v1081_v49 = vadd.f32 %v1080_v27, %v4983_v44  ;;  %v1138_v27 = vand.u32 2147483648, %v4975_v9 }
 0x19b   :  { %v3989_v34 = vpop.eup %3988 }
 0x19c   :  { %v1145_v15 = vadd.f32 1.0, %v3989_v34 }
 0x19e   :  { %v3991_v40 = vpop.eup %3990  ;;  %3994 = vrcp.f32 %v1145_v15  ;;  %v1106_v39 = vpop.f32.mrf.mxu2  ;;  %vm1151_vm15 = vweird.f32 %v1145_v15 }
 0x19f   :  { %v1128_v60 = vmul.f32 %v3991_v40, %v4975_v9  ;;  %v3993_v3 = vpop.eup %3992  ;;  %v1107_v28 = vadd.f32 %v1106_v39, %v4980_v11  ;;  %3996 = vpow2.f32 %v3784_v6  ;;  %v1094_v39 = vadd.f32 %v4950_v41, %v1081_v49 }
 0x1a0   :  { %v1082_v30 = vpop.f32.mrf.mxu0  ;;  %v4986_v2 = vadd.f32 1.0, %v3993_v3  ;;  %vm1133_vm14 = vweird.f32 %v3991_v40  ;;  %v6422_v3 = vld [vmem:[#allocation50_spill] sm:$0xff] }
 0x1a1   :  { %v1129_v18 = vsub.f32 1.0, %v1128_v60  ;;  %v1120_v51 = vadd.f32 %v1119_v50, %v1107_v28  ;;  %v1157_v30 = vand.u32 2147483648, %v1145_v15  ;;  %v1155_v60 = vand.u32 2147483647, %v1145_v15  ;;  %vm1134_vm2 = vmor %vm1132_vm0, %vm1133_vm14 }
 0x1a2   :  { %vm1277_vm10 = vweird.f32 %v4986_v2 }
 0x1a3   :  { %v3781_v12 = vmul.f32 -1.442695, %v1120_v51  ;;  %v1130_v55 = vmul.f32 %v3991_v40, %v1129_v18  ;;  %v1158_v41 = vor.u32 1.1754944e-38, %v1157_v30  ;;  %vm1156_vm3 = vcmp.eq.f32.partialorder %v1155_v60, 8.507059e+37 }
 0x1a4   :  { %v3995_v16 = vpop.eup %3994 }
 0x1a5   :  { %v1147_v34 = vmul.f32 %v3995_v16, %v1145_v15  ;;  %3998 = vpow2.f32 %v3781_v12  ;;  %vm1152_vm13 = vweird.f32 %v3995_v16  ;;  %v1131_v58 = vadd.f32 %v3991_v40, %v1130_v55  ;;  %v3997_v6 = vpop.eup %3996 }
 0x1a6   :  { %v1108_v59 = vpop.f32.mrf.mxu2  ;;  %4000 = vrcp.f32 %v4986_v2  ;;  %v1136_v12 = vand.u32 2147483647, %v4975_v9  ;;  %vm1153_vm1 = vmor %vm1151_vm15, %vm1152_vm13  ;;  %v4999_v30 = vadd.f32 1.0, %v3997_v6 }
 0x1a7   :  { %v1148_v29 = vsub.f32 1.0, %v1147_v34  ;;  %4002 = vtanh.f32 %v1094_v39  ;;  %v1135_v55 = vsel %vm1134_vm2, %v3991_v40, %v1131_v58  ;;  %v1139_v59 = vor.u32 1.1754944e-38, %v1138_v27 }
 0x1a8   :  { %vm1137_vm4 = vcmp.eq.f32.partialorder %v1136_v12, 8.507059e+37  ;;  %vm1297_vm2 = vweird.f32 %v4999_v30 }
 0x1a9   :  { %v1149_v33 = vmul.f32 %v3995_v16, %v1148_v29  ;;  %v1202_v50 = vpop.f32.mrf.mxu0 }
 0x1aa   :  { %v1245_v28 = vadd.f32 %v1202_v50, %v6422_v3  ;;  %v1140_v3 = vsel %vm1137_vm4, %v1139_v59, %v1135_v55 }
 0x1ab   :  { %v1150_v18 = vadd.f32 %v3995_v16, %v1149_v33  ;;  %v3999_v51 = vpop.eup %3998 }
 0x1ac   :  { %v3782_v29 = vmul.f32 -1.442695, %v1245_v28  ;;  %v4995_v34 = vpop.eup %4000  ;;  %v1165_v15 = vadd.f32 1.0, %v3999_v51 }
 0x1ad   :  { %v1154_v49 = vsel %vm1153_vm1, %v3995_v16, %v1150_v18  ;;  %v1273_v28 = vmul.f32 %v4995_v34, %v4986_v2  ;;  %v4003_v39 = vpop.eup %4002  ;;  %vm1278_vm7 = vweird.f32 %v4995_v34 }
 0x1ae   :  { %4004 = vpow2.f32 %v3782_v29  ;;  %v1159_v33 = vsel %vm1156_vm3, %v1158_v41, %v1154_v49  ;;  %v1182_v44 = vmul.f32 %v4003_v39, %v1140_v3  ;;  %v1177_v6 = vand.u32 2147483648, %v1165_v15  ;;  %v6424_v49 = vld [vmem:[#allocation61_spill] sm:$0xff]  ;;  %vm5017_vm11 = vmor %vm1277_vm10, %vm1278_vm7 }
 0x1af   :  { %v1228_v50 = vpop.f32.mrf.mxu2  ;;  %4006 = vrcp.f32 %v1165_v15  ;;  %v1181_v16 = vmul.f32 0.0, %v1159_v33  ;;  %v1274_v60 = vsub.f32 1.0, %v1273_v28  ;;  %v213_v55 = vadd.f32 %v6424_v49, %v4651_v19 }
 0x1b0   :  { %4008 = vrcp.f32 %v4999_v30  ;;  %v1175_v33 = vand.u32 2147483647, %v1165_v15  ;;  %vm1171_vm6 = vweird.f32 %v1165_v15 }
 0x1b1   :  { %v1204_v9 = vpop.f32.mrf.mxu0  ;;  %v5002_v27 = vadd.f32 %v1182_v44, %v1181_v16  ;;  %v1275_v41 = vmul.f32 %v4995_v34, %v1274_v60  ;;  %v1247_v44 = vadd.f32 %v1228_v50, %v213_v55  ;;  %v1283_v60 = vand.u32 2147483648, %v4986_v2  ;;  %v6432_v55 = vld [vmem:[#allocation18_spill] sm:$0xff] }
 0x1b2   :  { %vm1176_vm9 = vcmp.eq.f32.partialorder %v1175_v33, 8.507059e+37 }
 0x1b3   :  { %6423 = vst [vmem:[#allocation24_spill] sm:$0xff] %v5002_v27  ;;  %v1276_v39 = vadd.f32 %v4995_v34, %v1275_v41  ;;  %v1284_v33 = vor.u32 1.1754944e-38, %v1283_v60 }
 0x1b4   :  { %v4005_v18 = vpop.eup %4004 }
 0x1b5   :  { %v1252_v40 = vadd.f32 1.0, %v4005_v18  ;;  %v4007_v58 = vpop.eup %4006  ;;  %v1178_v18 = vor.u32 1.1754944e-38, %v1177_v6 }
 0x1b6   :  { %v1167_v12 = vmul.f32 %v4007_v58, %v1165_v15  ;;  %vm1172_vm5 = vweird.f32 %v4007_v58  ;;  %v5008_v3 = vpop.eup %4008  ;;  %v1281_v15 = vand.u32 2147483647, %v4986_v2 }
 0x1b7   :  { %4010 = vrcp.f32 %v1252_v40  ;;  %v1230_v29 = vpop.f32.mrf.mxu2  ;;  %vm1173_vm8 = vmor %vm1171_vm6, %vm1172_vm5  ;;  %v1264_v41 = vand.u32 2147483648, %v1252_v40  ;;  %v1262_v19 = vand.u32 2147483647, %v1252_v40  ;;  %vm1258_vm13 = vweird.f32 %v1252_v40 }
 0x1b8   :  { %v1168_v51 = vsub.f32 1.0, %v1167_v12  ;;  %4012 = vtanh.f32 %v5002_v27  ;;  %v1293_v12 = vmul.f32 %v5008_v3, %v4999_v30  ;;  %vm1282_vm14 = vcmp.eq.f32.partialorder %v1281_v15, 8.507059e+37  ;;  %v6429_v15 = vld [vmem:[#allocation14_spill] sm:$0xff] }
 0x1b9   :  { %4014 = vtanh.f32 %v1247_v44  ;;  %v1265_v2 = vor.u32 1.1754944e-38, %v1264_v41  ;;  %vm1263_vm0 = vcmp.eq.f32.partialorder %v1262_v19, 8.507059e+37  ;;  %vm1298_vm1 = vweird.f32 %v5008_v3 }
 0x1ba   :  { %v1169_v59 = vmul.f32 %v4007_v58, %v1168_v51  ;;  %v1303_v19 = vand.u32 2147483648, %v4999_v30  ;;  %vm1299_vm3 = vmor %vm1297_vm2, %vm1298_vm1 }
 0x1bc   :  { %v1170_v28 = vadd.f32 %v4007_v58, %v1169_v59 }
 0x1bd   :  { %v4011_v9 = vpop.eup %4010 }
 0x1be   :  { %v1254_v16 = vmul.f32 %v4011_v9, %v1252_v40  ;;  %v1174_v29 = vsel %vm1173_vm8, %v4007_v58, %v1170_v28  ;;  %v4013_v51 = vpop.eup %4012  ;;  %vm1259_vm12 = vweird.f32 %v4011_v9  ;;  %v1280_v58 = vsel %vm5017_vm11, %v4995_v34, %v1276_v39 }
 0x1bf   :  { %v1179_v49 = vsel %vm1176_vm9, %v1178_v18, %v1174_v29  ;;  %v1294_v28 = vsub.f32 1.0, %v1293_v12  ;;  %vm1260_vm15 = vmor %vm1258_vm13, %vm1259_vm12  ;;  %v1285_v18 = vsel %vm1282_vm14, %v1284_v33, %v1280_v58  ;;  %v6427_v29 = vld [vmem:[#allocation12_spill] sm:$0xff]  ;;  %v6433_v33 = vld [vmem:[#allocation19_spill] sm:$0xff] }
 0x1c0   :  { %v1255_v50 = vsub.f32 1.0, %v1254_v16  ;;  %v1185_v6 = vmul.f32 %v4013_v51, %v1179_v49  ;;  %v6428_v51 = vld [vmem:[#allocation13_spill] sm:$0xff]  ;;  %v1307_v60 = vmul.f32 %v1285_v18, %v4888_v7  ;;  %v6430_v49 = vld [vmem:[#allocation15_spill] sm:$0xff]  ;;  %v6431_v7 = vld [vmem:[#allocation16_spill] sm:$0xff] }
 0x1c1   :  { %v1295_v34 = vmul.f32 %v5008_v3, %v1294_v28  ;;  %v6434_v28 = vld [vmem:[#allocation21_spill] sm:$0xff] }
 0x1c2   :  { %v1256_v59 = vmul.f32 %v4011_v9, %v1255_v50  ;;  %v1313_v16 = vpack.c.bf16 %v1185_v6, %v1185_v6  ;;  %v4015_v50 = vpop.eup %4014  ;;  %v1304_v6 = vor.u32 1.1754944e-38, %v1303_v19  ;;  %v6445_v19 = vld [vmem:[#allocation43_spill] sm:$0xff] }
 0x1c4   :  { %v1257_v27 = vadd.f32 %v4011_v9, %v1256_v59  ;;  %1335 = vmatmul.bf16.vlgmr.msra.gmra.mxu1 %v1313_v16  ;;  %1361 = vmatmul.bf16.vlgmr.msra.gmra.mxu3 %v1313_v16 }
 0x1c5   :  { %1501 = vmatpush.bf16.msra.mxu1 %v6427_v29  ;;  %1527 = vmatpush.bf16.msra.mxu3 %v6428_v51 }
 0x1c6   :  { %v1261_v44 = vsel %vm1260_vm15, %v4011_v9, %v1257_v27  ;;  %v1296_v27 = vadd.f32 %v5008_v3, %v1295_v34  ;;  %v1301_v9 = vand.u32 2147483647, %v4999_v30  ;;  %v6435_v30 = vld [vmem:[#allocation23_spill] sm:$0xff]  ;;  %v6439_v34 = vld [vmem:[#allocation32_spill] sm:$0xff] }
 0x1c7   :  { %v1266_v39 = vsel %vm1263_vm0, %v1265_v2, %v1261_v44  ;;  %v6436_v44 = vld [vmem:[#allocation25_spill] sm:$0xff] }
 0x1c8   :  { %v1308_v12 = vmul.f32 %v4015_v50, %v1266_v39  ;;  %v1300_v41 = vsel %vm1299_vm3, %v5008_v3, %v1296_v27  ;;  %vm1302_vm4 = vcmp.eq.f32.partialorder %v1301_v9, 8.507059e+37  ;;  %v6437_v3 = vld [vmem:[#allocation27_spill] sm:$0xff]  ;;  %v6438_v50 = vld [vmem:[#allocation29_spill] sm:$0xff]  ;;  %v6441_v39 = vld [vmem:[#allocation38_spill] sm:$0xff] }
 0x1c9   :  { %1502 = vmatpush.bf16.msra.mxu1 %v6429_v15  ;;  %1528 = vmatpush.bf16.msra.mxu3 %v6430_v49  ;;  %v1305_v58 = vsel %vm1302_vm4, %v1304_v6, %v1300_v41  ;;  %v6444_v27 = vld [vmem:[#allocation42_spill] sm:$0xff]  ;;  %v6446_v9 = vld [vmem:[#allocation44_spill] sm:$0xff]  ;;  %v6447_v41 = vld [vmem:[#allocation45_spill] sm:$0xff] }
 0x1ca   :  { %v5028_v40 = vadd.f32 %v1308_v12, %v1307_v60  ;;  %v6442_v60 = vld [vmem:[#allocation39_spill] sm:$0xff]  ;;  %v6443_v12 = vld [vmem:[#allocation40_spill] sm:$0xff] }
 0x1cb   :  { %v6448_v6 = vld [vmem:[#allocation63_spill] sm:$0xff] }
 0x1cc   :  { %4016 = vtanh.f32 %v5028_v40 }
 0x1cd   :  { %1503 = vmatpush.bf16.msra.mxu1 %v6431_v7  ;;  %1529 = vmatpush.bf16.msra.mxu3 %v6432_v55 }
 0x1d1   :  { %1504 = vmatpush.bf16.msra.mxu1 %v6433_v33  ;;  %1530 = vmatpush.bf16.msra.mxu3 %v6434_v28 }
 0x1d2   :  { %v4017_v59 = vpop.eup %4016 }
 0x1d3   :  { %v1311_v2 = vmul.f32 %v4017_v59, %v1305_v58  ;;  %v6449_v59 = vld [vmem:[#allocation66_spill] sm:$0xff]  ;;  %v6450_v58 = vld [vmem:[#allocation67_spill] sm:$0xff] }
 0x1d4   :  { %1387 = vmatmul.bf16.vlgmr.msrb.gmra.mxu1 %v1313_v16  ;;  %1413 = vmatmul.bf16.vlgmr.msrb.gmra.mxu3 %v1313_v16  ;;  %v6440_v16 = vld [vmem:[#allocation36_spill] sm:$0xff] }
 0x1d5   :  { %v1312_v18 = vpack.c.bf16 %v1311_v2, %v1311_v2  ;;  %1505 = vmatpush.bf16.msra.mxu1 %v6435_v30  ;;  %1531 = vmatpush.bf16.msra.mxu3 %v6436_v44  ;;  %v6451_v2 = vld [vmem:[#allocation68_spill] sm:$0xff] }
 0x1d7   :  { %1322 = vmatmul.bf16.vlgmr.msrb.gmra.mxu0 %v1312_v18  ;;  %1348 = vmatmul.bf16.vlgmr.msra.gmra.mxu2 %v1312_v18 }
 0x1d8   :  { %1488 = vmatpush.bf16.msrb.mxu0 %v4400_v13  ;;  %1514 = vmatpush.bf16.msra.mxu2 %v4417_v32 }
 0x1d9   :  { %1506 = vmatpush.bf16.msra.mxu1 %v6437_v3  ;;  %1532 = vmatpush.bf16.msra.mxu3 %v6438_v50 }
 0x1dc   :  { %1489 = vmatpush.bf16.msrb.mxu0 %v4412_v26  ;;  %1515 = vmatpush.bf16.msra.mxu2 %v4433_v45 }
 0x1dd   :  { %1507 = vmatpush.bf16.msra.mxu1 %v6439_v34  ;;  %1533 = vmatpush.bf16.msra.mxu3 %v4494_v42 }
 0x1e0   :  { %1490 = vmatpush.bf16.msrb.mxu0 %v6380_v31  ;;  %1516 = vmatpush.bf16.msra.mxu2 %v6381_v56 }
 0x1e1   :  { %1508 = vmatpush.bf16.msra.mxu1 %v6440_v16  ;;  %1534 = vmatpush.bf16.msra.mxu3 %v6441_v39 }
 0x1e4   :  { %1491 = vmatpush.bf16.msrb.mxu0 %v6384_v54  ;;  %1517 = vmatpush.bf16.msra.mxu2 %v6385_v22 }
 0x1e5   :  { %1622 = vmatpush.bf16.msrb.mxu1 %v6442_v60  ;;  %1648 = vmatpush.bf16.msrb.mxu3 %v6443_v12 }
 0x1e6   :  { %1509 = vmatmul.bf16.vlgmr.msra.gmra.mxu1 %v1312_v18  ;;  %1535 = vmatmul.bf16.vlgmr.msra.gmra.mxu3 %v1312_v18 }
 0x1e7   :  { %1374 = vmatmul.bf16.vlgmr.msra.gmra.mxu0 %v1312_v18  ;;  %1400 = vmatmul.bf16.vlgmr.msrb.gmra.mxu2 %v1312_v18 }
 0x1e8   :  { %1492 = vmatpush.bf16.msrb.mxu0 %v6388_v25  ;;  %1518 = vmatpush.bf16.msra.mxu2 %v6389_v47 }
 0x1e9   :  { %1623 = vmatpush.bf16.msrb.mxu1 %v6444_v27  ;;  %1649 = vmatpush.bf16.msrb.mxu3 %v6445_v19 }
 0x1ec   :  { %1493 = vmatpush.bf16.msrb.mxu0 %v6392_v14  ;;  %1519 = vmatpush.bf16.msra.mxu2 %v6393_v20 }
 0x1ed   :  { %1624 = vmatpush.bf16.msrb.mxu1 %v6446_v9  ;;  %1650 = vmatpush.bf16.msrb.mxu3 %v6447_v41 }
 0x1f0   :  { %1494 = vmatpush.bf16.msrb.mxu0 %v6396_v17  ;;  %1520 = vmatpush.bf16.msra.mxu2 %v6397_v62  ;;  %v6492_v17 = vld [vmem:[#allocation46_spill] sm:$0xff] }
 0x1f1   :  { %1625 = vmatpush.bf16.msrb.mxu1 %v4583_v57  ;;  %1651 = vmatpush.bf16.msrb.mxu3 %v4588_v0  ;;  %v6493_v0 = vld [vmem:[#allocation54_spill] sm:$0xff] }
 0x1f4   :  { %1495 = vmatpush.bf16.msrb.mxu0 %v6400_v5  ;;  %1521 = vmatpush.bf16.msra.mxu2 %v6401_v46  ;;  %v6489_v5 = vld [vmem:[#allocation65_spill] sm:$0xff] }
 0x1f5   :  { %1626 = vmatpush.bf16.msrb.mxu1 %v4592_v4  ;;  %1652 = vmatpush.bf16.msrb.mxu3 %v4594_v21 }
 0x1f7   :  { %1496 = vmatmul.bf16.vlgmr.msrb.gmra.mxu0 %v1312_v18  ;;  %1522 = vmatmul.bf16.vlgmr.msra.gmra.mxu2 %v1312_v18  ;;  %v6452_v18 = vld [vmem:[#allocation71_spill] sm:$0xff] }
 0x1f8   :  { %1609 = vmatpush.bf16.msra.mxu0 %v6402_v53  ;;  %1635 = vmatpush.bf16.msrb.mxu2 %v6403_v10 }
 0x1f9   :  { %1627 = vmatpush.bf16.msrb.mxu1 %v4606_v52  ;;  %1653 = vmatpush.bf16.msrb.mxu3 %v4608_v1 }
 0x1fc   :  { %1610 = vmatpush.bf16.msra.mxu0 %v6404_v8  ;;  %1636 = vmatpush.bf16.msrb.mxu2 %v6405_v61 }
 0x1fd   :  { %1628 = vmatpush.bf16.msrb.mxu1 %v4612_v63  ;;  %1654 = vmatpush.bf16.msrb.mxu3 %v4614_v43  ;;  %v6453_v63 = vld [vmem:[#allocation74_spill] sm:$0xff]  ;;  %v6487_v43 = vld [vmem:[#allocation17_spill] sm:$0xff] }
 0x200   :  { %1611 = vmatpush.bf16.msra.mxu0 %v6406_v23  ;;  %1637 = vmatpush.bf16.msrb.mxu2 %v6407_v24  ;;  %v6454_v24 = vld [vmem:[#allocation81_spill] sm:$0xff] }
 0x201   :  { %1629 = vmatpush.bf16.msrb.mxu1 %v6448_v6  ;;  %1655 = vmatpush.bf16.msrb.mxu3 %v6449_v59  ;;  %v6455_v6 = vld [vmem:[#allocation82_spill] sm:$0xff] }
 0x204   :  { %1612 = vmatpush.bf16.msra.mxu0 %v6408_v48  ;;  %1638 = vmatpush.bf16.msrb.mxu2 %v6409_v37  ;;  %v6458_v48 = vld [vmem:[#allocation86_spill] sm:$0xff]  ;;  %v6459_v37 = vld [vmem:[#allocation105_spill] sm:$0xff] }
 0x205   :  { %1674 = vmatpush.bf16.msra.mxu1 %v6450_v58  ;;  %1700 = vmatpush.bf16.msra.mxu3 %v6451_v2  ;;  %v6456_v58 = vld [vmem:[#allocation102_spill] sm:$0xff]  ;;  %v6457_v2 = vld [vmem:[#allocation85_spill] sm:$0xff] }
 0x208   :  { %1613 = vmatpush.bf16.msra.mxu0 %v6410_v36  ;;  %1639 = vmatpush.bf16.msrb.mxu2 %v6411_v38  ;;  %v6462_v36 = vld [vmem:[#allocation93_spill] sm:$0xff]  ;;  %v6463_v38 = vld [vmem:[#allocation112_spill] sm:$0xff] }
 0x209   :  { %1675 = vmatpush.bf16.msra.mxu1 %v6452_v18  ;;  %1701 = vmatpush.bf16.msra.mxu3 %v6453_v63  ;;  %v6460_v18 = vld [vmem:[#allocation108_spill] sm:$0xff] }
 0x20a   :  { %v6461_v63 = vld [vmem:[#allocation92_spill] sm:$0xff] }
 0x20c   :  { %1614 = vmatpush.bf16.msra.mxu0 %v6412_v35  ;;  %1640 = vmatpush.bf16.msrb.mxu2 %v6456_v58  ;;  %v6466_v35 = vld [vmem:[#allocation115_spill] sm:$0xff]  ;;  %v6467_v58 = vld [vmem:[#allocation96_spill] sm:$0xff] }
 0x20d   :  { %1676 = vmatpush.bf16.msra.mxu1 %v6454_v24  ;;  %1702 = vmatpush.bf16.msra.mxu3 %v6455_v6  ;;  %v6464_v24 = vld [vmem:[#allocation113_spill] sm:$0xff]  ;;  %v6465_v6 = vld [vmem:[#allocation114_spill] sm:$0xff] }
 0x210   :  { %1615 = vmatpush.bf16.msra.mxu0 %v6459_v37  ;;  %1641 = vmatpush.bf16.msrb.mxu2 %v6460_v18  ;;  %v6470_v37 = vld [vmem:[#allocation117_spill] sm:$0xff]  ;;  %v6471_v18 = vld [vmem:[#allocation103_spill] sm:$0xff] }
 0x211   :  { %1677 = vmatpush.bf16.msra.mxu1 %v6457_v2  ;;  %1703 = vmatpush.bf16.msra.mxu3 %v6458_v48  ;;  %v6468_v2 = vld [vmem:[#allocation97_spill] sm:$0xff]  ;;  %v6469_v48 = vld [vmem:[#allocation116_spill] sm:$0xff] }
 0x214   :  { %1616 = vmatpush.bf16.msra.mxu0 %v6463_v38  ;;  %1642 = vmatpush.bf16.msrb.mxu2 %v6464_v24  ;;  %v6474_v38 = vld [vmem:[#allocation122_spill] sm:$0xff]  ;;  %v6475_v24 = vld [vmem:[#allocation109_spill] sm:$0xff] }
 0x215   :  { %1678 = vmatpush.bf16.msra.mxu1 %v6461_v63  ;;  %1704 = vmatpush.bf16.msra.mxu3 %v6462_v36  ;;  %v6472_v63 = vld [vmem:[#allocation104_spill] sm:$0xff]  ;;  %v6473_v36 = vld [vmem:[#allocation121_spill] sm:$0xff] }
 0x218   :  { %1661 = vmatpush.bf16.msrb.mxu0 %v6465_v6  ;;  %1687 = vmatpush.bf16.msra.mxu2 %v6466_v35  ;;  %v6476_v6 = vld [vmem:[#allocation111_spill] sm:$0xff] }
 0x219   :  { %1679 = vmatpush.bf16.msra.mxu1 %v6467_v58  ;;  %1705 = vmatpush.bf16.msra.mxu3 %v6468_v2  ;;  %v6477_v35 = vld [vmem:[#allocation123_spill] sm:$0xff]  ;;  %v6478_v58 = vld [vmem:[#allocation126_spill] sm:$0xff] }
 0x21a   :  { %v6479_v2 = vld [vmem:[#allocation127_spill] sm:$0xff] }
 0x21c   :  { %1662 = vmatpush.bf16.msrb.mxu0 %v6469_v48  ;;  %1688 = vmatpush.bf16.msra.mxu2 %v6470_v37  ;;  %v6480_v48 = vld [vmem:[#allocation128_spill] sm:$0xff]  ;;  %v6481_v37 = vld [vmem:[#allocation129_spill] sm:$0xff] }
 0x21d   :  { %1680 = vmatpush.bf16.msra.mxu1 %v6471_v18  ;;  %1706 = vmatpush.bf16.msra.mxu3 %v6472_v63  ;;  %v6482_v18 = vld [vmem:[#allocation130_spill] sm:$0xff]  ;;  %v6483_v63 = vld [vmem:[#allocation131_spill] sm:$0xff] }
 0x220   :  { %1663 = vmatpush.bf16.msrb.mxu0 %v6473_v36  ;;  %1689 = vmatpush.bf16.msra.mxu2 %v6474_v38  ;;  %v6484_v36 = vld [vmem:[#allocation132_spill] sm:$0xff]  ;;  %v6485_v38 = vld [vmem:[#allocation133_spill] sm:$0xff] }
 0x221   :  { %1681 = vmatpush.bf16.msra.mxu1 %v6475_v24  ;;  %1707 = vmatpush.bf16.msra.mxu3 %v6476_v6  ;;  %v6486_v24 = vld [vmem:[#allocation134_spill] sm:$0xff] }
 0x224   :  { %1664 = vmatpush.bf16.msrb.mxu0 %v6477_v35  ;;  %1690 = vmatpush.bf16.msra.mxu2 %v6478_v58 }
 0x228   :  { %1665 = vmatpush.bf16.msrb.mxu0 %v6479_v2  ;;  %1691 = vmatpush.bf16.msra.mxu2 %v6480_v48 }
 0x22c   :  { %1666 = vmatpush.bf16.msrb.mxu0 %v6481_v37  ;;  %1692 = vmatpush.bf16.msra.mxu2 %v6482_v18 }
 0x230   :  { %1667 = vmatpush.bf16.msrb.mxu0 %v6483_v63  ;;  %1693 = vmatpush.bf16.msra.mxu2 %v6484_v36  ;;  %v6488_v63 = vld [vmem:[#allocation22_spill] sm:$0xff] }
 0x234   :  { %1668 = vmatpush.bf16.msrb.mxu0 %v6485_v38  ;;  %1694 = vmatpush.bf16.msra.mxu2 %v6486_v24 }
 0x241   :  { %v1336_v6 = vpop.f32.mrf.mxu1 }
 0x247   :  { %v1362_v35 = vpop.f32.mrf.mxu3 }
 0x249   :  { %v1338_v59 = vpop.f32.mrf.mxu1 }
 0x24f   :  { %v1364_v58 = vpop.f32.mrf.mxu3 }
 0x251   :  { %v1388_v23 = vpop.f32.mrf.mxu1 }
 0x254   :  { %v1323_v2 = vpop.f32.mrf.mxu0 }
 0x255   :  { %v1324_v48 = vadd.f32 %v1323_v2, %v6487_v43 }
 0x257   :  { %v1337_v61 = vadd.f32 %v1336_v6, %v1324_v48  ;;  %v1414_v37 = vpop.f32.mrf.mxu3 }
 0x259   :  { %v3785_v8 = vmul.f32 -1.442695, %v1337_v61  ;;  %v1390_v18 = vpop.f32.mrf.mxu1 }
 0x25a   :  { %v1349_v1 = vpop.f32.mrf.mxu2 }
 0x25b   :  { %4018 = vpow2.f32 %v3785_v8  ;;  %v1350_v36 = vadd.f32 %v1349_v1, %v6488_v63 }
 0x25c   :  { %v1325_v52 = vpop.f32.mrf.mxu0 }
 0x25d   :  { %v1363_v38 = vadd.f32 %v1362_v35, %v1350_v36 }
 0x25f   :  { %v3786_v10 = vmul.f32 -1.442695, %v1363_v38  ;;  %v1416_v24 = vpop.f32.mrf.mxu3 }
 0x261   :  { %v4019_v53 = vpop.eup %4018  ;;  %4020 = vpow2.f32 %v3786_v10  ;;  %v6490_v10 = vld [vmem:[#allocation76_spill] sm:$0xff] }
 0x262   :  { %v5133_v59 = vadd.f32 1.0, %v4019_v53  ;;  %v1351_v46 = vpop.f32.mrf.mxu2 }
 0x263   :  { %v1510_v58 = vpop.f32.mrf.mxu1 }
 0x264   :  { %v1541_v2 = vadd.f32 %v1510_v58, %v6489_v5  ;;  %4022 = vrcp.f32 %v5133_v59  ;;  %v1375_v48 = vpop.f32.mrf.mxu0  ;;  %vm1427_vm7 = vweird.f32 %v5133_v59 }
 0x266   :  { %v3789_v61 = vmul.f32 -1.442695, %v1541_v2  ;;  %v6491_v2 = vld [vmem:[#allocation26_spill] sm:$0xff] }
 0x267   :  { %v4021_v6 = vpop.eup %4020 }
 0x268   :  { %4024 = vpow2.f32 %v3789_v61  ;;  %v1440_v8 = vadd.f32 1.0, %v4021_v6  ;;  %v1376_v61 = vadd.f32 %v1375_v48, %v6491_v2 }
 0x269   :  { %v1536_v1 = vpop.f32.mrf.mxu3 }
 0x26a   :  { %v4023_v52 = vpop.eup %4022  ;;  %4026 = vrcp.f32 %v1440_v8  ;;  %v1401_v35 = vpop.f32.mrf.mxu2  ;;  %v1543_v46 = vadd.f32 %v1536_v1, %v6490_v10  ;;  %vm1446_vm8 = vweird.f32 %v1440_v8 }
 0x26b   :  { %v1512_v38 = vpop.f32.mrf.mxu1  ;;  %v1423_v36 = vmul.f32 %v4023_v52, %v5133_v59  ;;  %v1402_v24 = vadd.f32 %v1401_v35, %v4980_v11  ;;  %v134_v35 = vadd.f32 %v6493_v0, %v6492_v17  ;;  %vm1428_vm5 = vweird.f32 %v4023_v52  ;;  %v6525_v17 = vld [vmem:[#allocation94_spill] sm:$0xff] }
 0x26c   :  { %v1377_v53 = vpop.f32.mrf.mxu0  ;;  %v3790_v4 = vmul.f32 -1.442695, %v1543_v46  ;;  %v1450_v46 = vand.u32 2147483647, %v1440_v8  ;;  %v1431_v0 = vand.u32 2147483647, %v5133_v59  ;;  %vm5149_vm9 = vmor %vm1427_vm7, %vm1428_vm5 }
 0x26d   :  { %v1424_v18 = vsub.f32 1.0, %v1423_v36  ;;  %v1415_v58 = vadd.f32 %v1414_v37, %v1402_v24  ;;  %v1389_v36 = vadd.f32 %v1388_v23, %v1376_v61  ;;  %v1433_v37 = vand.u32 2147483648, %v5133_v59 }
 0x26e   :  { %v4025_v5 = vpop.eup %4024  ;;  %v1452_v24 = vand.u32 2147483648, %v1440_v8  ;;  %vm1451_vm11 = vcmp.eq.f32.partialorder %v1450_v46, 8.507059e+37  ;;  %vm1432_vm12 = vcmp.eq.f32.partialorder %v1431_v0, 8.507059e+37 }
 0x26f   :  { %v5140_v63 = vadd.f32 1.0, %v4025_v5  ;;  %v3787_v6 = vmul.f32 -1.442695, %v1415_v58  ;;  %v1425_v21 = vmul.f32 %v4023_v52, %v1424_v18 }
 0x270   :  { %v4027_v43 = vpop.eup %4026 }
 0x271   :  { %v1538_v38 = vpop.f32.mrf.mxu3  ;;  %v1442_v62 = vmul.f32 %v4027_v43, %v1440_v8  ;;  %4028 = vpow2.f32 %v3787_v6  ;;  %v1426_v10 = vadd.f32 %v4023_v52, %v1425_v21  ;;  %vm1447_vm6 = vweird.f32 %v4027_v43 }
 0x272   :  { %v1403_v11 = vpop.f32.mrf.mxu2  ;;  %4030 = vrcp.f32 %v5140_v63  ;;  %vm1448_vm10 = vmor %vm1446_vm8, %vm1447_vm6  ;;  %v1434_v6 = vor.u32 1.1754944e-38, %v1433_v37  ;;  %vm1572_vm2 = vweird.f32 %v5140_v63 }
 0x273   :  { %v1443_v1 = vsub.f32 1.0, %v1442_v62  ;;  %4032 = vpow2.f32 %v3790_v4  ;;  %v1453_v4 = vor.u32 1.1754944e-38, %v1452_v24  ;;  %v1430_v18 = vsel %vm5149_vm9, %v4023_v52, %v1426_v10  ;;  %v6496_v24 = vld [vmem:[#allocation24_spill] sm:$0xff] }
 0x274   :  { %v1497_v48 = vpop.f32.mrf.mxu0  ;;  %4034 = vtanh.f32 %v1389_v36 }
 0x275   :  { %v1444_v53 = vmul.f32 %v4027_v43, %v1443_v1  ;;  %v1540_v5 = vadd.f32 %v1497_v48, %v134_v35  ;;  %v1435_v1 = vsel %vm1432_vm12, %v1434_v6, %v1430_v18 }
 0x277   :  { %v4029_v11 = vpop.eup %4028  ;;  %v1445_v23 = vadd.f32 %v4027_v43, %v1444_v53  ;;  %v3788_v21 = vmul.f32 -1.442695, %v1540_v5 }
 0x278   :  { %v1460_v58 = vadd.f32 1.0, %v4029_v11  ;;  %v5155_v61 = vpop.eup %4030 }
 0x279   :  { %v1449_v38 = vsel %vm1448_vm10, %v4027_v43, %v1445_v23  ;;  %4036 = vpow2.f32 %v3788_v21  ;;  %v4033_v59 = vpop.eup %4032  ;;  %v1568_v36 = vmul.f32 %v5155_v61, %v5140_v63  ;;  %vm1573_vm15 = vweird.f32 %v5155_v61 }
 0x27a   :  { %v1454_v8 = vsel %vm1451_vm11, %v1453_v4, %v1449_v38  ;;  %4038 = vrcp.f32 %v1460_v58  ;;  %v1523_v35 = vpop.f32.mrf.mxu2  ;;  %v4035_v52 = vpop.eup %4034  ;;  %v5160_v10 = vadd.f32 1.0, %v4033_v59  ;;  %v1472_v18 = vand.u32 2147483648, %v1460_v58  ;;  %vm5176_vm3 = vmor %vm1572_vm2, %vm1573_vm15 }
 0x27b   :  { %v1476_v48 = vmul.f32 %v1454_v8, %v6496_v24  ;;  %v1477_v5 = vmul.f32 %v4035_v52, %v1435_v1  ;;  %v1569_v46 = vsub.f32 1.0, %v1568_v36  ;;  %v1470_v38 = vand.u32 2147483647, %v1460_v58  ;;  %v6497_v36 = vld [vmem:[#allocation75_spill] sm:$0xff] }
 0x27c   :  { %v1499_v53 = vpop.f32.mrf.mxu0  ;;  %4040 = vrcp.f32 %v5160_v10  ;;  %vm1466_vm14 = vweird.f32 %v1460_v58  ;;  %v1542_v24 = vadd.f32 %v1523_v35, %v6497_v36  ;;  %vm1592_vm10 = vweird.f32 %v5160_v10 }
 0x27d   :  { %v5162_v11 = vadd.f32 %v1477_v5, %v1476_v48  ;;  %v1570_v4 = vmul.f32 %v5155_v61, %v1569_v46  ;;  %v1473_v53 = vor.u32 1.1754944e-38, %v1472_v18  ;;  %vm1471_vm1 = vcmp.eq.f32.partialorder %v1470_v38, 8.507059e+37 }
 0x27e   :  { %v1578_v46 = vand.u32 2147483648, %v5140_v63 }
 0x27f   :  { %v4037_v37 = vpop.eup %4036  ;;  %v1571_v48 = vadd.f32 %v5155_v61, %v1570_v4 }
 0x280   :  { %v4039_v43 = vpop.eup %4038  ;;  %v1547_v0 = vadd.f32 1.0, %v4037_v37  ;;  %v1579_v36 = vor.u32 1.1754944e-38, %v1578_v46 }
 0x281   :  { %v1462_v62 = vmul.f32 %v4039_v43, %v1460_v58  ;;  %vm1467_vm13 = vweird.f32 %v4039_v43 }
 0x282   :  { %4042 = vrcp.f32 %v1547_v0  ;;  %v1525_v23 = vpop.f32.mrf.mxu2  ;;  %v5167_v59 = vpop.eup %4040  ;;  %vm1468_vm0 = vmor %vm1466_vm14, %vm1467_vm13  ;;  %v1559_v18 = vand.u32 2147483648, %v1547_v0  ;;  %v1557_v38 = vand.u32 2147483647, %v1547_v0  ;;  %vm1553_vm5 = vweird.f32 %v1547_v0 }
 0x283   :  { %v1463_v21 = vsub.f32 1.0, %v1462_v62  ;;  %4044 = vtanh.f32 %v5162_v11  ;;  %v1588_v58 = vmul.f32 %v5167_v59, %v5160_v10  ;;  %vm1593_vm9 = vweird.f32 %v5167_v59 }
 0x284   :  { %4046 = vtanh.f32 %v1542_v24  ;;  %vm1558_vm8 = vcmp.eq.f32.partialorder %v1557_v38, 8.507059e+37  ;;  %v1596_v23 = vand.u32 2147483647, %v5160_v10  ;;  %vm1594_vm11 = vmor %vm1592_vm10, %vm1593_vm9  ;;  %v6503_v38 = vld [vmem:[#allocation52_spill] sm:$0xff] }
 0x285   :  { %v1464_v6 = vmul.f32 %v4039_v43, %v1463_v21  ;;  %v1576_v21 = vand.u32 2147483647, %v5140_v63  ;;  %v1560_v63 = vor.u32 1.1754944e-38, %v1559_v18 }
 0x286   :  { %vm1597_vm12 = vcmp.eq.f32.partialorder %v1596_v23, 8.507059e+37  ;;  %v6518_v23 = vld [vmem:[#allocation66_spill] sm:$0xff] }
 0x287   :  { %v1465_v8 = vadd.f32 %v4039_v43, %v1464_v6  ;;  %vm1577_vm6 = vcmp.eq.f32.partialorder %v1576_v21, 8.507059e+37 }
 0x288   :  { %v4043_v1 = vpop.eup %4042 }
 0x289   :  { %v1549_v52 = vmul.f32 %v4043_v1, %v1547_v0  ;;  %v1469_v5 = vsel %vm1468_vm0, %v4039_v43, %v1465_v8  ;;  %v4045_v37 = vpop.eup %4044  ;;  %v1575_v43 = vsel %vm5176_vm3, %v5155_v61, %v1571_v48  ;;  %vm1554_vm4 = vweird.f32 %v4043_v1 }
 0x28a   :  { %v1474_v62 = vsel %vm1471_vm1, %v1473_v53, %v1469_v5  ;;  %v1589_v53 = vsub.f32 1.0, %v1588_v58  ;;  %vm1555_vm7 = vmor %vm1553_vm5, %vm1554_vm4  ;;  %v4047_v24 = vpop.eup %4046 }
 0x28b   :  { %v1550_v35 = vsub.f32 1.0, %v1549_v52  ;;  %v1480_v4 = vmul.f32 %v4045_v37, %v1474_v62  ;;  %v1580_v52 = vsel %vm1577_vm6, %v1579_v36, %v1575_v43  ;;  %v6505_v36 = vld [vmem:[#allocation34_spill] sm:$0xff] }
 0x28c   :  { %v1590_v48 = vmul.f32 %v5167_v59, %v1589_v53  ;;  %v1602_v46 = vmul.f32 %v1580_v52, %v5028_v40  ;;  %v6506_v53 = vld [vmem:[#allocation37_spill] sm:$0xff]  ;;  %v6509_v52 = vld [vmem:[#allocation56_spill] sm:$0xff] }
 0x28d   :  { %v1551_v6 = vmul.f32 %v4043_v1, %v1550_v35  ;;  %v1608_v8 = vpack.c.bf16 %v1480_v4, %v1480_v4 }
 0x28e   :  { %v1591_v62 = vadd.f32 %v5167_v59, %v1590_v48  ;;  %v6512_v48 = vld [vmem:[#allocation80_spill] sm:$0xff] }
 0x28f   :  { %v1552_v5 = vadd.f32 %v4043_v1, %v1551_v6  ;;  %1630 = vmatmul.bf16.vlgmr.msrb.gmra.mxu1 %v1608_v8  ;;  %1656 = vmatmul.bf16.vlgmr.msrb.gmra.mxu3 %v1608_v8  ;;  %v6502_v6 = vld [vmem:[#allocation35_spill] sm:$0xff] }
 0x290   :  { %1796 = vmatpush.bf16.msrb.mxu1 %v6427_v29  ;;  %1822 = vmatpush.bf16.msrb.mxu3 %v6428_v51  ;;  %v1595_v40 = vsel %vm1594_vm11, %v5167_v59, %v1591_v62  ;;  %v6501_v59 = vld [vmem:[#allocation31_spill] sm:$0xff]  ;;  %v6516_v62 = vld [vmem:[#allocation84_spill] sm:$0xff] }
 0x291   :  { %v1556_v61 = vsel %vm1555_vm7, %v4043_v1, %v1552_v5  ;;  %v1598_v1 = vand.u32 2147483648, %v5160_v10  ;;  %v6500_v10 = vld [vmem:[#allocation51_spill] sm:$0xff]  ;;  %v6507_v5 = vld [vmem:[#allocation69_spill] sm:$0xff] }
 0x292   :  { %v1561_v37 = vsel %vm1558_vm8, %v1560_v63, %v1556_v61  ;;  %v6508_v63 = vld [vmem:[#allocation70_spill] sm:$0xff]  ;;  %v6510_v61 = vld [vmem:[#allocation57_spill] sm:$0xff] }
 0x293   :  { %v1603_v58 = vmul.f32 %v4047_v24, %v1561_v37  ;;  %v1599_v35 = vor.u32 1.1754944e-38, %v1598_v1  ;;  %v6511_v24 = vld [vmem:[#allocation79_spill] sm:$0xff]  ;;  %v6513_v37 = vld [vmem:[#allocation58_spill] sm:$0xff] }
 0x294   :  { %1797 = vmatpush.bf16.msrb.mxu1 %v6429_v15  ;;  %1823 = vmatpush.bf16.msrb.mxu3 %v6430_v49  ;;  %v6517_v1 = vld [vmem:[#allocation63_spill] sm:$0xff] }
 0x295   :  { %v5190_v0 = vadd.f32 %v1603_v58, %v1602_v46  ;;  %v1600_v4 = vsel %vm1597_vm12, %v1599_v35, %v1595_v40  ;;  %v6514_v46 = vld [vmem:[#allocation59_spill] sm:$0xff]  ;;  %v6520_v35 = vld [vmem:[#allocation68_spill] sm:$0xff] }
 0x296   :  { %v6515_v58 = vld [vmem:[#allocation83_spill] sm:$0xff] }
 0x297   :  { %4048 = vtanh.f32 %v5190_v0  ;;  %v6519_v40 = vld [vmem:[#allocation67_spill] sm:$0xff] }
 0x298   :  { %1798 = vmatpush.bf16.msrb.mxu1 %v6431_v7  ;;  %1824 = vmatpush.bf16.msrb.mxu3 %v6432_v55 }
 0x29c   :  { %1799 = vmatpush.bf16.msrb.mxu1 %v6433_v33  ;;  %1825 = vmatpush.bf16.msrb.mxu3 %v6434_v28 }
 0x29d   :  { %v4049_v21 = vpop.eup %4048 }
 0x29e   :  { %v1606_v18 = vmul.f32 %v4049_v21, %v1600_v4  ;;  %v6521_v21 = vld [vmem:[#allocation89_spill] sm:$0xff]  ;;  %v6522_v4 = vld [vmem:[#allocation91_spill] sm:$0xff] }
 0x29f   :  { %1682 = vmatmul.bf16.vlgmr.msra.gmra.mxu1 %v1608_v8  ;;  %1708 = vmatmul.bf16.vlgmr.msra.gmra.mxu3 %v1608_v8  ;;  %v6504_v8 = vld [vmem:[#allocation53_spill] sm:$0xff] }
 0x2a0   :  { %v1607_v43 = vpack.c.bf16 %v1606_v18, %v1606_v18  ;;  %1800 = vmatpush.bf16.msrb.mxu1 %v6435_v30  ;;  %1826 = vmatpush.bf16.msrb.mxu3 %v6436_v44  ;;  %v6523_v18 = vld [vmem:[#allocation71_spill] sm:$0xff] }
 0x2a2   :  { %1617 = vmatmul.bf16.vlgmr.msra.gmra.mxu0 %v1607_v43  ;;  %1643 = vmatmul.bf16.vlgmr.msrb.gmra.mxu2 %v1607_v43 }
 0x2a3   :  { %1783 = vmatpush.bf16.msra.mxu0 %v4400_v13  ;;  %1809 = vmatpush.bf16.msrb.mxu2 %v4417_v32 }
 0x2a4   :  { %1801 = vmatpush.bf16.msrb.mxu1 %v6437_v3  ;;  %1827 = vmatpush.bf16.msrb.mxu3 %v6438_v50 }
 0x2a7   :  { %1784 = vmatpush.bf16.msra.mxu0 %v4412_v26  ;;  %1810 = vmatpush.bf16.msrb.mxu2 %v4433_v45 }
 0x2a8   :  { %1802 = vmatpush.bf16.msrb.mxu1 %v6439_v34  ;;  %1828 = vmatpush.bf16.msrb.mxu3 %v4494_v42 }
 0x2ab   :  { %1785 = vmatpush.bf16.msra.mxu0 %v6380_v31  ;;  %1811 = vmatpush.bf16.msrb.mxu2 %v6381_v56 }
 0x2ac   :  { %1803 = vmatpush.bf16.msrb.mxu1 %v6440_v16  ;;  %1829 = vmatpush.bf16.msrb.mxu3 %v6441_v39 }
 0x2af   :  { %1786 = vmatpush.bf16.msra.mxu0 %v6384_v54  ;;  %1804 = vmatmul.bf16.vlgmr.msrb.gmra.mxu1 %v1607_v43 }
 0x2b0   :  { %1917 = vmatpush.bf16.msra.mxu1 %v6442_v60  ;;  %1943 = vmatpush.bf16.msra.mxu3 %v6443_v12 }
 0x2b1   :  { %1812 = vmatpush.bf16.msrb.mxu2 %v6385_v22  ;;  %1830 = vmatmul.bf16.vlgmr.msrb.gmra.mxu3 %v1607_v43 }
 0x2b2   :  { %1669 = vmatmul.bf16.vlgmr.msrb.gmra.mxu0 %v1607_v43  ;;  %1695 = vmatmul.bf16.vlgmr.msra.gmra.mxu2 %v1607_v43 }
 0x2b3   :  { %1787 = vmatpush.bf16.msra.mxu0 %v6388_v25 }
 0x2b4   :  { %1918 = vmatpush.bf16.msra.mxu1 %v6444_v27  ;;  %1944 = vmatpush.bf16.msra.mxu3 %v6445_v19 }
 0x2b5   :  { %1813 = vmatpush.bf16.msrb.mxu2 %v6389_v47 }
 0x2b7   :  { %1788 = vmatpush.bf16.msra.mxu0 %v6392_v14 }
 0x2b8   :  { %1919 = vmatpush.bf16.msra.mxu1 %v6446_v9  ;;  %1945 = vmatpush.bf16.msra.mxu3 %v6447_v41 }
 0x2b9   :  { %1814 = vmatpush.bf16.msrb.mxu2 %v6393_v20 }
 0x2bb   :  { %1789 = vmatpush.bf16.msra.mxu0 %v6501_v59 }
 0x2bc   :  { %1920 = vmatpush.bf16.msra.mxu1 %v4583_v57  ;;  %1946 = vmatpush.bf16.msra.mxu3 %v6500_v10 }
 0x2bd   :  { %1815 = vmatpush.bf16.msrb.mxu2 %v6502_v6 }
 0x2bf   :  { %1790 = vmatpush.bf16.msra.mxu0 %v6505_v36  ;;  %v6564_v36 = vld [vmem:[#allocation78_spill] sm:$0xff] }
 0x2c0   :  { %1921 = vmatpush.bf16.msra.mxu1 %v6503_v38  ;;  %1947 = vmatpush.bf16.msra.mxu3 %v6504_v8 }
 0x2c1   :  { %1816 = vmatpush.bf16.msrb.mxu2 %v6506_v53  ;;  %v6563_v53 = vld [vmem:[#allocation60_spill] sm:$0xff] }
 0x2c2   :  { %1791 = vmatmul.bf16.vlgmr.msra.gmra.mxu0 %v1607_v43 }
 0x2c3   :  { %1904 = vmatpush.bf16.msrb.mxu0 %v6507_v5 }
 0x2c4   :  { %1922 = vmatpush.bf16.msra.mxu1 %v6509_v52  ;;  %1948 = vmatpush.bf16.msra.mxu3 %v6510_v61 }
 0x2c5   :  { %1930 = vmatpush.bf16.msra.mxu2 %v6508_v63 }
 0x2c6   :  { %1817 = vmatmul.bf16.vlgmr.msrb.gmra.mxu2 %v1607_v43  ;;  %v6524_v43 = vld [vmem:[#allocation74_spill] sm:$0xff] }
 0x2c7   :  { %1905 = vmatpush.bf16.msrb.mxu0 %v6511_v24 }
 0x2c8   :  { %1923 = vmatpush.bf16.msra.mxu1 %v6513_v37  ;;  %1949 = vmatpush.bf16.msra.mxu3 %v6514_v46 }
 0x2c9   :  { %1931 = vmatpush.bf16.msra.mxu2 %v6512_v48  ;;  %v6561_v48 = vld [vmem:[#allocation17_spill] sm:$0xff] }
 0x2cb   :  { %1906 = vmatpush.bf16.msrb.mxu0 %v6515_v58  ;;  %v6526_v58 = vld [vmem:[#allocation95_spill] sm:$0xff] }
 0x2cc   :  { %1924 = vmatpush.bf16.msra.mxu1 %v6517_v1  ;;  %1950 = vmatpush.bf16.msra.mxu3 %v6518_v23  ;;  %v6528_v1 = vld [vmem:[#allocation82_spill] sm:$0xff]  ;;  %v6529_v23 = vld [vmem:[#allocation101_spill] sm:$0xff] }
 0x2cd   :  { %1932 = vmatpush.bf16.msra.mxu2 %v6516_v62  ;;  %v6527_v62 = vld [vmem:[#allocation81_spill] sm:$0xff] }
 0x2cf   :  { %1907 = vmatpush.bf16.msrb.mxu0 %v6521_v21  ;;  %v6532_v21 = vld [vmem:[#allocation86_spill] sm:$0xff] }
 0x2d0   :  { %1969 = vmatpush.bf16.msrb.mxu1 %v6519_v40  ;;  %1995 = vmatpush.bf16.msrb.mxu3 %v6520_v35  ;;  %v6530_v40 = vld [vmem:[#allocation102_spill] sm:$0xff]  ;;  %v6531_v35 = vld [vmem:[#allocation85_spill] sm:$0xff] }
 0x2d1   :  { %1933 = vmatpush.bf16.msra.mxu2 %v6522_v4  ;;  %v6533_v4 = vld [vmem:[#allocation105_spill] sm:$0xff] }
 0x2d3   :  { %1908 = vmatpush.bf16.msrb.mxu0 %v6525_v17  ;;  %v6536_v17 = vld [vmem:[#allocation93_spill] sm:$0xff] }
 0x2d4   :  { %1970 = vmatpush.bf16.msrb.mxu1 %v6523_v18  ;;  %1996 = vmatpush.bf16.msrb.mxu3 %v6524_v43  ;;  %v6534_v18 = vld [vmem:[#allocation108_spill] sm:$0xff] }
 0x2d5   :  { %1934 = vmatpush.bf16.msra.mxu2 %v6526_v58  ;;  %v6535_v43 = vld [vmem:[#allocation92_spill] sm:$0xff] }
 0x2d6   :  { %v6537_v58 = vld [vmem:[#allocation112_spill] sm:$0xff] }
 0x2d7   :  { %1909 = vmatpush.bf16.msrb.mxu0 %v6529_v23  ;;  %v6540_v23 = vld [vmem:[#allocation115_spill] sm:$0xff] }
 0x2d8   :  { %1971 = vmatpush.bf16.msrb.mxu1 %v6527_v62  ;;  %1997 = vmatpush.bf16.msrb.mxu3 %v6528_v1  ;;  %v6538_v62 = vld [vmem:[#allocation113_spill] sm:$0xff]  ;;  %v6539_v1 = vld [vmem:[#allocation114_spill] sm:$0xff] }
 0x2d9   :  { %1935 = vmatpush.bf16.msra.mxu2 %v6530_v40  ;;  %v6541_v40 = vld [vmem:[#allocation96_spill] sm:$0xff] }
 0x2db   :  { %1910 = vmatpush.bf16.msrb.mxu0 %v6533_v4  ;;  %v6544_v4 = vld [vmem:[#allocation117_spill] sm:$0xff] }
 0x2dc   :  { %1972 = vmatpush.bf16.msrb.mxu1 %v6531_v35  ;;  %1998 = vmatpush.bf16.msrb.mxu3 %v6532_v21  ;;  %v6542_v35 = vld [vmem:[#allocation97_spill] sm:$0xff]  ;;  %v6543_v21 = vld [vmem:[#allocation116_spill] sm:$0xff] }
 0x2dd   :  { %1936 = vmatpush.bf16.msra.mxu2 %v6534_v18  ;;  %v6545_v18 = vld [vmem:[#allocation103_spill] sm:$0xff] }
 0x2df   :  { %1911 = vmatpush.bf16.msrb.mxu0 %v6537_v58  ;;  %v6548_v58 = vld [vmem:[#allocation122_spill] sm:$0xff] }
 0x2e0   :  { %1973 = vmatpush.bf16.msrb.mxu1 %v6535_v43  ;;  %1999 = vmatpush.bf16.msrb.mxu3 %v6536_v17  ;;  %v6546_v43 = vld [vmem:[#allocation104_spill] sm:$0xff]  ;;  %v6547_v17 = vld [vmem:[#allocation121_spill] sm:$0xff] }
 0x2e1   :  { %1937 = vmatpush.bf16.msra.mxu2 %v6538_v62  ;;  %v6549_v62 = vld [vmem:[#allocation109_spill] sm:$0xff] }
 0x2e3   :  { %1956 = vmatpush.bf16.msra.mxu0 %v6539_v1  ;;  %v6550_v1 = vld [vmem:[#allocation111_spill] sm:$0xff] }
 0x2e4   :  { %1974 = vmatpush.bf16.msrb.mxu1 %v6541_v40  ;;  %2000 = vmatpush.bf16.msrb.mxu3 %v6542_v35  ;;  %v6552_v40 = vld [vmem:[#allocation126_spill] sm:$0xff]  ;;  %v6553_v35 = vld [vmem:[#allocation127_spill] sm:$0xff] }
 0x2e5   :  { %1982 = vmatpush.bf16.msrb.mxu2 %v6540_v23  ;;  %v6551_v23 = vld [vmem:[#allocation123_spill] sm:$0xff] }
 0x2e7   :  { %1957 = vmatpush.bf16.msra.mxu0 %v6543_v21  ;;  %v6554_v21 = vld [vmem:[#allocation128_spill] sm:$0xff] }
 0x2e8   :  { %1975 = vmatpush.bf16.msrb.mxu1 %v6545_v18  ;;  %2001 = vmatpush.bf16.msrb.mxu3 %v6546_v43  ;;  %v6556_v18 = vld [vmem:[#allocation130_spill] sm:$0xff]  ;;  %v6557_v43 = vld [vmem:[#allocation131_spill] sm:$0xff] }
 0x2e9   :  { %1983 = vmatpush.bf16.msrb.mxu2 %v6544_v4  ;;  %v6555_v4 = vld [vmem:[#allocation129_spill] sm:$0xff] }
 0x2eb   :  { %1958 = vmatpush.bf16.msra.mxu0 %v6547_v17  ;;  %v6558_v17 = vld [vmem:[#allocation132_spill] sm:$0xff] }
 0x2ec   :  { %1976 = vmatpush.bf16.msrb.mxu1 %v6549_v62  ;;  %2002 = vmatpush.bf16.msrb.mxu3 %v6550_v1  ;;  %v6560_v62 = vld [vmem:[#allocation134_spill] sm:$0xff] }
 0x2ed   :  { %1984 = vmatpush.bf16.msrb.mxu2 %v6548_v58  ;;  %v6559_v58 = vld [vmem:[#allocation133_spill] sm:$0xff] }
 0x2ef   :  { %1959 = vmatpush.bf16.msra.mxu0 %v6551_v23 }
 0x2f1   :  { %1985 = vmatpush.bf16.msrb.mxu2 %v6552_v40 }
 0x2f3   :  { %1960 = vmatpush.bf16.msra.mxu0 %v6553_v35 }
 0x2f5   :  { %1986 = vmatpush.bf16.msrb.mxu2 %v6554_v21 }
 0x2f7   :  { %1961 = vmatpush.bf16.msra.mxu0 %v6555_v4 }
 0x2f9   :  { %1987 = vmatpush.bf16.msrb.mxu2 %v6556_v18 }
 0x2fb   :  { %1962 = vmatpush.bf16.msra.mxu0 %v6557_v43  ;;  %v6562_v43 = vld [vmem:[#allocation22_spill] sm:$0xff] }
 0x2fd   :  { %1988 = vmatpush.bf16.msrb.mxu2 %v6558_v17 }
 0x2ff   :  { %1963 = vmatpush.bf16.msra.mxu0 %v6559_v58 }
 0x301   :  { %1989 = vmatpush.bf16.msrb.mxu2 %v6560_v62 }
 0x30c   :  { %v1631_v1 = vpop.f32.mrf.mxu1 }
 0x312   :  { %v1657_v23 = vpop.f32.mrf.mxu3 }
 0x314   :  { %v1633_v46 = vpop.f32.mrf.mxu1 }
 0x315   :  { %v178_v46 = vadd.f32 %v6564_v36, %v6563_v53 }
 0x31a   :  { %v1659_v40 = vpop.f32.mrf.mxu3 }
 0x31c   :  { %v1683_v37 = vpop.f32.mrf.mxu1 }
 0x31f   :  { %v1618_v35 = vpop.f32.mrf.mxu0 }
 0x320   :  { %v1619_v21 = vadd.f32 %v1618_v35, %v6561_v48 }
 0x322   :  { %v1632_v24 = vadd.f32 %v1631_v1, %v1619_v21  ;;  %v1709_v4 = vpop.f32.mrf.mxu3 }
 0x324   :  { %v3791_v61 = vmul.f32 -1.442695, %v1632_v24  ;;  %v1685_v18 = vpop.f32.mrf.mxu1 }
 0x325   :  { %v1644_v52 = vpop.f32.mrf.mxu2 }
 0x326   :  { %4050 = vpow2.f32 %v3791_v61  ;;  %v1645_v17 = vadd.f32 %v1644_v52, %v6562_v43  ;;  %v6565_v52 = vld [vmem:[#allocation73_spill] sm:$0xff] }
 0x327   :  { %v1620_v63 = vpop.f32.mrf.mxu0 }
 0x328   :  { %v1658_v58 = vadd.f32 %v1657_v23, %v1645_v17 }
 0x32a   :  { %v3792_v5 = vmul.f32 -1.442695, %v1658_v58  ;;  %v1711_v62 = vpop.f32.mrf.mxu3  ;;  %v6566_v58 = vld [vmem:[#allocation88_spill] sm:$0xff] }
 0x32b   :  { %v260_v62 = vadd.f32 %v6566_v58, %v6565_v52 }
 0x32c   :  { %v4051_v40 = vpop.eup %4050  ;;  %4052 = vpow2.f32 %v3792_v5  ;;  %v1805_v8 = vpop.f32.mrf.mxu1 }
 0x32d   :  { %v5295_v38 = vadd.f32 1.0, %v4051_v40  ;;  %v1836_v1 = vadd.f32 %v1805_v8, %v178_v46  ;;  %v1646_v35 = vpop.f32.mrf.mxu2  ;;  %v6567_v8 = vld [vmem:[#allocation20_spill] sm:$0xff] }
 0x32f   :  { %4054 = vrcp.f32 %v5295_v38  ;;  %v3795_v24 = vmul.f32 -1.442695, %v1836_v1  ;;  %v1670_v61 = vpop.f32.mrf.mxu0  ;;  %vm1722_vm15 = vweird.f32 %v5295_v38 }
 0x331   :  { %4056 = vpow2.f32 %v3795_v24  ;;  %v1671_v24 = vadd.f32 %v1670_v61, %v6491_v2 }
 0x332   :  { %v4053_v21 = vpop.eup %4052 }
 0x333   :  { %v1735_v63 = vadd.f32 1.0, %v4053_v21 }
 0x334   :  { %v1831_v17 = vpop.f32.mrf.mxu3  ;;  %v1807_v23 = vpop.f32.mrf.mxu1 }
 0x335   :  { %v4055_v36 = vpop.eup %4054  ;;  %4058 = vrcp.f32 %v1735_v63  ;;  %v1696_v5 = vpop.f32.mrf.mxu2  ;;  %v1838_v40 = vadd.f32 %v1831_v17, %v260_v62  ;;  %v1684_v17 = vadd.f32 %v1683_v37, %v1671_v24  ;;  %v1747_v62 = vand.u32 2147483648, %v1735_v63 }
 0x336   :  { %v1718_v18 = vmul.f32 %v4055_v36, %v5295_v38  ;;  %v1697_v46 = vadd.f32 %v1696_v5, %v6567_v8  ;;  %vm1723_vm13 = vweird.f32 %v4055_v36  ;;  %vm1741_vm0 = vweird.f32 %v1735_v63 }
 0x337   :  { %v1672_v35 = vpop.f32.mrf.mxu0  ;;  %v4057_v53 = vpop.eup %4056  ;;  %v3796_v21 = vmul.f32 -1.442695, %v1838_v40  ;;  %vm5309_vm1 = vmor %vm1722_vm15, %vm1723_vm13  ;;  %v1726_v37 = vand.u32 2147483647, %v5295_v38 }
 0x338   :  { %v1719_v1 = vsub.f32 1.0, %v1718_v18  ;;  %v1710_v43 = vadd.f32 %v1709_v4, %v1697_v46  ;;  %v5303_v6 = vadd.f32 1.0, %v4057_v53  ;;  %v1745_v4 = vand.u32 2147483647, %v1735_v63  ;;  %v6568_v53 = vld [vmem:[#allocation64_spill] sm:$0xff] }
 0x339   :  { %vm1727_vm4 = vcmp.eq.f32.partialorder %v1726_v37, 8.507059e+37 }
 0x33a   :  { %v3793_v58 = vmul.f32 -1.442695, %v1710_v43  ;;  %v1720_v59 = vmul.f32 %v4055_v36, %v1719_v1  ;;  %v1728_v43 = vand.u32 2147483648, %v5295_v38  ;;  %vm1746_vm3 = vcmp.eq.f32.partialorder %v1745_v4, 8.507059e+37 }
 0x33b   :  { %v4059_v48 = vpop.eup %4058  ;;  %vm1867_vm10 = vweird.f32 %v5303_v6 }
 0x33c   :  { %v1833_v23 = vpop.f32.mrf.mxu3  ;;  %v1737_v52 = vmul.f32 %v4059_v48, %v1735_v63  ;;  %4060 = vpow2.f32 %v3793_v58  ;;  %vm1742_vm14 = vweird.f32 %v4059_v48  ;;  %v1721_v18 = vadd.f32 %v4055_v36, %v1720_v59 }
 0x33d   :  { %v1698_v10 = vpop.f32.mrf.mxu2  ;;  %4062 = vpow2.f32 %v3796_v21  ;;  %vm1743_vm2 = vmor %vm1741_vm0, %vm1742_vm14  ;;  %v1729_v58 = vor.u32 1.1754944e-38, %v1728_v43 }
 0x33e   :  { %v1738_v57 = vsub.f32 1.0, %v1737_v52  ;;  %4064 = vrcp.f32 %v5303_v6  ;;  %v1725_v1 = vsel %vm5309_vm1, %v4055_v36, %v1721_v18 }
 0x33f   :  { %v1792_v5 = vpop.f32.mrf.mxu0  ;;  %4066 = vtanh.f32 %v1684_v17 }
 0x340   :  { %v1739_v61 = vmul.f32 %v4059_v48, %v1738_v57  ;;  %v1835_v40 = vadd.f32 %v1792_v5, %v6568_v53  ;;  %v1748_v57 = vor.u32 1.1754944e-38, %v1747_v62  ;;  %v1730_v5 = vsel %vm1727_vm4, %v1729_v58, %v1725_v1  ;;  %v6571_v1 = vld [vmem:[#allocation72_spill] sm:$0xff] }
 0x342   :  { %v1740_v52 = vadd.f32 %v4059_v48, %v1739_v61  ;;  %v3794_v46 = vmul.f32 -1.442695, %v1835_v40  ;;  %v4061_v35 = vpop.eup %4060 }
 0x343   :  { %v4063_v59 = vpop.eup %4062  ;;  %v1755_v21 = vadd.f32 1.0, %v4061_v35 }
 0x344   :  { %v1744_v24 = vsel %vm1743_vm2, %v4059_v48, %v1740_v52  ;;  %v5316_v63 = vpop.eup %4064  ;;  %4068 = vpow2.f32 %v3794_v46  ;;  %v5321_v36 = vadd.f32 1.0, %v4063_v59 }
 0x345   :  { %v1749_v23 = vsel %vm1746_vm3, %v1748_v57, %v1744_v24  ;;  %4070 = vrcp.f32 %v1755_v21  ;;  %v1863_v17 = vmul.f32 %v5316_v63, %v5303_v6  ;;  %v4067_v53 = vpop.eup %4066  ;;  %v1765_v59 = vand.u32 2147483647, %v1755_v21  ;;  %v6572_v24 = vld [vmem:[#allocation87_spill] sm:$0xff] }
 0x346   :  { %v1771_v62 = vmul.f32 %v1749_v23, %v5162_v11  ;;  %v1772_v48 = vmul.f32 %v4067_v53, %v1730_v5  ;;  %4072 = vrcp.f32 %v5321_v36  ;;  %v1767_v11 = vand.u32 2147483648, %v1755_v21 }
 0x347   :  { %v1794_v61 = vpop.f32.mrf.mxu0  ;;  %v1864_v40 = vsub.f32 1.0, %v1863_v17  ;;  %v219_v58 = vadd.f32 %v6572_v24, %v6571_v1  ;;  %vm1761_vm6 = vweird.f32 %v1755_v21  ;;  %vm1868_vm7 = vweird.f32 %v5316_v63  ;;  %v6600_v1 = vld [vmem:[#allocation74_spill] sm:$0xff] }
 0x348   :  { %v5323_v43 = vadd.f32 %v1772_v48, %v1771_v62  ;;  %v1768_v53 = vor.u32 1.1754944e-38, %v1767_v11  ;;  %vm1766_vm9 = vcmp.eq.f32.partialorder %v1765_v59, 8.507059e+37  ;;  %vm5338_vm11 = vmor %vm1867_vm10, %vm1868_vm7  ;;  %vm1887_vm2 = vweird.f32 %v5321_v36 }
 0x349   :  { %v1818_v38 = vpop.f32.mrf.mxu2  ;;  %v1865_v35 = vmul.f32 %v5316_v63, %v1864_v40 }
 0x34a   :  { %v4069_v4 = vpop.eup %4068  ;;  %v1837_v17 = vadd.f32 %v1818_v38, %v219_v58 }
 0x34b   :  { %v4071_v18 = vpop.eup %4070  ;;  %v1842_v10 = vadd.f32 1.0, %v4069_v4  ;;  %v1866_v62 = vadd.f32 %v5316_v63, %v1865_v35  ;;  %v1871_v35 = vand.u32 2147483647, %v5303_v6 }
 0x34c   :  { %v1757_v37 = vmul.f32 %v4071_v18, %v1755_v21  ;;  %vm1762_vm5 = vweird.f32 %v4071_v18  ;;  %v5330_v23 = vpop.eup %4072 }
 0x34d   :  { %4074 = vrcp.f32 %v1842_v10  ;;  %vm1763_vm8 = vmor %vm1761_vm6, %vm1762_vm5  ;;  %v1883_v21 = vmul.f32 %v5330_v23, %v5321_v36  ;;  %v1852_v24 = vand.u32 2147483647, %v1842_v10  ;;  %vm1848_vm13 = vweird.f32 %v1842_v10 }
 0x34e   :  { %v1758_v46 = vsub.f32 1.0, %v1757_v37  ;;  %4076 = vtanh.f32 %v5323_v43  ;;  %v1873_v37 = vand.u32 2147483648, %v5303_v6  ;;  %vm1872_vm14 = vcmp.eq.f32.partialorder %v1871_v35, 8.507059e+37 }
 0x34f   :  { %4078 = vtanh.f32 %v1837_v17  ;;  %vm1853_vm0 = vcmp.eq.f32.partialorder %v1852_v24, 8.507059e+37  ;;  %vm1888_vm1 = vweird.f32 %v5330_v23  ;;  %v6578_v24 = vld [vmem:[#allocation35_spill] sm:$0xff] }
 0x350   :  { %v1759_v57 = vmul.f32 %v4071_v18, %v1758_v46  ;;  %v1891_v46 = vand.u32 2147483647, %v5321_v36  ;;  %vm1889_vm3 = vmor %vm1887_vm2, %vm1888_vm1 }
 0x351   :  { %v1820_v52 = vpop.f32.mrf.mxu2 }
 0x352   :  { %v1760_v5 = vadd.f32 %v4071_v18, %v1759_v57  ;;  %v1854_v57 = vand.u32 2147483648, %v1842_v10  ;;  %vm1892_vm4 = vcmp.eq.f32.partialorder %v1891_v46, 8.507059e+37  ;;  %v6593_v46 = vld [vmem:[#allocation63_spill] sm:$0xff] }
 0x353   :  { %v4075_v61 = vpop.eup %4074 }
 0x354   :  { %v1844_v48 = vmul.f32 %v4075_v61, %v1842_v10  ;;  %v1764_v4 = vsel %vm1763_vm8, %v4071_v18, %v1760_v5  ;;  %v4077_v40 = vpop.eup %4076  ;;  %v1870_v18 = vsel %vm5338_vm11, %v5316_v63, %v1866_v62  ;;  %vm1849_vm12 = vweird.f32 %v4075_v61 }
 0x355   :  { %v1769_v52 = vsel %vm1766_vm9, %v1768_v53, %v1764_v4  ;;  %v1874_v5 = vor.u32 1.1754944e-38, %v1873_v37  ;;  %v1884_v53 = vsub.f32 1.0, %v1883_v21  ;;  %vm1850_vm15 = vmor %vm1848_vm13, %vm1849_vm12  ;;  %v1855_v6 = vor.u32 1.1754944e-38, %v1854_v57  ;;  %v4079_v17 = vpop.eup %4078 }
 0x356   :  { %v1845_v38 = vsub.f32 1.0, %v1844_v48  ;;  %v1775_v11 = vmul.f32 %v4077_v40, %v1769_v52 }
 0x357   :  { %v1875_v48 = vsel %vm1872_vm14, %v1874_v5, %v1870_v18  ;;  %v1885_v62 = vmul.f32 %v5330_v23, %v1884_v53  ;;  %v6580_v5 = vld [vmem:[#allocation53_spill] sm:$0xff]  ;;  %v6581_v53 = vld [vmem:[#allocation34_spill] sm:$0xff] }
 0x358   :  { %v1846_v59 = vmul.f32 %v4075_v61, %v1845_v38  ;;  %v1903_v58 = vpack.c.bf16 %v1775_v11, %v1775_v11  ;;  %v1897_v37 = vmul.f32 %v1875_v48, %v5190_v0  ;;  %v6584_v48 = vld [vmem:[#allocation70_spill] sm:$0xff] }
 0x359   :  { %v1886_v52 = vadd.f32 %v5330_v23, %v1885_v62  ;;  %v6587_v62 = vld [vmem:[#allocation79_spill] sm:$0xff] }
 0x35a   :  { %v1847_v4 = vadd.f32 %v4075_v61, %v1846_v59  ;;  %1925 = vmatmul.bf16.vlgmr.msra.gmra.mxu1 %v1903_v58  ;;  %1951 = vmatmul.bf16.vlgmr.msra.gmra.mxu3 %v1903_v58  ;;  %v6577_v59 = vld [vmem:[#allocation31_spill] sm:$0xff] }
 0x35b   :  { %2091 = vmatpush.bf16.msra.mxu1 %v6427_v29  ;;  %2117 = vmatpush.bf16.msra.mxu3 %v6428_v51  ;;  %v1890_v0 = vsel %vm1889_vm3, %v5330_v23, %v1886_v52  ;;  %v6576_v23 = vld [vmem:[#allocation51_spill] sm:$0xff] }
 0x35c   :  { %v1851_v63 = vsel %vm1850_vm15, %v4075_v61, %v1847_v4  ;;  %v1893_v61 = vand.u32 2147483648, %v5321_v36  ;;  %v6575_v36 = vld [vmem:[#allocation49_spill] sm:$0xff]  ;;  %v6591_v52 = vld [vmem:[#allocation83_spill] sm:$0xff] }
 0x35d   :  { %v1856_v40 = vsel %vm1853_vm0, %v1855_v6, %v1851_v63  ;;  %v6582_v4 = vld [vmem:[#allocation37_spill] sm:$0xff]  ;;  %v6585_v63 = vld [vmem:[#allocation56_spill] sm:$0xff] }
 0x35e   :  { %v1898_v21 = vmul.f32 %v4079_v17, %v1856_v40  ;;  %v1894_v38 = vor.u32 1.1754944e-38, %v1893_v61  ;;  %v6583_v6 = vld [vmem:[#allocation69_spill] sm:$0xff]  ;;  %v6588_v40 = vld [vmem:[#allocation80_spill] sm:$0xff] }
 0x35f   :  { %2092 = vmatpush.bf16.msra.mxu1 %v6429_v15  ;;  %2118 = vmatpush.bf16.msra.mxu3 %v6430_v49  ;;  %v6586_v17 = vld [vmem:[#allocation57_spill] sm:$0xff]  ;;  %v6592_v61 = vld [vmem:[#allocation84_spill] sm:$0xff] }
 0x360   :  { %v5352_v10 = vadd.f32 %v1898_v21, %v1897_v37  ;;  %v1895_v11 = vsel %vm1892_vm4, %v1894_v38, %v1890_v0  ;;  %v6589_v37 = vld [vmem:[#allocation58_spill] sm:$0xff]  ;;  %v6590_v21 = vld [vmem:[#allocation59_spill] sm:$0xff] }
 0x361   :  { %v6594_v0 = vld [vmem:[#allocation66_spill] sm:$0xff]  ;;  %v6595_v38 = vld [vmem:[#allocation67_spill] sm:$0xff] }
 0x362   :  { %4080 = vtanh.f32 %v5352_v10 }
 0x363   :  { %2093 = vmatpush.bf16.msra.mxu1 %v6431_v7  ;;  %2119 = vmatpush.bf16.msra.mxu3 %v6432_v55 }
 0x367   :  { %2094 = vmatpush.bf16.msra.mxu1 %v6433_v33  ;;  %2120 = vmatpush.bf16.msra.mxu3 %v6434_v28 }
 0x368   :  { %v4081_v35 = vpop.eup %4080 }
 0x369   :  { %v1901_v57 = vmul.f32 %v4081_v35, %v1895_v11  ;;  %v6596_v35 = vld [vmem:[#allocation68_spill] sm:$0xff]  ;;  %v6597_v11 = vld [vmem:[#allocation89_spill] sm:$0xff] }
 0x36a   :  { %1977 = vmatmul.bf16.vlgmr.msrb.gmra.mxu1 %v1903_v58  ;;  %2003 = vmatmul.bf16.vlgmr.msrb.gmra.mxu3 %v1903_v58  ;;  %v6579_v58 = vld [vmem:[#allocation52_spill] sm:$0xff] }
 0x36b   :  { %v1902_v18 = vpack.c.bf16 %v1901_v57, %v1901_v57  ;;  %2095 = vmatpush.bf16.msra.mxu1 %v6435_v30  ;;  %2121 = vmatpush.bf16.msra.mxu3 %v6436_v44  ;;  %v6598_v57 = vld [vmem:[#allocation91_spill] sm:$0xff] }
 0x36d   :  { %1912 = vmatmul.bf16.vlgmr.msrb.gmra.mxu0 %v1902_v18  ;;  %1938 = vmatmul.bf16.vlgmr.msra.gmra.mxu2 %v1902_v18 }
 0x36e   :  { %2078 = vmatpush.bf16.msrb.mxu0 %v4400_v13  ;;  %2104 = vmatpush.bf16.msra.mxu2 %v4417_v32 }
 0x36f   :  { %2096 = vmatpush.bf16.msra.mxu1 %v6437_v3  ;;  %2122 = vmatpush.bf16.msra.mxu3 %v6438_v50 }
 0x372   :  { %2079 = vmatpush.bf16.msrb.mxu0 %v4412_v26  ;;  %2105 = vmatpush.bf16.msra.mxu2 %v4433_v45 }
 0x373   :  { %2097 = vmatpush.bf16.msra.mxu1 %v6439_v34  ;;  %2123 = vmatpush.bf16.msra.mxu3 %v4494_v42 }
 0x376   :  { %2080 = vmatpush.bf16.msrb.mxu0 %v6380_v31  ;;  %2106 = vmatpush.bf16.msra.mxu2 %v6381_v56 }
 0x377   :  { %2098 = vmatpush.bf16.msra.mxu1 %v6440_v16  ;;  %2124 = vmatpush.bf16.msra.mxu3 %v6441_v39 }
 0x37a   :  { %2081 = vmatpush.bf16.msrb.mxu0 %v6384_v54  ;;  %2099 = vmatmul.bf16.vlgmr.msra.gmra.mxu1 %v1902_v18 }
 0x37b   :  { %2212 = vmatpush.bf16.msrb.mxu1 %v6442_v60  ;;  %2238 = vmatpush.bf16.msrb.mxu3 %v6443_v12 }
 0x37c   :  { %2107 = vmatpush.bf16.msra.mxu2 %v6385_v22  ;;  %2125 = vmatmul.bf16.vlgmr.msra.gmra.mxu3 %v1902_v18 }
 0x37d   :  { %1964 = vmatmul.bf16.vlgmr.msra.gmra.mxu0 %v1902_v18  ;;  %1990 = vmatmul.bf16.vlgmr.msrb.gmra.mxu2 %v1902_v18 }
 0x37e   :  { %2082 = vmatpush.bf16.msrb.mxu0 %v6388_v25 }
 0x37f   :  { %2213 = vmatpush.bf16.msrb.mxu1 %v6444_v27  ;;  %2239 = vmatpush.bf16.msrb.mxu3 %v6445_v19 }
 0x380   :  { %2108 = vmatpush.bf16.msra.mxu2 %v6389_v47 }
 0x382   :  { %2083 = vmatpush.bf16.msrb.mxu0 %v6392_v14 }
 0x383   :  { %2214 = vmatpush.bf16.msrb.mxu1 %v6446_v9  ;;  %2240 = vmatpush.bf16.msrb.mxu3 %v6447_v41 }
 0x384   :  { %2109 = vmatpush.bf16.msra.mxu2 %v6393_v20 }
 0x386   :  { %2084 = vmatpush.bf16.msrb.mxu0 %v6577_v59 }
 0x387   :  { %2215 = vmatpush.bf16.msrb.mxu1 %v6575_v36  ;;  %2241 = vmatpush.bf16.msrb.mxu3 %v6576_v23  ;;  %v6641_v36 = vld [vmem:[#allocation46_spill] sm:$0xff] }
 0x388   :  { %2110 = vmatpush.bf16.msra.mxu2 %v6578_v24 }
 0x38a   :  { %2085 = vmatpush.bf16.msrb.mxu0 %v6581_v53 }
 0x38b   :  { %2216 = vmatpush.bf16.msrb.mxu1 %v6579_v58  ;;  %2242 = vmatpush.bf16.msrb.mxu3 %v6580_v5  ;;  %v6639_v5 = vld [vmem:[#allocation90_spill] sm:$0xff] }
 0x38c   :  { %2111 = vmatpush.bf16.msra.mxu2 %v6582_v4 }
 0x38d   :  { %2086 = vmatmul.bf16.vlgmr.msrb.gmra.mxu0 %v1902_v18 }
 0x38e   :  { %2199 = vmatpush.bf16.msra.mxu0 %v6583_v6 }
 0x38f   :  { %2217 = vmatpush.bf16.msrb.mxu1 %v6585_v63  ;;  %2243 = vmatpush.bf16.msrb.mxu3 %v6586_v17 }
 0x390   :  { %2225 = vmatpush.bf16.msrb.mxu2 %v6584_v48 }
 0x391   :  { %2112 = vmatmul.bf16.vlgmr.msra.gmra.mxu2 %v1902_v18  ;;  %v6599_v18 = vld [vmem:[#allocation71_spill] sm:$0xff] }
 0x392   :  { %2200 = vmatpush.bf16.msra.mxu0 %v6587_v62  ;;  %v6637_v62 = vld [vmem:[#allocation17_spill] sm:$0xff] }
 0x393   :  { %2218 = vmatpush.bf16.msrb.mxu1 %v6589_v37  ;;  %2244 = vmatpush.bf16.msrb.mxu3 %v6590_v21  ;;  %v6601_v21 = vld [vmem:[#allocation94_spill] sm:$0xff] }
 0x394   :  { %2226 = vmatpush.bf16.msrb.mxu2 %v6588_v40 }
 0x396   :  { %2201 = vmatpush.bf16.msra.mxu0 %v6591_v52  ;;  %v6602_v52 = vld [vmem:[#allocation95_spill] sm:$0xff] }
 0x397   :  { %2219 = vmatpush.bf16.msrb.mxu1 %v6593_v46  ;;  %2245 = vmatpush.bf16.msrb.mxu3 %v6594_v0  ;;  %v6604_v46 = vld [vmem:[#allocation82_spill] sm:$0xff]  ;;  %v6605_v0 = vld [vmem:[#allocation101_spill] sm:$0xff] }
 0x398   :  { %2227 = vmatpush.bf16.msrb.mxu2 %v6592_v61  ;;  %v6603_v61 = vld [vmem:[#allocation81_spill] sm:$0xff] }
 0x39a   :  { %2202 = vmatpush.bf16.msra.mxu0 %v6597_v11  ;;  %v6608_v11 = vld [vmem:[#allocation86_spill] sm:$0xff] }
 0x39b   :  { %2264 = vmatpush.bf16.msra.mxu1 %v6595_v38  ;;  %2290 = vmatpush.bf16.msra.mxu3 %v6596_v35  ;;  %v6606_v38 = vld [vmem:[#allocation102_spill] sm:$0xff]  ;;  %v6607_v35 = vld [vmem:[#allocation85_spill] sm:$0xff] }
 0x39c   :  { %2228 = vmatpush.bf16.msrb.mxu2 %v6598_v57  ;;  %v6609_v57 = vld [vmem:[#allocation105_spill] sm:$0xff] }
 0x39e   :  { %2203 = vmatpush.bf16.msra.mxu0 %v6601_v21  ;;  %v6612_v21 = vld [vmem:[#allocation93_spill] sm:$0xff] }
 0x39f   :  { %2265 = vmatpush.bf16.msra.mxu1 %v6599_v18  ;;  %2291 = vmatpush.bf16.msra.mxu3 %v6600_v1  ;;  %v6610_v18 = vld [vmem:[#allocation108_spill] sm:$0xff] }
 0x3a0   :  { %2229 = vmatpush.bf16.msrb.mxu2 %v6602_v52  ;;  %v6611_v1 = vld [vmem:[#allocation92_spill] sm:$0xff] }
 0x3a1   :  { %v6613_v52 = vld [vmem:[#allocation112_spill] sm:$0xff] }
 0x3a2   :  { %2204 = vmatpush.bf16.msra.mxu0 %v6605_v0  ;;  %v6616_v0 = vld [vmem:[#allocation115_spill] sm:$0xff] }
 0x3a3   :  { %2266 = vmatpush.bf16.msra.mxu1 %v6603_v61  ;;  %2292 = vmatpush.bf16.msra.mxu3 %v6604_v46  ;;  %v6614_v61 = vld [vmem:[#allocation113_spill] sm:$0xff]  ;;  %v6615_v46 = vld [vmem:[#allocation114_spill] sm:$0xff] }
 0x3a4   :  { %2230 = vmatpush.bf16.msrb.mxu2 %v6606_v38  ;;  %v6617_v38 = vld [vmem:[#allocation96_spill] sm:$0xff] }
 0x3a6   :  { %2205 = vmatpush.bf16.msra.mxu0 %v6609_v57  ;;  %v6620_v57 = vld [vmem:[#allocation117_spill] sm:$0xff] }
 0x3a7   :  { %2267 = vmatpush.bf16.msra.mxu1 %v6607_v35  ;;  %2293 = vmatpush.bf16.msra.mxu3 %v6608_v11  ;;  %v6618_v35 = vld [vmem:[#allocation97_spill] sm:$0xff]  ;;  %v6619_v11 = vld [vmem:[#allocation116_spill] sm:$0xff] }
 0x3a8   :  { %2231 = vmatpush.bf16.msrb.mxu2 %v6610_v18  ;;  %v6621_v18 = vld [vmem:[#allocation103_spill] sm:$0xff] }
 0x3aa   :  { %2206 = vmatpush.bf16.msra.mxu0 %v6613_v52  ;;  %v6624_v52 = vld [vmem:[#allocation122_spill] sm:$0xff] }
 0x3ab   :  { %2268 = vmatpush.bf16.msra.mxu1 %v6611_v1  ;;  %2294 = vmatpush.bf16.msra.mxu3 %v6612_v21  ;;  %v6622_v1 = vld [vmem:[#allocation104_spill] sm:$0xff]  ;;  %v6623_v21 = vld [vmem:[#allocation121_spill] sm:$0xff] }
 0x3ac   :  { %2232 = vmatpush.bf16.msrb.mxu2 %v6614_v61  ;;  %v6625_v61 = vld [vmem:[#allocation109_spill] sm:$0xff] }
 0x3ae   :  { %2251 = vmatpush.bf16.msrb.mxu0 %v6615_v46  ;;  %v6626_v46 = vld [vmem:[#allocation111_spill] sm:$0xff] }
 0x3af   :  { %2269 = vmatpush.bf16.msra.mxu1 %v6617_v38  ;;  %2295 = vmatpush.bf16.msra.mxu3 %v6618_v35  ;;  %v6628_v38 = vld [vmem:[#allocation126_spill] sm:$0xff]  ;;  %v6629_v35 = vld [vmem:[#allocation127_spill] sm:$0xff] }
 0x3b0   :  { %2277 = vmatpush.bf16.msra.mxu2 %v6616_v0  ;;  %v6627_v0 = vld [vmem:[#allocation123_spill] sm:$0xff] }
 0x3b2   :  { %2252 = vmatpush.bf16.msrb.mxu0 %v6619_v11  ;;  %v6630_v11 = vld [vmem:[#allocation128_spill] sm:$0xff] }
 0x3b3   :  { %2270 = vmatpush.bf16.msra.mxu1 %v6621_v18  ;;  %2296 = vmatpush.bf16.msra.mxu3 %v6622_v1  ;;  %v6632_v18 = vld [vmem:[#allocation130_spill] sm:$0xff]  ;;  %v6633_v1 = vld [vmem:[#allocation131_spill] sm:$0xff] }
 0x3b4   :  { %2278 = vmatpush.bf16.msra.mxu2 %v6620_v57  ;;  %v6631_v57 = vld [vmem:[#allocation129_spill] sm:$0xff] }
 0x3b6   :  { %2253 = vmatpush.bf16.msrb.mxu0 %v6623_v21  ;;  %v6634_v21 = vld [vmem:[#allocation132_spill] sm:$0xff] }
 0x3b7   :  { %2271 = vmatpush.bf16.msra.mxu1 %v6625_v61  ;;  %2297 = vmatpush.bf16.msra.mxu3 %v6626_v46  ;;  %v6636_v61 = vld [vmem:[#allocation134_spill] sm:$0xff] }
 0x3b8   :  { %2279 = vmatpush.bf16.msra.mxu2 %v6624_v52  ;;  %v6635_v52 = vld [vmem:[#allocation133_spill] sm:$0xff] }
 0x3ba   :  { %2254 = vmatpush.bf16.msrb.mxu0 %v6627_v0 }
 0x3bc   :  { %2280 = vmatpush.bf16.msra.mxu2 %v6628_v38 }
 0x3be   :  { %2255 = vmatpush.bf16.msrb.mxu0 %v6629_v35 }
 0x3c0   :  { %2281 = vmatpush.bf16.msra.mxu2 %v6630_v11 }
 0x3c2   :  { %2256 = vmatpush.bf16.msrb.mxu0 %v6631_v57 }
 0x3c4   :  { %2282 = vmatpush.bf16.msra.mxu2 %v6632_v18 }
 0x3c6   :  { %2257 = vmatpush.bf16.msrb.mxu0 %v6633_v1  ;;  %v6638_v1 = vld [vmem:[#allocation22_spill] sm:$0xff] }
 0x3c8   :  { %2283 = vmatpush.bf16.msra.mxu2 %v6634_v21 }
 0x3ca   :  { %2258 = vmatpush.bf16.msrb.mxu0 %v6635_v52 }
 0x3cc   :  { %2284 = vmatpush.bf16.msra.mxu2 %v6636_v61 }
 0x3d7   :  { %v1926_v46 = vpop.f32.mrf.mxu1 }
 0x3dd   :  { %v1952_v0 = vpop.f32.mrf.mxu3 }
 0x3df   :  { %v1928_v37 = vpop.f32.mrf.mxu1 }
 0x3e5   :  { %v1954_v38 = vpop.f32.mrf.mxu3 }
 0x3e7   :  { %v1978_v40 = vpop.f32.mrf.mxu1 }
 0x3ea   :  { %v1913_v35 = vpop.f32.mrf.mxu0 }
 0x3eb   :  { %v1914_v11 = vadd.f32 %v1913_v35, %v6637_v62 }
 0x3ed   :  { %v1927_v17 = vadd.f32 %v1926_v46, %v1914_v11  ;;  %v2004_v57 = vpop.f32.mrf.mxu3 }
 0x3ef   :  { %v3797_v63 = vmul.f32 -1.442695, %v1927_v17  ;;  %v1980_v18 = vpop.f32.mrf.mxu1 }
 0x3f0   :  { %v1939_v48 = vpop.f32.mrf.mxu2 }
 0x3f1   :  { %4082 = vpow2.f32 %v3797_v63  ;;  %v1940_v21 = vadd.f32 %v1939_v48, %v6638_v1 }
 0x3f2   :  { %v1915_v6 = vpop.f32.mrf.mxu0 }
 0x3f3   :  { %v1953_v52 = vadd.f32 %v1952_v0, %v1940_v21 }
 0x3f5   :  { %v3798_v4 = vmul.f32 -1.442695, %v1953_v52  ;;  %v2006_v61 = vpop.f32.mrf.mxu3 }
 0x3f6   :  { %v6640_v61 = vld [vmem:[#allocation99_spill] sm:$0xff] }
 0x3f7   :  { %v4083_v53 = vpop.eup %4082  ;;  %4084 = vpow2.f32 %v3798_v4  ;;  %v2100_v37 = vpop.f32.mrf.mxu1 }
 0x3f8   :  { %v5455_v38 = vadd.f32 1.0, %v4083_v53  ;;  %v2131_v58 = vadd.f32 %v2100_v37, %v6639_v5  ;;  %v1941_v35 = vpop.f32.mrf.mxu2 }
 0x3fa   :  { %4086 = vrcp.f32 %v5455_v38  ;;  %v3801_v17 = vmul.f32 -1.442695, %v2131_v58  ;;  %v1965_v46 = vpop.f32.mrf.mxu0  ;;  %vm2017_vm7 = vweird.f32 %v5455_v38 }
 0x3fb   :  { %v1966_v58 = vadd.f32 %v1965_v46, %v6491_v2 }
 0x3fc   :  { %4088 = vpow2.f32 %v3801_v17 }
 0x3fd   :  { %v4085_v11 = vpop.eup %4084 }
 0x3fe   :  { %v2030_v63 = vadd.f32 1.0, %v4085_v11 }
 0x3ff   :  { %v2126_v48 = vpop.f32.mrf.mxu3  ;;  %v2102_v6 = vpop.f32.mrf.mxu1 }
 0x400   :  { %v4087_v21 = vpop.eup %4086  ;;  %4090 = vrcp.f32 %v2030_v63  ;;  %v1991_v52 = vpop.f32.mrf.mxu2  ;;  %v2133_v53 = vadd.f32 %v2126_v48, %v6640_v61  ;;  %v6642_v48 = vld [vmem:[#allocation77_spill] sm:$0xff]  ;;  %vm2036_vm8 = vweird.f32 %v2030_v63 }
 0x401   :  { %v2013_v4 = vmul.f32 %v4087_v21, %v5455_v38  ;;  %v1992_v0 = vadd.f32 %v1991_v52, %v6567_v8  ;;  %v140_v61 = vadd.f32 %v6642_v48, %v6641_v36  ;;  %vm2018_vm5 = vweird.f32 %v4087_v21 }
 0x402   :  { %v1967_v5 = vpop.f32.mrf.mxu0  ;;  %v4089_v18 = vpop.eup %4088  ;;  %v3802_v1 = vmul.f32 -1.442695, %v2133_v53  ;;  %vm5470_vm9 = vmor %vm2017_vm7, %vm2018_vm5 }
 0x403   :  { %v2014_v37 = vsub.f32 1.0, %v2013_v4  ;;  %v2005_v35 = vadd.f32 %v2004_v57, %v1992_v0  ;;  %v5463_v11 = vadd.f32 1.0, %v4089_v18  ;;  %v1979_v5 = vadd.f32 %v1978_v40, %v1966_v58 }
 0x404   :  { %v2042_v4 = vand.u32 2147483648, %v2030_v63  ;;  %v2040_v57 = vand.u32 2147483647, %v2030_v63 }
 0x405   :  { %v3799_v6 = vmul.f32 -1.442695, %v2005_v35  ;;  %v2015_v59 = vmul.f32 %v4087_v21, %v2014_v37  ;;  %vm2162_vm2 = vweird.f32 %v5463_v11 }
 0x406   :  { %v4091_v17 = vpop.eup %4090  ;;  %v2043_v35 = vor.u32 1.1754944e-38, %v2042_v4  ;;  %vm2041_vm11 = vcmp.eq.f32.partialorder %v2040_v57, 8.507059e+37 }
 0x407   :  { %v2128_v62 = vpop.f32.mrf.mxu3  ;;  %v2032_v24 = vmul.f32 %v4091_v17, %v2030_v63  ;;  %4092 = vpow2.f32 %v3799_v6  ;;  %vm2037_vm6 = vweird.f32 %v4091_v17  ;;  %v2016_v0 = vadd.f32 %v4087_v21, %v2015_v59 }
 0x408   :  { %v1993_v23 = vpop.f32.mrf.mxu2  ;;  %4094 = vpow2.f32 %v3802_v1  ;;  %v2021_v1 = vand.u32 2147483647, %v5455_v38  ;;  %vm2038_vm10 = vmor %vm2036_vm8, %vm2037_vm6 }
 0x409   :  { %v2033_v52 = vsub.f32 1.0, %v2032_v24  ;;  %4096 = vrcp.f32 %v5463_v11  ;;  %v2023_v23 = vand.u32 2147483648, %v5455_v38  ;;  %v2020_v59 = vsel %vm5470_vm9, %v4087_v21, %v2016_v0 }
 0x40a   :  { %v2087_v46 = vpop.f32.mrf.mxu0  ;;  %4098 = vtanh.f32 %v1979_v5  ;;  %vm2022_vm12 = vcmp.eq.f32.partialorder %v2021_v1, 8.507059e+37 }
 0x40b   :  { %v2034_v53 = vmul.f32 %v4091_v17, %v2033_v52  ;;  %v2130_v62 = vadd.f32 %v2087_v46, %v140_v61  ;;  %v2024_v61 = vor.u32 1.1754944e-38, %v2023_v23 }
 0x40d   :  { %v2035_v24 = vadd.f32 %v4091_v17, %v2034_v53  ;;  %v3800_v40 = vmul.f32 -1.442695, %v2130_v62  ;;  %v4093_v37 = vpop.eup %4092  ;;  %v2025_v46 = vsel %vm2022_vm12, %v2024_v61, %v2020_v59 }
 0x40e   :  { %v4095_v58 = vpop.eup %4094  ;;  %v2050_v48 = vadd.f32 1.0, %v4093_v37 }
 0x40f   :  { %v2039_v6 = vsel %vm2038_vm10, %v4091_v17, %v2035_v24  ;;  %v5477_v63 = vpop.eup %4096  ;;  %4100 = vpow2.f32 %v3800_v40  ;;  %v5482_v21 = vadd.f32 1.0, %v4095_v58 }
 0x410   :  { %v2044_v52 = vsel %vm2041_vm11, %v2043_v35, %v2039_v6  ;;  %4102 = vrcp.f32 %v2050_v48  ;;  %v2158_v5 = vmul.f32 %v5477_v63, %v5463_v11  ;;  %v4099_v62 = vpop.eup %4098  ;;  %v2060_v59 = vand.u32 2147483647, %v2050_v48 }
 0x411   :  { %v2066_v4 = vmul.f32 %v2044_v52, %v5323_v43  ;;  %v2067_v17 = vmul.f32 %v4099_v62, %v2025_v46  ;;  %4104 = vrcp.f32 %v5482_v21  ;;  %v2062_v43 = vand.u32 2147483648, %v2050_v48  ;;  %v6645_v46 = vld [vmem:[#allocation98_spill] sm:$0xff] }
 0x412   :  { %v2089_v53 = vpop.f32.mrf.mxu0  ;;  %v2159_v18 = vsub.f32 1.0, %v2158_v5  ;;  %vm2056_vm14 = vweird.f32 %v2050_v48  ;;  %vm2163_vm15 = vweird.f32 %v5477_v63  ;;  %vm2061_vm1 = vcmp.eq.f32.partialorder %v2060_v59, 8.507059e+37 }
 0x413   :  { %v5484_v23 = vadd.f32 %v2067_v17, %v2066_v4  ;;  %v2063_v4 = vor.u32 1.1754944e-38, %v2062_v43  ;;  %vm5498_vm3 = vmor %vm2162_vm2, %vm2163_vm15  ;;  %vm2182_vm10 = vweird.f32 %v5482_v21 }
 0x414   :  { %v2113_v38 = vpop.f32.mrf.mxu2  ;;  %v2160_v35 = vmul.f32 %v5477_v63, %v2159_v18  ;;  %v2168_v18 = vand.u32 2147483648, %v5463_v11 }
 0x415   :  { %v4101_v57 = vpop.eup %4100  ;;  %v2132_v53 = vadd.f32 %v2113_v38, %v6645_v46 }
 0x416   :  { %v4103_v0 = vpop.eup %4102  ;;  %v2137_v24 = vadd.f32 1.0, %v4101_v57  ;;  %v2161_v5 = vadd.f32 %v5477_v63, %v2160_v35  ;;  %v2169_v46 = vor.u32 1.1754944e-38, %v2168_v18 }
 0x417   :  { %v2052_v1 = vmul.f32 %v4103_v0, %v2050_v48  ;;  %vm2057_vm13 = vweird.f32 %v4103_v0  ;;  %v5489_v6 = vpop.eup %4104 }
 0x418   :  { %4106 = vrcp.f32 %v2137_v24  ;;  %vm2058_vm0 = vmor %vm2056_vm14, %vm2057_vm13  ;;  %v2178_v48 = vmul.f32 %v5489_v6, %v5482_v21  ;;  %v2149_v43 = vand.u32 2147483648, %v2137_v24  ;;  %v2147_v59 = vand.u32 2147483647, %v2137_v24 }
 0x419   :  { %v2053_v37 = vsub.f32 1.0, %v2052_v1  ;;  %4108 = vtanh.f32 %v5484_v23  ;;  %vm2143_vm5 = vweird.f32 %v2137_v24  ;;  %vm2183_vm9 = vweird.f32 %v5489_v6 }
 0x41a   :  { %4110 = vtanh.f32 %v2132_v53  ;;  %vm2148_vm8 = vcmp.eq.f32.partialorder %v2147_v59, 8.507059e+37  ;;  %vm2184_vm11 = vmor %vm2182_vm10, %vm2183_vm9  ;;  %v6651_v59 = vld [vmem:[#allocation35_spill] sm:$0xff] }
 0x41b   :  { %v2054_v58 = vmul.f32 %v4103_v0, %v2053_v37  ;;  %v2166_v37 = vand.u32 2147483647, %v5463_v11  ;;  %v2150_v11 = vor.u32 1.1754944e-38, %v2149_v43 }
 0x41c   :  { %v2115_v40 = vpop.f32.mrf.mxu2 }
 0x41d   :  { %v2055_v61 = vadd.f32 %v4103_v0, %v2054_v58  ;;  %vm2167_vm6 = vcmp.eq.f32.partialorder %v2166_v37, 8.507059e+37  ;;  %v2186_v40 = vand.u32 2147483647, %v5482_v21 }
 0x41e   :  { %v4107_v52 = vpop.eup %4106 }
 0x41f   :  { %v2139_v62 = vmul.f32 %v4107_v52, %v2137_v24  ;;  %v2059_v17 = vsel %vm2058_vm0, %v4103_v0, %v2055_v61  ;;  %v4109_v57 = vpop.eup %4108  ;;  %v2165_v0 = vsel %vm5498_vm3, %v5477_v63, %v2161_v5  ;;  %vm2144_vm4 = vweird.f32 %v4107_v52 }
 0x420   :  { %v2064_v1 = vsel %vm2061_vm1, %v2063_v4, %v2059_v17  ;;  %v2179_v4 = vsub.f32 1.0, %v2178_v48  ;;  %vm2145_vm7 = vmor %vm2143_vm5, %vm2144_vm4  ;;  %v4111_v53 = vpop.eup %4110  ;;  %vm2187_vm12 = vcmp.eq.f32.partialorder %v2186_v40, 8.507059e+37  ;;  %v6666_v40 = vld [vmem:[#allocation63_spill] sm:$0xff] }
 0x421   :  { %v2140_v38 = vsub.f32 1.0, %v2139_v62  ;;  %v2070_v35 = vmul.f32 %v4109_v57, %v2064_v1  ;;  %v2170_v62 = vsel %vm2167_vm6, %v2169_v46, %v2165_v0  ;;  %v6653_v46 = vld [vmem:[#allocation53_spill] sm:$0xff] }
 0x422   :  { %v2180_v5 = vmul.f32 %v5489_v6, %v2179_v4  ;;  %v2192_v18 = vmul.f32 %v2170_v62, %v5352_v10  ;;  %v6654_v4 = vld [vmem:[#allocation34_spill] sm:$0xff] }
 0x423   :  { %v2141_v58 = vmul.f32 %v4107_v52, %v2140_v38  ;;  %v2198_v61 = vpack.c.bf16 %v2070_v35, %v2070_v35  ;;  %v6657_v62 = vld [vmem:[#allocation70_spill] sm:$0xff] }
 0x424   :  { %v2181_v1 = vadd.f32 %v5489_v6, %v2180_v5  ;;  %v6660_v5 = vld [vmem:[#allocation79_spill] sm:$0xff] }
 0x425   :  { %v2142_v17 = vadd.f32 %v4107_v52, %v2141_v58  ;;  %2220 = vmatmul.bf16.vlgmr.msrb.gmra.mxu1 %v2198_v61  ;;  %2246 = vmatmul.bf16.vlgmr.msrb.gmra.mxu3 %v2198_v61  ;;  %v6650_v58 = vld [vmem:[#allocation31_spill] sm:$0xff] }
 0x426   :  { %2386 = vmatpush.bf16.msrb.mxu1 %v6427_v29  ;;  %2412 = vmatpush.bf16.msrb.mxu3 %v6428_v51  ;;  %v2185_v10 = vsel %vm2184_vm11, %v5489_v6, %v2181_v1  ;;  %v6649_v6 = vld [vmem:[#allocation51_spill] sm:$0xff] }
 0x427   :  { %v2146_v63 = vsel %vm2145_vm7, %v4107_v52, %v2142_v17  ;;  %v2188_v52 = vand.u32 2147483648, %v5482_v21  ;;  %v6648_v21 = vld [vmem:[#allocation49_spill] sm:$0xff]  ;;  %v6664_v1 = vld [vmem:[#allocation83_spill] sm:$0xff] }
 0x428   :  { %v2151_v57 = vsel %vm2148_vm8, %v2150_v11, %v2146_v63  ;;  %v6655_v17 = vld [vmem:[#allocation37_spill] sm:$0xff]  ;;  %v6658_v63 = vld [vmem:[#allocation56_spill] sm:$0xff] }
 0x429   :  { %v2193_v48 = vmul.f32 %v4111_v53, %v2151_v57  ;;  %v2189_v38 = vor.u32 1.1754944e-38, %v2188_v52  ;;  %v6656_v11 = vld [vmem:[#allocation69_spill] sm:$0xff]  ;;  %v6661_v57 = vld [vmem:[#allocation80_spill] sm:$0xff] }
 0x42a   :  { %2387 = vmatpush.bf16.msrb.mxu1 %v6429_v15  ;;  %2413 = vmatpush.bf16.msrb.mxu3 %v6430_v49  ;;  %v6659_v53 = vld [vmem:[#allocation57_spill] sm:$0xff]  ;;  %v6665_v52 = vld [vmem:[#allocation84_spill] sm:$0xff] }
 0x42b   :  { %v5512_v24 = vadd.f32 %v2193_v48, %v2192_v18  ;;  %v2190_v35 = vsel %vm2187_vm12, %v2189_v38, %v2185_v10  ;;  %v6662_v18 = vld [vmem:[#allocation58_spill] sm:$0xff]  ;;  %v6663_v48 = vld [vmem:[#allocation59_spill] sm:$0xff] }
 0x42c   :  { %v6667_v10 = vld [vmem:[#allocation66_spill] sm:$0xff]  ;;  %v6668_v38 = vld [vmem:[#allocation67_spill] sm:$0xff] }
 0x42d   :  { %4112 = vtanh.f32 %v5512_v24 }
 0x42e   :  { %2388 = vmatpush.bf16.msrb.mxu1 %v6431_v7  ;;  %2414 = vmatpush.bf16.msrb.mxu3 %v6432_v55 }
 0x432   :  { %2389 = vmatpush.bf16.msrb.mxu1 %v6433_v33  ;;  %2415 = vmatpush.bf16.msrb.mxu3 %v6434_v28 }
 0x433   :  { %v4113_v37 = vpop.eup %4112 }
 0x434   :  { %v2196_v43 = vmul.f32 %v4113_v37, %v2190_v35  ;;  %v6669_v37 = vld [vmem:[#allocation68_spill] sm:$0xff]  ;;  %v6670_v35 = vld [vmem:[#allocation89_spill] sm:$0xff] }
 0x435   :  { %2272 = vmatmul.bf16.vlgmr.msra.gmra.mxu1 %v2198_v61  ;;  %2298 = vmatmul.bf16.vlgmr.msra.gmra.mxu3 %v2198_v61  ;;  %v6652_v61 = vld [vmem:[#allocation52_spill] sm:$0xff] }
 0x436   :  { %v2197_v0 = vpack.c.bf16 %v2196_v43, %v2196_v43  ;;  %2390 = vmatpush.bf16.msrb.mxu1 %v6435_v30  ;;  %2416 = vmatpush.bf16.msrb.mxu3 %v6436_v44  ;;  %v6671_v43 = vld [vmem:[#allocation91_spill] sm:$0xff] }
 0x438   :  { %2207 = vmatmul.bf16.vlgmr.msra.gmra.mxu0 %v2197_v0  ;;  %2233 = vmatmul.bf16.vlgmr.msrb.gmra.mxu2 %v2197_v0 }
 0x439   :  { %2373 = vmatpush.bf16.msra.mxu0 %v4400_v13  ;;  %2399 = vmatpush.bf16.msrb.mxu2 %v4417_v32 }
 0x43a   :  { %2391 = vmatpush.bf16.msrb.mxu1 %v6437_v3  ;;  %2417 = vmatpush.bf16.msrb.mxu3 %v6438_v50 }
 0x43d   :  { %2374 = vmatpush.bf16.msra.mxu0 %v4412_v26  ;;  %2400 = vmatpush.bf16.msrb.mxu2 %v4433_v45 }
 0x43e   :  { %2392 = vmatpush.bf16.msrb.mxu1 %v6439_v34  ;;  %2418 = vmatpush.bf16.msrb.mxu3 %v4494_v42 }
 0x441   :  { %2375 = vmatpush.bf16.msra.mxu0 %v6380_v31  ;;  %2401 = vmatpush.bf16.msrb.mxu2 %v6381_v56 }
 0x442   :  { %2393 = vmatpush.bf16.msrb.mxu1 %v6440_v16  ;;  %2419 = vmatpush.bf16.msrb.mxu3 %v6441_v39 }
 0x445   :  { %2376 = vmatpush.bf16.msra.mxu0 %v6384_v54  ;;  %2394 = vmatmul.bf16.vlgmr.msrb.gmra.mxu1 %v2197_v0 }
 0x446   :  { %2507 = vmatpush.bf16.msra.mxu1 %v6442_v60  ;;  %2533 = vmatpush.bf16.msra.mxu3 %v6443_v12 }
 0x447   :  { %2402 = vmatpush.bf16.msrb.mxu2 %v6385_v22  ;;  %2420 = vmatmul.bf16.vlgmr.msrb.gmra.mxu3 %v2197_v0 }
 0x448   :  { %2259 = vmatmul.bf16.vlgmr.msrb.gmra.mxu0 %v2197_v0  ;;  %2285 = vmatmul.bf16.vlgmr.msra.gmra.mxu2 %v2197_v0 }
 0x449   :  { %2377 = vmatpush.bf16.msra.mxu0 %v6388_v25 }
 0x44a   :  { %2508 = vmatpush.bf16.msra.mxu1 %v6444_v27  ;;  %2534 = vmatpush.bf16.msra.mxu3 %v6445_v19 }
 0x44b   :  { %2403 = vmatpush.bf16.msrb.mxu2 %v6389_v47 }
 0x44d   :  { %2378 = vmatpush.bf16.msra.mxu0 %v6392_v14 }
 0x44e   :  { %2509 = vmatpush.bf16.msra.mxu1 %v6446_v9  ;;  %2535 = vmatpush.bf16.msra.mxu3 %v6447_v41 }
 0x44f   :  { %2404 = vmatpush.bf16.msrb.mxu2 %v6393_v20 }
 0x451   :  { %2379 = vmatpush.bf16.msra.mxu0 %v6650_v58 }
 0x452   :  { %2510 = vmatpush.bf16.msra.mxu1 %v6648_v21  ;;  %2536 = vmatpush.bf16.msra.mxu3 %v6649_v6 }
 0x453   :  { %2405 = vmatpush.bf16.msrb.mxu2 %v6651_v59 }
 0x455   :  { %2380 = vmatpush.bf16.msra.mxu0 %v6654_v4 }
 0x456   :  { %2511 = vmatpush.bf16.msra.mxu1 %v6652_v61  ;;  %2537 = vmatpush.bf16.msra.mxu3 %v6653_v46  ;;  %v6712_v46 = vld [vmem:[#allocation60_spill] sm:$0xff] }
 0x457   :  { %2406 = vmatpush.bf16.msrb.mxu2 %v6655_v17  ;;  %v6713_v61 = vld [vmem:[#allocation100_spill] sm:$0xff] }
 0x458   :  { %2381 = vmatmul.bf16.vlgmr.msra.gmra.mxu0 %v2197_v0 }
 0x459   :  { %2494 = vmatpush.bf16.msrb.mxu0 %v6656_v11 }
 0x45a   :  { %2512 = vmatpush.bf16.msra.mxu1 %v6658_v63  ;;  %2538 = vmatpush.bf16.msra.mxu3 %v6659_v53  ;;  %v6710_v53 = vld [vmem:[#allocation17_spill] sm:$0xff] }
 0x45b   :  { %2520 = vmatpush.bf16.msra.mxu2 %v6657_v62 }
 0x45c   :  { %2407 = vmatmul.bf16.vlgmr.msrb.gmra.mxu2 %v2197_v0  ;;  %v6672_v0 = vld [vmem:[#allocation71_spill] sm:$0xff] }
 0x45d   :  { %2495 = vmatpush.bf16.msrb.mxu0 %v6660_v5 }
 0x45e   :  { %2513 = vmatpush.bf16.msra.mxu1 %v6662_v18  ;;  %2539 = vmatpush.bf16.msra.mxu3 %v6663_v48  ;;  %v6673_v18 = vld [vmem:[#allocation74_spill] sm:$0xff] }
 0x45f   :  { %2521 = vmatpush.bf16.msra.mxu2 %v6661_v57  ;;  %v6674_v48 = vld [vmem:[#allocation94_spill] sm:$0xff] }
 0x461   :  { %2496 = vmatpush.bf16.msrb.mxu0 %v6664_v1  ;;  %v6675_v1 = vld [vmem:[#allocation95_spill] sm:$0xff] }
 0x462   :  { %2514 = vmatpush.bf16.msra.mxu1 %v6666_v40  ;;  %2540 = vmatpush.bf16.msra.mxu3 %v6667_v10  ;;  %v6677_v40 = vld [vmem:[#allocation82_spill] sm:$0xff]  ;;  %v6678_v10 = vld [vmem:[#allocation101_spill] sm:$0xff] }
 0x463   :  { %2522 = vmatpush.bf16.msra.mxu2 %v6665_v52  ;;  %v6676_v52 = vld [vmem:[#allocation81_spill] sm:$0xff] }
 0x465   :  { %2497 = vmatpush.bf16.msrb.mxu0 %v6670_v35  ;;  %v6681_v35 = vld [vmem:[#allocation86_spill] sm:$0xff] }
 0x466   :  { %2559 = vmatpush.bf16.msrb.mxu1 %v6668_v38  ;;  %2585 = vmatpush.bf16.msrb.mxu3 %v6669_v37  ;;  %v6679_v38 = vld [vmem:[#allocation102_spill] sm:$0xff]  ;;  %v6680_v37 = vld [vmem:[#allocation85_spill] sm:$0xff] }
 0x467   :  { %2523 = vmatpush.bf16.msra.mxu2 %v6671_v43  ;;  %v6682_v43 = vld [vmem:[#allocation105_spill] sm:$0xff] }
 0x469   :  { %2498 = vmatpush.bf16.msrb.mxu0 %v6674_v48  ;;  %v6685_v48 = vld [vmem:[#allocation93_spill] sm:$0xff] }
 0x46a   :  { %2560 = vmatpush.bf16.msrb.mxu1 %v6672_v0  ;;  %2586 = vmatpush.bf16.msrb.mxu3 %v6673_v18  ;;  %v6683_v0 = vld [vmem:[#allocation108_spill] sm:$0xff] }
 0x46b   :  { %2524 = vmatpush.bf16.msra.mxu2 %v6675_v1  ;;  %v6684_v18 = vld [vmem:[#allocation92_spill] sm:$0xff] }
 0x46c   :  { %v6686_v1 = vld [vmem:[#allocation112_spill] sm:$0xff] }
 0x46d   :  { %2499 = vmatpush.bf16.msrb.mxu0 %v6678_v10  ;;  %v6689_v10 = vld [vmem:[#allocation115_spill] sm:$0xff] }
 0x46e   :  { %2561 = vmatpush.bf16.msrb.mxu1 %v6676_v52  ;;  %2587 = vmatpush.bf16.msrb.mxu3 %v6677_v40  ;;  %v6687_v52 = vld [vmem:[#allocation113_spill] sm:$0xff]  ;;  %v6688_v40 = vld [vmem:[#allocation114_spill] sm:$0xff] }
 0x46f   :  { %2525 = vmatpush.bf16.msra.mxu2 %v6679_v38  ;;  %v6690_v38 = vld [vmem:[#allocation96_spill] sm:$0xff] }
 0x471   :  { %2500 = vmatpush.bf16.msrb.mxu0 %v6682_v43  ;;  %v6693_v43 = vld [vmem:[#allocation117_spill] sm:$0xff] }
 0x472   :  { %2562 = vmatpush.bf16.msrb.mxu1 %v6680_v37  ;;  %2588 = vmatpush.bf16.msrb.mxu3 %v6681_v35  ;;  %v6691_v37 = vld [vmem:[#allocation97_spill] sm:$0xff]  ;;  %v6692_v35 = vld [vmem:[#allocation116_spill] sm:$0xff] }
 0x473   :  { %2526 = vmatpush.bf16.msra.mxu2 %v6683_v0  ;;  %v6694_v0 = vld [vmem:[#allocation103_spill] sm:$0xff] }
 0x475   :  { %2501 = vmatpush.bf16.msrb.mxu0 %v6686_v1  ;;  %v6697_v1 = vld [vmem:[#allocation122_spill] sm:$0xff] }
 0x476   :  { %2563 = vmatpush.bf16.msrb.mxu1 %v6684_v18  ;;  %2589 = vmatpush.bf16.msrb.mxu3 %v6685_v48  ;;  %v6695_v18 = vld [vmem:[#allocation104_spill] sm:$0xff]  ;;  %v6696_v48 = vld [vmem:[#allocation121_spill] sm:$0xff] }
 0x477   :  { %2527 = vmatpush.bf16.msra.mxu2 %v6687_v52  ;;  %v6698_v52 = vld [vmem:[#allocation109_spill] sm:$0xff] }
 0x479   :  { %2546 = vmatpush.bf16.msra.mxu0 %v6688_v40  ;;  %v6699_v40 = vld [vmem:[#allocation111_spill] sm:$0xff] }
 0x47a   :  { %2564 = vmatpush.bf16.msrb.mxu1 %v6690_v38  ;;  %2590 = vmatpush.bf16.msrb.mxu3 %v6691_v37  ;;  %v6701_v38 = vld [vmem:[#allocation126_spill] sm:$0xff]  ;;  %v6702_v37 = vld [vmem:[#allocation127_spill] sm:$0xff] }
 0x47b   :  { %2572 = vmatpush.bf16.msrb.mxu2 %v6689_v10  ;;  %v6700_v10 = vld [vmem:[#allocation123_spill] sm:$0xff] }
 0x47d   :  { %2547 = vmatpush.bf16.msra.mxu0 %v6692_v35  ;;  %v6703_v35 = vld [vmem:[#allocation128_spill] sm:$0xff] }
 0x47e   :  { %2565 = vmatpush.bf16.msrb.mxu1 %v6694_v0  ;;  %2591 = vmatpush.bf16.msrb.mxu3 %v6695_v18  ;;  %v6705_v0 = vld [vmem:[#allocation130_spill] sm:$0xff]  ;;  %v6706_v18 = vld [vmem:[#allocation131_spill] sm:$0xff] }
 0x47f   :  { %2573 = vmatpush.bf16.msrb.mxu2 %v6693_v43  ;;  %v6704_v43 = vld [vmem:[#allocation129_spill] sm:$0xff] }
 0x481   :  { %2548 = vmatpush.bf16.msra.mxu0 %v6696_v48  ;;  %v6707_v48 = vld [vmem:[#allocation132_spill] sm:$0xff] }
 0x482   :  { %2566 = vmatpush.bf16.msrb.mxu1 %v6698_v52  ;;  %2592 = vmatpush.bf16.msrb.mxu3 %v6699_v40  ;;  %v6709_v52 = vld [vmem:[#allocation134_spill] sm:$0xff] }
 0x483   :  { %2574 = vmatpush.bf16.msrb.mxu2 %v6697_v1  ;;  %v6708_v1 = vld [vmem:[#allocation133_spill] sm:$0xff] }
 0x485   :  { %2549 = vmatpush.bf16.msra.mxu0 %v6700_v10 }
 0x487   :  { %2575 = vmatpush.bf16.msrb.mxu2 %v6701_v38 }
 0x489   :  { %2550 = vmatpush.bf16.msra.mxu0 %v6702_v37 }
 0x48b   :  { %2576 = vmatpush.bf16.msrb.mxu2 %v6703_v35 }
 0x48d   :  { %2551 = vmatpush.bf16.msra.mxu0 %v6704_v43 }
 0x48f   :  { %2577 = vmatpush.bf16.msrb.mxu2 %v6705_v0 }
 0x491   :  { %2552 = vmatpush.bf16.msra.mxu0 %v6706_v18  ;;  %v6711_v18 = vld [vmem:[#allocation22_spill] sm:$0xff] }
 0x493   :  { %2578 = vmatpush.bf16.msrb.mxu2 %v6707_v48 }
 0x495   :  { %2553 = vmatpush.bf16.msra.mxu0 %v6708_v1 }
 0x497   :  { %2579 = vmatpush.bf16.msrb.mxu2 %v6709_v52 }
 0x4a2   :  { %v2221_v40 = vpop.f32.mrf.mxu1 }
 0x4a8   :  { %v2247_v10 = vpop.f32.mrf.mxu3 }
 0x4aa   :  { %v2223_v57 = vpop.f32.mrf.mxu1 }
 0x4ab   :  { %v184_v57 = vadd.f32 %v6713_v61, %v6712_v46 }
 0x4b0   :  { %v2249_v38 = vpop.f32.mrf.mxu3 }
 0x4b2   :  { %v2273_v5 = vpop.f32.mrf.mxu1 }
 0x4b5   :  { %v2208_v37 = vpop.f32.mrf.mxu0 }
 0x4b6   :  { %v2209_v35 = vadd.f32 %v2208_v37, %v6710_v53 }
 0x4b8   :  { %v2222_v63 = vadd.f32 %v2221_v40, %v2209_v35  ;;  %v2299_v43 = vpop.f32.mrf.mxu3 }
 0x4ba   :  { %v3803_v62 = vmul.f32 -1.442695, %v2222_v63  ;;  %v2275_v0 = vpop.f32.mrf.mxu1 }
 0x4bb   :  { %v2234_v11 = vpop.f32.mrf.mxu2 }
 0x4bc   :  { %4114 = vpow2.f32 %v3803_v62  ;;  %v2235_v48 = vadd.f32 %v2234_v11, %v6711_v18 }
 0x4bd   :  { %v2210_v17 = vpop.f32.mrf.mxu0 }
 0x4be   :  { %v2248_v1 = vadd.f32 %v2247_v10, %v2235_v48  ;;  %v6714_v48 = vld [vmem:[#allocation73_spill] sm:$0xff] }
 0x4c0   :  { %v3804_v4 = vmul.f32 -1.442695, %v2248_v1  ;;  %v2301_v52 = vpop.f32.mrf.mxu3  ;;  %v6715_v1 = vld [vmem:[#allocation107_spill] sm:$0xff] }
 0x4c1   :  { %v266_v52 = vadd.f32 %v6715_v1, %v6714_v48 }
 0x4c2   :  { %v4115_v38 = vpop.eup %4114  ;;  %4116 = vpow2.f32 %v3804_v4  ;;  %v2395_v59 = vpop.f32.mrf.mxu1 }
 0x4c3   :  { %v5617_v58 = vadd.f32 1.0, %v4115_v38  ;;  %v2426_v40 = vadd.f32 %v2395_v59, %v184_v57  ;;  %v2236_v37 = vpop.f32.mrf.mxu2 }
 0x4c5   :  { %4118 = vrcp.f32 %v5617_v58  ;;  %v3807_v63 = vmul.f32 -1.442695, %v2426_v40  ;;  %v2260_v62 = vpop.f32.mrf.mxu0  ;;  %vm2312_vm15 = vweird.f32 %v5617_v58 }
 0x4c7   :  { %4120 = vpow2.f32 %v3807_v63  ;;  %v2261_v63 = vadd.f32 %v2260_v62, %v6491_v2 }
 0x4c8   :  { %v4117_v35 = vpop.eup %4116 }
 0x4c9   :  { %v2325_v17 = vadd.f32 1.0, %v4117_v35 }
 0x4ca   :  { %v2421_v11 = vpop.f32.mrf.mxu3  ;;  %v2397_v10 = vpop.f32.mrf.mxu1 }
 0x4cb   :  { %v4119_v61 = vpop.eup %4118  ;;  %4122 = vrcp.f32 %v2325_v17  ;;  %v2286_v4 = vpop.f32.mrf.mxu2  ;;  %v2428_v38 = vadd.f32 %v2421_v11, %v266_v52  ;;  %v6716_v11 = vld [vmem:[#allocation41_spill] sm:$0xff]  ;;  %vm2331_vm0 = vweird.f32 %v2325_v17 }
 0x4cc   :  { %v2308_v0 = vmul.f32 %v4119_v61, %v5617_v58  ;;  %v2287_v59 = vadd.f32 %v2286_v4, %v6567_v8  ;;  %v143_v52 = vadd.f32 %v6716_v11, %v6641_v36  ;;  %vm2313_vm13 = vweird.f32 %v4119_v61 }
 0x4cd   :  { %v2262_v57 = vpop.f32.mrf.mxu0  ;;  %v4121_v37 = vpop.eup %4120  ;;  %v3808_v35 = vmul.f32 -1.442695, %v2428_v38  ;;  %vm5632_vm1 = vmor %vm2312_vm15, %vm2313_vm13 }
 0x4ce   :  { %v2309_v40 = vsub.f32 1.0, %v2308_v0  ;;  %v2300_v46 = vadd.f32 %v2299_v43, %v2287_v59  ;;  %v5625_v53 = vadd.f32 1.0, %v4121_v37  ;;  %v2274_v57 = vadd.f32 %v2273_v5, %v2261_v63 }
 0x4cf   :  { %v2337_v0 = vand.u32 2147483648, %v2325_v17  ;;  %v2335_v43 = vand.u32 2147483647, %v2325_v17  ;;  %v2316_v5 = vand.u32 2147483647, %v5617_v58 }
 0x4d0   :  { %v3805_v1 = vmul.f32 -1.442695, %v2300_v46  ;;  %v2310_v6 = vmul.f32 %v4119_v61, %v2309_v40  ;;  %vm2457_vm10 = vweird.f32 %v5625_v53 }
 0x4d1   :  { %v4123_v18 = vpop.eup %4122  ;;  %vm2336_vm3 = vcmp.eq.f32.partialorder %v2335_v43, 8.507059e+37  ;;  %vm2317_vm4 = vcmp.eq.f32.partialorder %v2316_v5, 8.507059e+37 }
 0x4d2   :  { %v2423_v10 = vpop.f32.mrf.mxu3  ;;  %v2327_v48 = vmul.f32 %v4123_v18, %v2325_v17  ;;  %4124 = vpow2.f32 %v3805_v1  ;;  %vm2332_vm14 = vweird.f32 %v4123_v18  ;;  %v2311_v46 = vadd.f32 %v4119_v61, %v2310_v6 }
 0x4d3   :  { %v2288_v21 = vpop.f32.mrf.mxu2  ;;  %4126 = vpow2.f32 %v3808_v35  ;;  %vm2333_vm2 = vmor %vm2331_vm0, %vm2332_vm14  ;;  %v2338_v35 = vor.u32 1.1754944e-38, %v2337_v0 }
 0x4d4   :  { %v2328_v4 = vsub.f32 1.0, %v2327_v48  ;;  %4128 = vrcp.f32 %v5625_v53  ;;  %v2318_v21 = vand.u32 2147483648, %v5617_v58  ;;  %v2315_v6 = vsel %vm5632_vm1, %v4119_v61, %v2311_v46 }
 0x4d5   :  { %v2382_v62 = vpop.f32.mrf.mxu0  ;;  %4130 = vtanh.f32 %v2274_v57 }
 0x4d6   :  { %v2329_v38 = vmul.f32 %v4123_v18, %v2328_v4  ;;  %v2425_v59 = vadd.f32 %v2382_v62, %v143_v52  ;;  %v2319_v52 = vor.u32 1.1754944e-38, %v2318_v21 }
 0x4d8   :  { %v2330_v48 = vadd.f32 %v4123_v18, %v2329_v38  ;;  %v3806_v40 = vmul.f32 -1.442695, %v2425_v59  ;;  %v4125_v63 = vpop.eup %4124  ;;  %v2320_v62 = vsel %vm2317_vm4, %v2319_v52, %v2315_v6  ;;  %v6720_v52 = vld [vmem:[#allocation106_spill] sm:$0xff] }
 0x4d9   :  { %v4127_v1 = vpop.eup %4126  ;;  %v2345_v11 = vadd.f32 1.0, %v4125_v63 }
 0x4da   :  { %v2334_v10 = vsel %vm2333_vm2, %v4123_v18, %v2330_v48  ;;  %v5639_v17 = vpop.eup %4128  ;;  %4132 = vpow2.f32 %v3806_v40  ;;  %v5644_v61 = vadd.f32 1.0, %v4127_v1 }
 0x4db   :  { %v2339_v4 = vsel %vm2336_vm3, %v2338_v35, %v2334_v10  ;;  %4134 = vrcp.f32 %v2345_v11  ;;  %v2453_v57 = vmul.f32 %v5639_v17, %v5625_v53  ;;  %v4131_v59 = vpop.eup %4130  ;;  %v2355_v6 = vand.u32 2147483647, %v2345_v11  ;;  %v6719_v10 = vld [vmem:[#allocation72_spill] sm:$0xff] }
 0x4dc   :  { %v2361_v0 = vmul.f32 %v2339_v4, %v5484_v23  ;;  %v2362_v18 = vmul.f32 %v4131_v59, %v2320_v62  ;;  %4136 = vrcp.f32 %v5644_v61  ;;  %v2357_v23 = vand.u32 2147483648, %v2345_v11 }
 0x4dd   :  { %v2384_v38 = vpop.f32.mrf.mxu0  ;;  %v2454_v37 = vsub.f32 1.0, %v2453_v57  ;;  %v225_v4 = vadd.f32 %v6720_v52, %v6719_v10  ;;  %vm2351_vm6 = vweird.f32 %v2345_v11  ;;  %vm2458_vm7 = vweird.f32 %v5639_v17 }
 0x4de   :  { %v5646_v21 = vadd.f32 %v2362_v18, %v2361_v0  ;;  %v2358_v18 = vor.u32 1.1754944e-38, %v2357_v23  ;;  %vm2356_vm9 = vcmp.eq.f32.partialorder %v2355_v6, 8.507059e+37  ;;  %vm5661_vm11 = vmor %vm2457_vm10, %vm2458_vm7  ;;  %vm2477_vm2 = vweird.f32 %v5644_v61 }
 0x4df   :  { %v2408_v58 = vpop.f32.mrf.mxu2  ;;  %v2455_v35 = vmul.f32 %v5639_v17, %v2454_v37 }
 0x4e0   :  { %v4133_v43 = vpop.eup %4132  ;;  %v2427_v0 = vadd.f32 %v2408_v58, %v225_v4 }
 0x4e1   :  { %v4135_v46 = vpop.eup %4134  ;;  %v2432_v48 = vadd.f32 1.0, %v4133_v43  ;;  %v2456_v59 = vadd.f32 %v5639_v17, %v2455_v35  ;;  %v2461_v35 = vand.u32 2147483647, %v5625_v53 }
 0x4e2   :  { %v2347_v5 = vmul.f32 %v4135_v46, %v2345_v11  ;;  %vm2352_vm5 = vweird.f32 %v4135_v46  ;;  %v5653_v62 = vpop.eup %4136 }
 0x4e3   :  { %4138 = vrcp.f32 %v2432_v48  ;;  %vm2353_vm8 = vmor %vm2351_vm6, %vm2352_vm5  ;;  %v2473_v11 = vmul.f32 %v5653_v62, %v5644_v61  ;;  %v2444_v52 = vand.u32 2147483648, %v2432_v48  ;;  %v2442_v4 = vand.u32 2147483647, %v2432_v48 }
 0x4e4   :  { %v2348_v63 = vsub.f32 1.0, %v2347_v5  ;;  %4140 = vtanh.f32 %v5646_v21  ;;  %vm2438_vm13 = vweird.f32 %v2432_v48  ;;  %vm2462_vm14 = vcmp.eq.f32.partialorder %v2461_v35, 8.507059e+37 }
 0x4e5   :  { %4142 = vtanh.f32 %v2427_v0  ;;  %vm2443_vm0 = vcmp.eq.f32.partialorder %v2442_v4, 8.507059e+37  ;;  %vm2478_vm1 = vweird.f32 %v5653_v62  ;;  %v6727_v4 = vld [vmem:[#allocation52_spill] sm:$0xff] }
 0x4e6   :  { %v2349_v1 = vmul.f32 %v4135_v46, %v2348_v63  ;;  %vm2479_vm3 = vmor %vm2477_vm2, %vm2478_vm1 }
 0x4e7   :  { %v2410_v40 = vpop.f32.mrf.mxu2 }
 0x4e8   :  { %v2350_v38 = vadd.f32 %v4135_v46, %v2349_v1  ;;  %v2463_v40 = vand.u32 2147483648, %v5625_v53  ;;  %v2445_v53 = vor.u32 1.1754944e-38, %v2444_v52 }
 0x4e9   :  { %v4139_v57 = vpop.eup %4138 }
 0x4ea   :  { %v2434_v43 = vmul.f32 %v4139_v57, %v2432_v48  ;;  %v2354_v37 = vsel %vm2353_vm8, %v4135_v46, %v2350_v38  ;;  %v4141_v5 = vpop.eup %4140  ;;  %v2460_v46 = vsel %vm5661_vm11, %v5639_v17, %v2456_v59  ;;  %vm2439_vm12 = vweird.f32 %v4139_v57 }
 0x4eb   :  { %v2359_v63 = vsel %vm2356_vm9, %v2358_v18, %v2354_v37  ;;  %v2464_v10 = vor.u32 1.1754944e-38, %v2463_v40  ;;  %v2474_v18 = vsub.f32 1.0, %v2473_v11  ;;  %vm2440_vm15 = vmor %vm2438_vm13, %vm2439_vm12  ;;  %v4143_v0 = vpop.eup %4142 }
 0x4ec   :  { %v2435_v58 = vsub.f32 1.0, %v2434_v43  ;;  %v2365_v23 = vmul.f32 %v4141_v5, %v2359_v63  ;;  %v2481_v63 = vand.u32 2147483647, %v5644_v61 }
 0x4ed   :  { %v2465_v43 = vsel %vm2462_vm14, %v2464_v10, %v2460_v46  ;;  %v2475_v59 = vmul.f32 %v5653_v62, %v2474_v18  ;;  %v6725_v46 = vld [vmem:[#allocation31_spill] sm:$0xff]  ;;  %v6729_v18 = vld [vmem:[#allocation34_spill] sm:$0xff] }
 0x4ee   :  { %v2436_v6 = vmul.f32 %v4139_v57, %v2435_v58  ;;  %v2493_v38 = vpack.c.bf16 %v2365_v23, %v2365_v23  ;;  %v2487_v40 = vmul.f32 %v2465_v43, %v5512_v24  ;;  %vm2482_vm4 = vcmp.eq.f32.partialorder %v2481_v63, 8.507059e+37  ;;  %v6732_v43 = vld [vmem:[#allocation70_spill] sm:$0xff]  ;;  %v6741_v63 = vld [vmem:[#allocation63_spill] sm:$0xff] }
 0x4ef   :  { %v2476_v10 = vadd.f32 %v5653_v62, %v2475_v59  ;;  %v6735_v59 = vld [vmem:[#allocation79_spill] sm:$0xff] }
 0x4f0   :  { %v2437_v37 = vadd.f32 %v4139_v57, %v2436_v6  ;;  %2515 = vmatmul.bf16.vlgmr.msra.gmra.mxu1 %v2493_v38  ;;  %2541 = vmatmul.bf16.vlgmr.msra.gmra.mxu3 %v2493_v38  ;;  %v6726_v6 = vld [vmem:[#allocation35_spill] sm:$0xff] }
 0x4f1   :  { %2681 = vmatpush.bf16.msra.mxu1 %v6427_v29  ;;  %2707 = vmatpush.bf16.msra.mxu3 %v6428_v51  ;;  %v2480_v24 = vsel %vm2479_vm3, %v5653_v62, %v2476_v10  ;;  %v6724_v62 = vld [vmem:[#allocation51_spill] sm:$0xff] }
 0x4f2   :  { %v2441_v17 = vsel %vm2440_vm15, %v4139_v57, %v2437_v37  ;;  %v2483_v57 = vand.u32 2147483648, %v5644_v61  ;;  %v6723_v61 = vld [vmem:[#allocation49_spill] sm:$0xff]  ;;  %v6739_v10 = vld [vmem:[#allocation83_spill] sm:$0xff] }
 0x4f3   :  { %v2446_v5 = vsel %vm2443_vm0, %v2445_v53, %v2441_v17  ;;  %v6730_v37 = vld [vmem:[#allocation37_spill] sm:$0xff]  ;;  %v6733_v17 = vld [vmem:[#allocation56_spill] sm:$0xff] }
 0x4f4   :  { %v2488_v11 = vmul.f32 %v4143_v0, %v2446_v5  ;;  %v2484_v1 = vor.u32 1.1754944e-38, %v2483_v57  ;;  %v6731_v53 = vld [vmem:[#allocation69_spill] sm:$0xff]  ;;  %v6736_v5 = vld [vmem:[#allocation80_spill] sm:$0xff] }
 0x4f5   :  { %2682 = vmatpush.bf16.msra.mxu1 %v6429_v15  ;;  %2708 = vmatpush.bf16.msra.mxu3 %v6430_v49  ;;  %v6734_v0 = vld [vmem:[#allocation57_spill] sm:$0xff]  ;;  %v6740_v57 = vld [vmem:[#allocation84_spill] sm:$0xff] }
 0x4f6   :  { %v5675_v48 = vadd.f32 %v2488_v11, %v2487_v40  ;;  %v2485_v35 = vsel %vm2482_vm4, %v2484_v1, %v2480_v24  ;;  %v6737_v40 = vld [vmem:[#allocation58_spill] sm:$0xff]  ;;  %v6738_v11 = vld [vmem:[#allocation59_spill] sm:$0xff] }
 0x4f7   :  { %v6742_v24 = vld [vmem:[#allocation66_spill] sm:$0xff]  ;;  %v6743_v1 = vld [vmem:[#allocation67_spill] sm:$0xff] }
 0x4f8   :  { %4144 = vtanh.f32 %v5675_v48 }
 0x4f9   :  { %2683 = vmatpush.bf16.msra.mxu1 %v6431_v7  ;;  %2709 = vmatpush.bf16.msra.mxu3 %v6432_v55 }
 0x4fd   :  { %2684 = vmatpush.bf16.msra.mxu1 %v6433_v33  ;;  %2710 = vmatpush.bf16.msra.mxu3 %v6434_v28 }
 0x4fe   :  { %v4145_v58 = vpop.eup %4144 }
 0x4ff   :  { %v2491_v23 = vmul.f32 %v4145_v58, %v2485_v35  ;;  %v6744_v58 = vld [vmem:[#allocation68_spill] sm:$0xff]  ;;  %v6745_v35 = vld [vmem:[#allocation89_spill] sm:$0xff] }
 0x500   :  { %2567 = vmatmul.bf16.vlgmr.msrb.gmra.mxu1 %v2493_v38  ;;  %2593 = vmatmul.bf16.vlgmr.msrb.gmra.mxu3 %v2493_v38  ;;  %v6728_v38 = vld [vmem:[#allocation53_spill] sm:$0xff] }
 0x501   :  { %v2492_v52 = vpack.c.bf16 %v2491_v23, %v2491_v23  ;;  %2685 = vmatpush.bf16.msra.mxu1 %v6435_v30  ;;  %2711 = vmatpush.bf16.msra.mxu3 %v6436_v44  ;;  %v6746_v23 = vld [vmem:[#allocation91_spill] sm:$0xff] }
 0x503   :  { %2502 = vmatmul.bf16.vlgmr.msrb.gmra.mxu0 %v2492_v52  ;;  %2528 = vmatmul.bf16.vlgmr.msra.gmra.mxu2 %v2492_v52 }
 0x504   :  { %2668 = vmatpush.bf16.msrb.mxu0 %v4400_v13  ;;  %2694 = vmatpush.bf16.msra.mxu2 %v4417_v32 }
 0x505   :  { %2686 = vmatpush.bf16.msra.mxu1 %v6437_v3  ;;  %2712 = vmatpush.bf16.msra.mxu3 %v6438_v50 }
 0x508   :  { %2669 = vmatpush.bf16.msrb.mxu0 %v4412_v26  ;;  %2695 = vmatpush.bf16.msra.mxu2 %v4433_v45 }
 0x509   :  { %2687 = vmatpush.bf16.msra.mxu1 %v6439_v34  ;;  %2713 = vmatpush.bf16.msra.mxu3 %v4494_v42 }
 0x50c   :  { %2670 = vmatpush.bf16.msrb.mxu0 %v6380_v31  ;;  %2696 = vmatpush.bf16.msra.mxu2 %v6381_v56 }
 0x50d   :  { %2688 = vmatpush.bf16.msra.mxu1 %v6440_v16  ;;  %2714 = vmatpush.bf16.msra.mxu3 %v6441_v39 }
 0x510   :  { %2671 = vmatpush.bf16.msrb.mxu0 %v6384_v54  ;;  %2689 = vmatmul.bf16.vlgmr.msra.gmra.mxu1 %v2492_v52 }
 0x511   :  { %2802 = vmatpush.bf16.msrb.mxu1 %v6442_v60  ;;  %2828 = vmatpush.bf16.msrb.mxu3 %v6443_v12 }
 0x512   :  { %2697 = vmatpush.bf16.msra.mxu2 %v6385_v22  ;;  %2715 = vmatmul.bf16.vlgmr.msra.gmra.mxu3 %v2492_v52 }
 0x513   :  { %2554 = vmatmul.bf16.vlgmr.msra.gmra.mxu0 %v2492_v52  ;;  %2580 = vmatmul.bf16.vlgmr.msrb.gmra.mxu2 %v2492_v52 }
 0x514   :  { %2672 = vmatpush.bf16.msrb.mxu0 %v6388_v25 }
 0x515   :  { %2803 = vmatpush.bf16.msrb.mxu1 %v6444_v27  ;;  %2829 = vmatpush.bf16.msrb.mxu3 %v6445_v19 }
 0x516   :  { %2698 = vmatpush.bf16.msra.mxu2 %v6389_v47 }
 0x518   :  { %2673 = vmatpush.bf16.msrb.mxu0 %v6392_v14 }
 0x519   :  { %2804 = vmatpush.bf16.msrb.mxu1 %v6446_v9  ;;  %2830 = vmatpush.bf16.msrb.mxu3 %v6447_v41 }
 0x51a   :  { %2699 = vmatpush.bf16.msra.mxu2 %v6393_v20 }
 0x51c   :  { %2674 = vmatpush.bf16.msrb.mxu0 %v6725_v46 }
 0x51d   :  { %2805 = vmatpush.bf16.msrb.mxu1 %v6723_v61  ;;  %2831 = vmatpush.bf16.msrb.mxu3 %v6724_v62 }
 0x51e   :  { %2700 = vmatpush.bf16.msra.mxu2 %v6726_v6 }
 0x520   :  { %2675 = vmatpush.bf16.msrb.mxu0 %v6729_v18 }
 0x521   :  { %2806 = vmatpush.bf16.msrb.mxu1 %v6727_v4  ;;  %2832 = vmatpush.bf16.msrb.mxu3 %v6728_v38  ;;  %v6787_v4 = vld [vmem:[#allocation110_spill] sm:$0xff] }
 0x522   :  { %2701 = vmatpush.bf16.msra.mxu2 %v6730_v37 }
 0x523   :  { %2676 = vmatmul.bf16.vlgmr.msrb.gmra.mxu0 %v2492_v52 }
 0x524   :  { %2789 = vmatpush.bf16.msra.mxu0 %v6731_v53 }
 0x525   :  { %2807 = vmatpush.bf16.msrb.mxu1 %v6733_v17  ;;  %2833 = vmatpush.bf16.msrb.mxu3 %v6734_v0  ;;  %v6785_v0 = vld [vmem:[#allocation17_spill] sm:$0xff] }
 0x526   :  { %2815 = vmatpush.bf16.msrb.mxu2 %v6732_v43 }
 0x527   :  { %2702 = vmatmul.bf16.vlgmr.msra.gmra.mxu2 %v2492_v52  ;;  %v6747_v52 = vld [vmem:[#allocation71_spill] sm:$0xff] }
 0x528   :  { %2790 = vmatpush.bf16.msra.mxu0 %v6735_v59 }
 0x529   :  { %2808 = vmatpush.bf16.msrb.mxu1 %v6737_v40  ;;  %2834 = vmatpush.bf16.msrb.mxu3 %v6738_v11  ;;  %v6748_v40 = vld [vmem:[#allocation74_spill] sm:$0xff] }
 0x52a   :  { %2816 = vmatpush.bf16.msrb.mxu2 %v6736_v5  ;;  %v6749_v11 = vld [vmem:[#allocation94_spill] sm:$0xff] }
 0x52c   :  { %2791 = vmatpush.bf16.msra.mxu0 %v6739_v10  ;;  %v6750_v10 = vld [vmem:[#allocation95_spill] sm:$0xff] }
 0x52d   :  { %2809 = vmatpush.bf16.msrb.mxu1 %v6741_v63  ;;  %2835 = vmatpush.bf16.msrb.mxu3 %v6742_v24  ;;  %v6752_v63 = vld [vmem:[#allocation82_spill] sm:$0xff]  ;;  %v6753_v24 = vld [vmem:[#allocation101_spill] sm:$0xff] }
 0x52e   :  { %2817 = vmatpush.bf16.msrb.mxu2 %v6740_v57  ;;  %v6751_v57 = vld [vmem:[#allocation81_spill] sm:$0xff] }
 0x530   :  { %2792 = vmatpush.bf16.msra.mxu0 %v6745_v35  ;;  %v6756_v35 = vld [vmem:[#allocation86_spill] sm:$0xff] }
 0x531   :  { %2854 = vmatpush.bf16.msra.mxu1 %v6743_v1  ;;  %2880 = vmatpush.bf16.msra.mxu3 %v6744_v58  ;;  %v6754_v1 = vld [vmem:[#allocation102_spill] sm:$0xff]  ;;  %v6755_v58 = vld [vmem:[#allocation85_spill] sm:$0xff] }
 0x532   :  { %2818 = vmatpush.bf16.msrb.mxu2 %v6746_v23  ;;  %v6757_v23 = vld [vmem:[#allocation105_spill] sm:$0xff] }
 0x534   :  { %2793 = vmatpush.bf16.msra.mxu0 %v6749_v11  ;;  %v6760_v11 = vld [vmem:[#allocation93_spill] sm:$0xff] }
 0x535   :  { %2855 = vmatpush.bf16.msra.mxu1 %v6747_v52  ;;  %2881 = vmatpush.bf16.msra.mxu3 %v6748_v40  ;;  %v6758_v52 = vld [vmem:[#allocation108_spill] sm:$0xff] }
 0x536   :  { %2819 = vmatpush.bf16.msrb.mxu2 %v6750_v10  ;;  %v6759_v40 = vld [vmem:[#allocation92_spill] sm:$0xff] }
 0x537   :  { %v6761_v10 = vld [vmem:[#allocation112_spill] sm:$0xff] }
 0x538   :  { %2794 = vmatpush.bf16.msra.mxu0 %v6753_v24  ;;  %v6764_v24 = vld [vmem:[#allocation115_spill] sm:$0xff] }
 0x539   :  { %2856 = vmatpush.bf16.msra.mxu1 %v6751_v57  ;;  %2882 = vmatpush.bf16.msra.mxu3 %v6752_v63  ;;  %v6762_v57 = vld [vmem:[#allocation113_spill] sm:$0xff]  ;;  %v6763_v63 = vld [vmem:[#allocation114_spill] sm:$0xff] }
 0x53a   :  { %2820 = vmatpush.bf16.msrb.mxu2 %v6754_v1  ;;  %v6765_v1 = vld [vmem:[#allocation96_spill] sm:$0xff] }
 0x53c   :  { %2795 = vmatpush.bf16.msra.mxu0 %v6757_v23  ;;  %v6768_v23 = vld [vmem:[#allocation117_spill] sm:$0xff] }
 0x53d   :  { %2857 = vmatpush.bf16.msra.mxu1 %v6755_v58  ;;  %2883 = vmatpush.bf16.msra.mxu3 %v6756_v35  ;;  %v6766_v58 = vld [vmem:[#allocation97_spill] sm:$0xff]  ;;  %v6767_v35 = vld [vmem:[#allocation116_spill] sm:$0xff] }
 0x53e   :  { %2821 = vmatpush.bf16.msrb.mxu2 %v6758_v52  ;;  %v6769_v52 = vld [vmem:[#allocation103_spill] sm:$0xff] }
 0x540   :  { %2796 = vmatpush.bf16.msra.mxu0 %v6761_v10  ;;  %v6772_v10 = vld [vmem:[#allocation122_spill] sm:$0xff] }
 0x541   :  { %2858 = vmatpush.bf16.msra.mxu1 %v6759_v40  ;;  %2884 = vmatpush.bf16.msra.mxu3 %v6760_v11  ;;  %v6770_v40 = vld [vmem:[#allocation104_spill] sm:$0xff]  ;;  %v6771_v11 = vld [vmem:[#allocation121_spill] sm:$0xff] }
 0x542   :  { %2822 = vmatpush.bf16.msrb.mxu2 %v6762_v57  ;;  %v6773_v57 = vld [vmem:[#allocation109_spill] sm:$0xff] }
 0x544   :  { %2841 = vmatpush.bf16.msrb.mxu0 %v6763_v63  ;;  %v6774_v63 = vld [vmem:[#allocation111_spill] sm:$0xff] }
 0x545   :  { %2859 = vmatpush.bf16.msra.mxu1 %v6765_v1  ;;  %2885 = vmatpush.bf16.msra.mxu3 %v6766_v58  ;;  %v6776_v1 = vld [vmem:[#allocation126_spill] sm:$0xff]  ;;  %v6777_v58 = vld [vmem:[#allocation127_spill] sm:$0xff] }
 0x546   :  { %2867 = vmatpush.bf16.msra.mxu2 %v6764_v24  ;;  %v6775_v24 = vld [vmem:[#allocation123_spill] sm:$0xff] }
 0x548   :  { %2842 = vmatpush.bf16.msrb.mxu0 %v6767_v35  ;;  %v6778_v35 = vld [vmem:[#allocation128_spill] sm:$0xff] }
 0x549   :  { %2860 = vmatpush.bf16.msra.mxu1 %v6769_v52  ;;  %2886 = vmatpush.bf16.msra.mxu3 %v6770_v40  ;;  %v6780_v52 = vld [vmem:[#allocation130_spill] sm:$0xff]  ;;  %v6781_v40 = vld [vmem:[#allocation131_spill] sm:$0xff] }
 0x54a   :  { %2868 = vmatpush.bf16.msra.mxu2 %v6768_v23  ;;  %v6779_v23 = vld [vmem:[#allocation129_spill] sm:$0xff] }
 0x54c   :  { %2843 = vmatpush.bf16.msrb.mxu0 %v6771_v11  ;;  %v6782_v11 = vld [vmem:[#allocation132_spill] sm:$0xff] }
 0x54d   :  { %2861 = vmatpush.bf16.msra.mxu1 %v6773_v57  ;;  %2887 = vmatpush.bf16.msra.mxu3 %v6774_v63  ;;  %v6784_v57 = vld [vmem:[#allocation134_spill] sm:$0xff] }
 0x54e   :  { %2869 = vmatpush.bf16.msra.mxu2 %v6772_v10  ;;  %v6783_v10 = vld [vmem:[#allocation133_spill] sm:$0xff] }
 0x550   :  { %2844 = vmatpush.bf16.msrb.mxu0 %v6775_v24 }
 0x552   :  { %2870 = vmatpush.bf16.msra.mxu2 %v6776_v1 }
 0x554   :  { %2845 = vmatpush.bf16.msrb.mxu0 %v6777_v58 }
 0x556   :  { %2871 = vmatpush.bf16.msra.mxu2 %v6778_v35 }
 0x558   :  { %2846 = vmatpush.bf16.msrb.mxu0 %v6779_v23 }
 0x55a   :  { %2872 = vmatpush.bf16.msra.mxu2 %v6780_v52 }
 0x55c   :  { %2847 = vmatpush.bf16.msrb.mxu0 %v6781_v40  ;;  %v6786_v40 = vld [vmem:[#allocation22_spill] sm:$0xff] }
 0x55e   :  { %2873 = vmatpush.bf16.msra.mxu2 %v6782_v11 }
 0x560   :  { %2848 = vmatpush.bf16.msrb.mxu0 %v6783_v10 }
 0x562   :  { %2874 = vmatpush.bf16.msra.mxu2 %v6784_v57 }
 0x56d   :  { %v2516_v63 = vpop.f32.mrf.mxu1 }
 0x573   :  { %v2542_v24 = vpop.f32.mrf.mxu3 }
 0x575   :  { %v2518_v5 = vpop.f32.mrf.mxu1 }
 0x57b   :  { %v2544_v1 = vpop.f32.mrf.mxu3 }
 0x57d   :  { %v2568_v59 = vpop.f32.mrf.mxu1 }
 0x580   :  { %v2503_v58 = vpop.f32.mrf.mxu0 }
 0x581   :  { %v2504_v35 = vadd.f32 %v2503_v58, %v6785_v0 }
 0x583   :  { %v2517_v17 = vadd.f32 %v2516_v63, %v2504_v35  ;;  %v2594_v23 = vpop.f32.mrf.mxu3 }
 0x585   :  { %v3809_v43 = vmul.f32 -1.442695, %v2517_v17  ;;  %v2570_v52 = vpop.f32.mrf.mxu1 }
 0x586   :  { %v2529_v53 = vpop.f32.mrf.mxu2 }
 0x587   :  { %4146 = vpow2.f32 %v3809_v43  ;;  %v2530_v11 = vadd.f32 %v2529_v53, %v6786_v40 }
 0x588   :  { %v2505_v37 = vpop.f32.mrf.mxu0 }
 0x589   :  { %v2543_v10 = vadd.f32 %v2542_v24, %v2530_v11 }
 0x58b   :  { %v3810_v18 = vmul.f32 -1.442695, %v2543_v10  ;;  %v2596_v57 = vpop.f32.mrf.mxu3 }
 0x58c   :  { %v6788_v57 = vld [vmem:[#allocation119_spill] sm:$0xff] }
 0x58d   :  { %v4147_v38 = vpop.eup %4146  ;;  %4148 = vpow2.f32 %v3810_v18  ;;  %v2690_v5 = vpop.f32.mrf.mxu1 }
 0x58e   :  { %v5778_v1 = vadd.f32 1.0, %v4147_v38  ;;  %v2721_v6 = vadd.f32 %v2690_v5, %v6787_v4  ;;  %v2531_v58 = vpop.f32.mrf.mxu2 }
 0x590   :  { %4150 = vrcp.f32 %v5778_v1  ;;  %v3813_v17 = vmul.f32 -1.442695, %v2721_v6  ;;  %v2555_v63 = vpop.f32.mrf.mxu0  ;;  %vm2607_vm7 = vweird.f32 %v5778_v1 }
 0x591   :  { %v2556_v6 = vadd.f32 %v2555_v63, %v6491_v2 }
 0x592   :  { %4152 = vpow2.f32 %v3813_v17 }
 0x593   :  { %v4149_v35 = vpop.eup %4148 }
 0x594   :  { %v2620_v43 = vadd.f32 1.0, %v4149_v35 }
 0x595   :  { %v2716_v53 = vpop.f32.mrf.mxu3  ;;  %v2692_v37 = vpop.f32.mrf.mxu1 }
 0x596   :  { %v4151_v11 = vpop.eup %4150  ;;  %4154 = vrcp.f32 %v2620_v43  ;;  %v2581_v10 = vpop.f32.mrf.mxu2  ;;  %v2723_v38 = vadd.f32 %v2716_v53, %v6788_v57  ;;  %v6789_v53 = vld [vmem:[#allocation47_spill] sm:$0xff]  ;;  %vm2626_vm8 = vweird.f32 %v2620_v43 }
 0x597   :  { %v2603_v18 = vmul.f32 %v4151_v11, %v5778_v1  ;;  %v2582_v24 = vadd.f32 %v2581_v10, %v6567_v8  ;;  %v146_v57 = vadd.f32 %v6789_v53, %v6641_v36  ;;  %vm2608_vm5 = vweird.f32 %v4151_v11 }
 0x598   :  { %v2557_v4 = vpop.f32.mrf.mxu0  ;;  %v4153_v52 = vpop.eup %4152  ;;  %v3814_v40 = vmul.f32 -1.442695, %v2723_v38  ;;  %vm5793_vm9 = vmor %vm2607_vm7, %vm2608_vm5 }
 0x599   :  { %v2604_v5 = vsub.f32 1.0, %v2603_v18  ;;  %v2595_v58 = vadd.f32 %v2594_v23, %v2582_v24  ;;  %v5786_v35 = vadd.f32 1.0, %v4153_v52  ;;  %v2569_v4 = vadd.f32 %v2568_v59, %v2556_v6 }
 0x59a   :  { %v2632_v18 = vand.u32 2147483648, %v2620_v43  ;;  %v2630_v23 = vand.u32 2147483647, %v2620_v43 }
 0x59b   :  { %v3811_v37 = vmul.f32 -1.442695, %v2595_v58  ;;  %v2605_v62 = vmul.f32 %v4151_v11, %v2604_v5  ;;  %vm2752_vm2 = vweird.f32 %v5786_v35 }
 0x59c   :  { %v4155_v17 = vpop.eup %4154  ;;  %v2633_v58 = vor.u32 1.1754944e-38, %v2632_v18  ;;  %vm2631_vm11 = vcmp.eq.f32.partialorder %v2630_v23, 8.507059e+37 }
 0x59d   :  { %v2718_v0 = vpop.f32.mrf.mxu3  ;;  %v2622_v46 = vmul.f32 %v4155_v17, %v2620_v43  ;;  %4156 = vpow2.f32 %v3811_v37  ;;  %vm2627_vm6 = vweird.f32 %v4155_v17  ;;  %v2606_v24 = vadd.f32 %v4151_v11, %v2605_v62 }
 0x59e   :  { %v2583_v61 = vpop.f32.mrf.mxu2  ;;  %4158 = vpow2.f32 %v3814_v40  ;;  %vm2628_vm10 = vmor %vm2626_vm8, %vm2627_vm6 }
 0x59f   :  { %v2623_v10 = vsub.f32 1.0, %v2622_v46  ;;  %4160 = vrcp.f32 %v5786_v35  ;;  %v2613_v61 = vand.u32 2147483648, %v5778_v1  ;;  %v2611_v46 = vand.u32 2147483647, %v5778_v1 }
 0x5a0   :  { %v2677_v63 = vpop.f32.mrf.mxu0  ;;  %4162 = vtanh.f32 %v2569_v4  ;;  %v2610_v62 = vsel %vm5793_vm9, %v4151_v11, %v2606_v24 }
 0x5a1   :  { %v2624_v38 = vmul.f32 %v4155_v17, %v2623_v10  ;;  %v2720_v0 = vadd.f32 %v2677_v63, %v146_v57  ;;  %v2614_v57 = vor.u32 1.1754944e-38, %v2613_v61  ;;  %vm2612_vm12 = vcmp.eq.f32.partialorder %v2611_v46, 8.507059e+37 }
 0x5a3   :  { %v2625_v59 = vadd.f32 %v4155_v17, %v2624_v38  ;;  %v3812_v40 = vmul.f32 -1.442695, %v2720_v0  ;;  %v4157_v5 = vpop.eup %4156  ;;  %v2615_v63 = vsel %vm2612_vm12, %v2614_v57, %v2610_v62 }
 0x5a4   :  { %v4159_v6 = vpop.eup %4158  ;;  %v2640_v53 = vadd.f32 1.0, %v4157_v5 }
 0x5a5   :  { %v2629_v37 = vsel %vm2628_vm10, %v4155_v17, %v2625_v59  ;;  %v5800_v43 = vpop.eup %4160  ;;  %4164 = vpow2.f32 %v3812_v40  ;;  %v5805_v11 = vadd.f32 1.0, %v4159_v6 }
 0x5a6   :  { %v2634_v10 = vsel %vm2631_vm11, %v2633_v58, %v2629_v37  ;;  %4166 = vrcp.f32 %v2640_v53  ;;  %v2748_v4 = vmul.f32 %v5800_v43, %v5786_v35  ;;  %v4163_v0 = vpop.eup %4162  ;;  %v2650_v62 = vand.u32 2147483647, %v2640_v53 }
 0x5a7   :  { %v2656_v18 = vmul.f32 %v2634_v10, %v5646_v21  ;;  %v2657_v17 = vmul.f32 %v4163_v0, %v2615_v63  ;;  %4168 = vrcp.f32 %v5805_v11  ;;  %v2652_v21 = vand.u32 2147483648, %v2640_v53  ;;  %v6792_v63 = vld [vmem:[#allocation118_spill] sm:$0xff] }
 0x5a8   :  { %v2679_v38 = vpop.f32.mrf.mxu0  ;;  %v2749_v52 = vsub.f32 1.0, %v2748_v4  ;;  %vm2646_vm14 = vweird.f32 %v2640_v53  ;;  %vm2753_vm15 = vweird.f32 %v5800_v43  ;;  %vm2651_vm1 = vcmp.eq.f32.partialorder %v2650_v62, 8.507059e+37 }
 0x5a9   :  { %v5807_v61 = vadd.f32 %v2657_v17, %v2656_v18  ;;  %v2653_v18 = vor.u32 1.1754944e-38, %v2652_v21  ;;  %vm5821_vm3 = vmor %vm2752_vm2, %vm2753_vm15  ;;  %vm2772_vm10 = vweird.f32 %v5805_v11 }
 0x5aa   :  { %v2703_v1 = vpop.f32.mrf.mxu2  ;;  %v2750_v58 = vmul.f32 %v5800_v43, %v2749_v52  ;;  %v2758_v52 = vand.u32 2147483648, %v5786_v35 }
 0x5ab   :  { %v4165_v23 = vpop.eup %4164  ;;  %v2722_v38 = vadd.f32 %v2703_v1, %v6792_v63 }
 0x5ac   :  { %v4167_v24 = vpop.eup %4166  ;;  %v2727_v59 = vadd.f32 1.0, %v4165_v23  ;;  %v2751_v4 = vadd.f32 %v5800_v43, %v2750_v58  ;;  %v2759_v63 = vor.u32 1.1754944e-38, %v2758_v52 }
 0x5ad   :  { %v2642_v46 = vmul.f32 %v4167_v24, %v2640_v53  ;;  %vm2647_vm13 = vweird.f32 %v4167_v24  ;;  %v5812_v37 = vpop.eup %4168 }
 0x5ae   :  { %4170 = vrcp.f32 %v2727_v59  ;;  %vm2648_vm0 = vmor %vm2646_vm14, %vm2647_vm13  ;;  %v2768_v53 = vmul.f32 %v5812_v37, %v5805_v11  ;;  %v2739_v21 = vand.u32 2147483648, %v2727_v59  ;;  %v2737_v62 = vand.u32 2147483647, %v2727_v59 }
 0x5af   :  { %v2643_v5 = vsub.f32 1.0, %v2642_v46  ;;  %4172 = vtanh.f32 %v5807_v61  ;;  %vm2733_vm5 = vweird.f32 %v2727_v59  ;;  %vm2773_vm9 = vweird.f32 %v5812_v37 }
 0x5b0   :  { %4174 = vtanh.f32 %v2722_v38  ;;  %vm2738_vm8 = vcmp.eq.f32.partialorder %v2737_v62, 8.507059e+37  ;;  %vm2774_vm11 = vmor %vm2772_vm10, %vm2773_vm9  ;;  %v6832_v62 = vld [vmem:[#allocation93_spill] sm:$0xff] }
 0x5b1   :  { %v2644_v6 = vmul.f32 %v4167_v24, %v2643_v5  ;;  %v2756_v5 = vand.u32 2147483647, %v5786_v35  ;;  %v2740_v35 = vor.u32 1.1754944e-38, %v2739_v21  ;;  %v6829_v21 = vld [vmem:[#allocation105_spill] sm:$0xff] }
 0x5b2   :  { %v2705_v40 = vpop.f32.mrf.mxu2 }
 0x5b3   :  { %v2645_v57 = vadd.f32 %v4167_v24, %v2644_v6  ;;  %vm2757_vm6 = vcmp.eq.f32.partialorder %v2756_v5, 8.507059e+37  ;;  %v6827_v5 = vld [vmem:[#allocation85_spill] sm:$0xff] }
 0x5b4   :  { %v4171_v10 = vpop.eup %4170 }
 0x5b5   :  { %v2729_v0 = vmul.f32 %v4171_v10, %v2727_v59  ;;  %v2649_v17 = vsel %vm2648_vm0, %v4167_v24, %v2645_v57  ;;  %v4173_v23 = vpop.eup %4172  ;;  %v2755_v24 = vsel %vm5821_vm3, %v5800_v43, %v2751_v4  ;;  %vm2734_vm4 = vweird.f32 %v4171_v10 }
 0x5b6   :  { %v2654_v46 = vsel %vm2651_vm1, %v2653_v18, %v2649_v17  ;;  %v2769_v18 = vsub.f32 1.0, %v2768_v53  ;;  %vm2735_vm7 = vmor %vm2733_vm5, %vm2734_vm4  ;;  %v4175_v38 = vpop.eup %4174 }
 0x5b7   :  { %v2730_v1 = vsub.f32 1.0, %v2729_v0  ;;  %v2660_v58 = vmul.f32 %v4173_v23, %v2654_v46  ;;  %v2760_v0 = vsel %vm2757_vm6, %v2759_v63, %v2755_v24  ;;  %v6830_v24 = vld [vmem:[#allocation108_spill] sm:$0xff]  ;;  %v6834_v63 = vld [vmem:[#allocation113_spill] sm:$0xff] }
 0x5b8   :  { %v2770_v4 = vmul.f32 %v5812_v37, %v2769_v18  ;;  %v2782_v52 = vmul.f32 %v2760_v0, %v5675_v48  ;;  %v6835_v18 = vld [vmem:[#allocation114_spill] sm:$0xff]  ;;  %v6838_v0 = vld [vmem:[#allocation97_spill] sm:$0xff] }
 0x5b9   :  { %v2731_v6 = vmul.f32 %v4171_v10, %v2730_v1  ;;  %v2788_v57 = vpack.c.bf16 %v2660_v58, %v2660_v58  ;;  %v6828_v58 = vld [vmem:[#allocation86_spill] sm:$0xff] }
 0x5ba   :  { %v2771_v46 = vadd.f32 %v5812_v37, %v2770_v4  ;;  %v6841_v4 = vld [vmem:[#allocation103_spill] sm:$0xff] }
 0x5bb   :  { %v2732_v17 = vadd.f32 %v4171_v10, %v2731_v6  ;;  %2810 = vmatmul.bf16.vlgmr.msrb.gmra.mxu1 %v2788_v57  ;;  %2836 = vmatmul.bf16.vlgmr.msrb.gmra.mxu3 %v2788_v57  ;;  %v6831_v6 = vld [vmem:[#allocation92_spill] sm:$0xff] }
 0x5bc   :  { %2976 = vmatpush.bf16.msrb.mxu1 %v6427_v29  ;;  %3002 = vmatpush.bf16.msrb.mxu3 %v6428_v51  ;;  %v2778_v29 = vand.u32 2147483648, %v5805_v11  ;;  %v2776_v51 = vand.u32 2147483647, %v5805_v11  ;;  %v6825_v11 = vld [vmem:[#allocation101_spill] sm:$0xff] }
 0x5bd   :  { %v2736_v43 = vsel %vm2735_vm7, %v4171_v10, %v2732_v17  ;;  %v6836_v17 = vld [vmem:[#allocation115_spill] sm:$0xff] }
 0x5be   :  { %v2741_v23 = vsel %vm2738_vm8, %v2740_v35, %v2736_v43  ;;  %vm2777_vm12 = vcmp.eq.f32.partialorder %v2776_v51, 8.507059e+37  ;;  %v6837_v35 = vld [vmem:[#allocation96_spill] sm:$0xff]  ;;  %v6847_v51 = vld [vmem:[#allocation123_spill] sm:$0xff] }
 0x5bf   :  { %v2783_v53 = vmul.f32 %v4175_v38, %v2741_v23  ;;  %v6839_v43 = vld [vmem:[#allocation116_spill] sm:$0xff]  ;;  %v6840_v38 = vld [vmem:[#allocation117_spill] sm:$0xff] }
 0x5c0   :  { %2977 = vmatpush.bf16.msrb.mxu1 %v6429_v15  ;;  %3003 = vmatpush.bf16.msrb.mxu3 %v6430_v49  ;;  %v2775_v15 = vsel %vm2774_vm11, %v5812_v37, %v2771_v46  ;;  %v2779_v49 = vor.u32 1.1754944e-38, %v2778_v29  ;;  %v6826_v37 = vld [vmem:[#allocation102_spill] sm:$0xff]  ;;  %v6842_v23 = vld [vmem:[#allocation104_spill] sm:$0xff]  ;;  %v6845_v46 = vld [vmem:[#allocation109_spill] sm:$0xff] }
 0x5c1   :  { %v5835_v59 = vadd.f32 %v2783_v53, %v2782_v52  ;;  %v6843_v52 = vld [vmem:[#allocation121_spill] sm:$0xff]  ;;  %v6844_v53 = vld [vmem:[#allocation122_spill] sm:$0xff]  ;;  %v6846_v29 = vld [vmem:[#allocation111_spill] sm:$0xff] }
 0x5c2   :  { %v2780_v10 = vsel %vm2777_vm12, %v2779_v49, %v2775_v15  ;;  %v6848_v15 = vld [vmem:[#allocation126_spill] sm:$0xff]  ;;  %v6849_v49 = vld [vmem:[#allocation127_spill] sm:$0xff] }
 0x5c3   :  { %4176 = vtanh.f32 %v5835_v59 }
 0x5c4   :  { %2978 = vmatpush.bf16.msrb.mxu1 %v6431_v7  ;;  %3004 = vmatpush.bf16.msrb.mxu3 %v6432_v55  ;;  %v6808_v7 = vld [vmem:[#allocation80_spill] sm:$0xff]  ;;  %v6809_v55 = vld [vmem:[#allocation58_spill] sm:$0xff] }
 0x5c8   :  { %2979 = vmatpush.bf16.msrb.mxu1 %v6433_v33  ;;  %3005 = vmatpush.bf16.msrb.mxu3 %v6434_v28  ;;  %v6810_v33 = vld [vmem:[#allocation59_spill] sm:$0xff] }
 0x5c9   :  { %v4177_v48 = vpop.eup %4176  ;;  %v6811_v28 = vld [vmem:[#allocation83_spill] sm:$0xff] }
 0x5ca   :  { %v2786_v40 = vmul.f32 %v4177_v48, %v2780_v10  ;;  %v6850_v48 = vld [vmem:[#allocation128_spill] sm:$0xff]  ;;  %v6851_v10 = vld [vmem:[#allocation129_spill] sm:$0xff] }
 0x5cb   :  { %2862 = vmatmul.bf16.vlgmr.msra.gmra.mxu1 %v2788_v57  ;;  %2888 = vmatmul.bf16.vlgmr.msra.gmra.mxu3 %v2788_v57  ;;  %v6833_v57 = vld [vmem:[#allocation112_spill] sm:$0xff] }
 0x5cc   :  { %v2787_v1 = vpack.c.bf16 %v2786_v40, %v2786_v40  ;;  %2980 = vmatpush.bf16.msrb.mxu1 %v6435_v30  ;;  %3006 = vmatpush.bf16.msrb.mxu3 %v6436_v44  ;;  %v6812_v30 = vld [vmem:[#allocation84_spill] sm:$0xff]  ;;  %v6813_v44 = vld [vmem:[#allocation63_spill] sm:$0xff]  ;;  %v6852_v40 = vld [vmem:[#allocation130_spill] sm:$0xff] }
 0x5ce   :  { %2797 = vmatmul.bf16.vlgmr.msra.gmra.mxu0 %v2787_v1  ;;  %2823 = vmatmul.bf16.vlgmr.msrb.gmra.mxu2 %v2787_v1 }
 0x5cf   :  { %2963 = vmatpush.bf16.msra.mxu0 %v4400_v13  ;;  %2989 = vmatpush.bf16.msrb.mxu2 %v4417_v32  ;;  %v6795_v13 = vld [vmem:[#allocation49_spill] sm:$0xff]  ;;  %v6797_v32 = vld [vmem:[#allocation31_spill] sm:$0xff] }
 0x5d0   :  { %2981 = vmatpush.bf16.msrb.mxu1 %v6437_v3  ;;  %3007 = vmatpush.bf16.msrb.mxu3 %v6438_v50  ;;  %v6814_v3 = vld [vmem:[#allocation66_spill] sm:$0xff]  ;;  %v6815_v50 = vld [vmem:[#allocation67_spill] sm:$0xff] }
 0x5d3   :  { %2964 = vmatpush.bf16.msra.mxu0 %v4412_v26  ;;  %2990 = vmatpush.bf16.msrb.mxu2 %v4433_v45  ;;  %v6796_v26 = vld [vmem:[#allocation51_spill] sm:$0xff] }
 0x5d4   :  { %2982 = vmatpush.bf16.msrb.mxu1 %v6439_v34  ;;  %3008 = vmatpush.bf16.msrb.mxu3 %v4494_v42  ;;  %v6798_v45 = vld [vmem:[#allocation35_spill] sm:$0xff]  ;;  %v6799_v42 = vld [vmem:[#allocation52_spill] sm:$0xff] }
 0x5d5   :  { %v6816_v34 = vld [vmem:[#allocation68_spill] sm:$0xff] }
 0x5d7   :  { %2965 = vmatpush.bf16.msra.mxu0 %v6380_v31  ;;  %2991 = vmatpush.bf16.msrb.mxu2 %v6381_v56  ;;  %v6800_v31 = vld [vmem:[#allocation53_spill] sm:$0xff]  ;;  %v6801_v56 = vld [vmem:[#allocation34_spill] sm:$0xff] }
 0x5d8   :  { %2983 = vmatpush.bf16.msrb.mxu1 %v6440_v16  ;;  %3009 = vmatpush.bf16.msrb.mxu3 %v6441_v39  ;;  %v6817_v16 = vld [vmem:[#allocation89_spill] sm:$0xff]  ;;  %v6818_v39 = vld [vmem:[#allocation91_spill] sm:$0xff] }
 0x5db   :  { %2966 = vmatpush.bf16.msra.mxu0 %v6384_v54  ;;  %2984 = vmatmul.bf16.vlgmr.msrb.gmra.mxu1 %v2787_v1  ;;  %v6802_v54 = vld [vmem:[#allocation37_spill] sm:$0xff] }
 0x5dc   :  { %3097 = vmatpush.bf16.msra.mxu1 %v6442_v60  ;;  %3123 = vmatpush.bf16.msra.mxu3 %v6443_v12  ;;  %v6819_v60 = vld [vmem:[#allocation71_spill] sm:$0xff]  ;;  %v6820_v12 = vld [vmem:[#allocation74_spill] sm:$0xff] }
 0x5dd   :  { %2992 = vmatpush.bf16.msrb.mxu2 %v6385_v22  ;;  %3010 = vmatmul.bf16.vlgmr.msrb.gmra.mxu3 %v2787_v1  ;;  %v6803_v22 = vld [vmem:[#allocation69_spill] sm:$0xff] }
 0x5de   :  { %2849 = vmatmul.bf16.vlgmr.msrb.gmra.mxu0 %v2787_v1  ;;  %2875 = vmatmul.bf16.vlgmr.msra.gmra.mxu2 %v2787_v1 }
 0x5df   :  { %2967 = vmatpush.bf16.msra.mxu0 %v6388_v25  ;;  %v6804_v25 = vld [vmem:[#allocation70_spill] sm:$0xff] }
 0x5e0   :  { %3098 = vmatpush.bf16.msra.mxu1 %v6444_v27  ;;  %3124 = vmatpush.bf16.msra.mxu3 %v6445_v19  ;;  %v6821_v27 = vld [vmem:[#allocation94_spill] sm:$0xff]  ;;  %v6822_v19 = vld [vmem:[#allocation95_spill] sm:$0xff] }
 0x5e1   :  { %2993 = vmatpush.bf16.msrb.mxu2 %v6389_v47  ;;  %v6805_v47 = vld [vmem:[#allocation56_spill] sm:$0xff] }
 0x5e3   :  { %2968 = vmatpush.bf16.msra.mxu0 %v6392_v14  ;;  %v6806_v14 = vld [vmem:[#allocation57_spill] sm:$0xff] }
 0x5e4   :  { %3099 = vmatpush.bf16.msra.mxu1 %v6446_v9  ;;  %3125 = vmatpush.bf16.msra.mxu3 %v6447_v41  ;;  %v6823_v9 = vld [vmem:[#allocation81_spill] sm:$0xff]  ;;  %v6824_v41 = vld [vmem:[#allocation82_spill] sm:$0xff] }
 0x5e5   :  { %2994 = vmatpush.bf16.msrb.mxu2 %v6393_v20  ;;  %v6807_v20 = vld [vmem:[#allocation79_spill] sm:$0xff] }
 0x5e7   :  { %2969 = vmatpush.bf16.msra.mxu0 %v6797_v32  ;;  %v6856_v32 = vld [vmem:[#allocation134_spill] sm:$0xff] }
 0x5e8   :  { %3100 = vmatpush.bf16.msra.mxu1 %v6795_v13  ;;  %3126 = vmatpush.bf16.msra.mxu3 %v6796_v26  ;;  %v6854_v13 = vld [vmem:[#allocation132_spill] sm:$0xff]  ;;  %v6855_v26 = vld [vmem:[#allocation133_spill] sm:$0xff] }
 0x5e9   :  { %2995 = vmatpush.bf16.msrb.mxu2 %v6798_v45 }
 0x5eb   :  { %2970 = vmatpush.bf16.msra.mxu0 %v6801_v56 }
 0x5ec   :  { %3101 = vmatpush.bf16.msra.mxu1 %v6799_v42  ;;  %3127 = vmatpush.bf16.msra.mxu3 %v6800_v31 }
 0x5ed   :  { %2996 = vmatpush.bf16.msrb.mxu2 %v6802_v54 }
 0x5ee   :  { %2971 = vmatmul.bf16.vlgmr.msra.gmra.mxu0 %v2787_v1 }
 0x5ef   :  { %3084 = vmatpush.bf16.msrb.mxu0 %v6803_v22 }
 0x5f0   :  { %3102 = vmatpush.bf16.msra.mxu1 %v6805_v47  ;;  %3128 = vmatpush.bf16.msra.mxu3 %v6806_v14 }
 0x5f1   :  { %3110 = vmatpush.bf16.msra.mxu2 %v6804_v25  ;;  %v6857_v25 = vld [vmem:[#allocation17_spill] sm:$0xff] }
 0x5f2   :  { %2997 = vmatmul.bf16.vlgmr.msrb.gmra.mxu2 %v2787_v1  ;;  %v6853_v1 = vld [vmem:[#allocation131_spill] sm:$0xff] }
 0x5f3   :  { %3085 = vmatpush.bf16.msrb.mxu0 %v6807_v20 }
 0x5f4   :  { %3103 = vmatpush.bf16.msra.mxu1 %v6809_v55  ;;  %3129 = vmatpush.bf16.msra.mxu3 %v6810_v33 }
 0x5f5   :  { %3111 = vmatpush.bf16.msra.mxu2 %v6808_v7 }
 0x5f7   :  { %3086 = vmatpush.bf16.msrb.mxu0 %v6811_v28  ;;  %v6858_v28 = vld [vmem:[#allocation22_spill] sm:$0xff] }
 0x5f8   :  { %3104 = vmatpush.bf16.msra.mxu1 %v6813_v44  ;;  %3130 = vmatpush.bf16.msra.mxu3 %v6814_v3 }
 0x5f9   :  { %3112 = vmatpush.bf16.msra.mxu2 %v6812_v30 }
 0x5fb   :  { %3087 = vmatpush.bf16.msrb.mxu0 %v6817_v16  ;;  %v6859_v16 = vld [vmem:[#allocation60_spill] sm:$0xff] }
 0x5fc   :  { %3149 = vmatpush.bf16.msrb.mxu1 %v6815_v50  ;;  %3175 = vmatpush.bf16.msrb.mxu3 %v6816_v34 }
 0x5fd   :  { %3113 = vmatpush.bf16.msra.mxu2 %v6818_v39  ;;  %v6860_v39 = vld [vmem:[#allocation120_spill] sm:$0xff] }
 0x5ff   :  { %3088 = vmatpush.bf16.msrb.mxu0 %v6821_v27 }
 0x600   :  { %3150 = vmatpush.bf16.msrb.mxu1 %v6819_v60  ;;  %3176 = vmatpush.bf16.msrb.mxu3 %v6820_v12  ;;  %v190_v60 = vadd.f32 %v6860_v39, %v6859_v16 }
 0x601   :  { %3114 = vmatpush.bf16.msra.mxu2 %v6822_v19 }
 0x603   :  { %3089 = vmatpush.bf16.msrb.mxu0 %v6825_v11 }
 0x604   :  { %3151 = vmatpush.bf16.msrb.mxu1 %v6823_v9  ;;  %3177 = vmatpush.bf16.msrb.mxu3 %v6824_v41 }
 0x605   :  { %3115 = vmatpush.bf16.msra.mxu2 %v6826_v37 }
 0x607   :  { %3090 = vmatpush.bf16.msrb.mxu0 %v6829_v21 }
 0x608   :  { %3152 = vmatpush.bf16.msrb.mxu1 %v6827_v5  ;;  %3178 = vmatpush.bf16.msrb.mxu3 %v6828_v58 }
 0x609   :  { %3116 = vmatpush.bf16.msra.mxu2 %v6830_v24  ;;  %v6861_v24 = vld [vmem:[#allocation73_spill] sm:$0xff] }
 0x60b   :  { %3091 = vmatpush.bf16.msrb.mxu0 %v6833_v57 }
 0x60c   :  { %3153 = vmatpush.bf16.msrb.mxu1 %v6831_v6  ;;  %3179 = vmatpush.bf16.msrb.mxu3 %v6832_v62  ;;  %v6862_v6 = vld [vmem:[#allocation125_spill] sm:$0xff] }
 0x60d   :  { %3117 = vmatpush.bf16.msra.mxu2 %v6834_v63  ;;  %v272_v62 = vadd.f32 %v6862_v6, %v6861_v24 }
 0x60f   :  { %3136 = vmatpush.bf16.msra.mxu0 %v6835_v18 }
 0x610   :  { %3154 = vmatpush.bf16.msrb.mxu1 %v6837_v35  ;;  %3180 = vmatpush.bf16.msrb.mxu3 %v6838_v0 }
 0x611   :  { %3162 = vmatpush.bf16.msrb.mxu2 %v6836_v17 }
 0x613   :  { %3137 = vmatpush.bf16.msra.mxu0 %v6839_v43 }
 0x614   :  { %3155 = vmatpush.bf16.msrb.mxu1 %v6841_v4  ;;  %3181 = vmatpush.bf16.msrb.mxu3 %v6842_v23 }
 0x615   :  { %3163 = vmatpush.bf16.msrb.mxu2 %v6840_v38 }
 0x617   :  { %3138 = vmatpush.bf16.msra.mxu0 %v6843_v52 }
 0x618   :  { %3156 = vmatpush.bf16.msrb.mxu1 %v6845_v46  ;;  %3182 = vmatpush.bf16.msrb.mxu3 %v6846_v29 }
 0x619   :  { %3164 = vmatpush.bf16.msrb.mxu2 %v6844_v53 }
 0x61b   :  { %3139 = vmatpush.bf16.msra.mxu0 %v6847_v51 }
 0x61d   :  { %3165 = vmatpush.bf16.msrb.mxu2 %v6848_v15 }
 0x61f   :  { %3140 = vmatpush.bf16.msra.mxu0 %v6849_v49 }
 0x621   :  { %3166 = vmatpush.bf16.msrb.mxu2 %v6850_v48 }
 0x623   :  { %3141 = vmatpush.bf16.msra.mxu0 %v6851_v10 }
 0x625   :  { %3167 = vmatpush.bf16.msrb.mxu2 %v6852_v40  ;;  %v6863_v40 = vld [vmem:[#allocation48_spill] sm:$0xff] }
 0x627   :  { %3142 = vmatpush.bf16.msra.mxu0 %v6853_v1  ;;  %v149_v1 = vadd.f32 %v6863_v40, %v6641_v36 }
 0x629   :  { %3168 = vmatpush.bf16.msrb.mxu2 %v6854_v13 }
 0x62b   :  { %3143 = vmatpush.bf16.msra.mxu0 %v6855_v26 }
 0x62d   :  { %3169 = vmatpush.bf16.msrb.mxu2 %v6856_v32 }
 0x638   :  { %v2811_v45 = vpop.f32.mrf.mxu1 }
 0x63e   :  { %v2837_v42 = vpop.f32.mrf.mxu3 }
 0x640   :  { %v2813_v31 = vpop.f32.mrf.mxu1 }
 0x646   :  { %v2839_v56 = vpop.f32.mrf.mxu3 }
 0x648   :  { %v2863_v54 = vpop.f32.mrf.mxu1 }
 0x64b   :  { %v2798_v22 = vpop.f32.mrf.mxu0 }
 0x64c   :  { %v2799_v47 = vadd.f32 %v2798_v22, %v6857_v25 }
 0x64e   :  { %v2812_v14 = vadd.f32 %v2811_v45, %v2799_v47  ;;  %v2889_v20 = vpop.f32.mrf.mxu3 }
 0x650   :  { %v3815_v7 = vmul.f32 -1.442695, %v2812_v14  ;;  %v2865_v55 = vpop.f32.mrf.mxu1 }
 0x651   :  { %v2824_v33 = vpop.f32.mrf.mxu2 }
 0x652   :  { %4178 = vpow2.f32 %v3815_v7  ;;  %v2825_v30 = vadd.f32 %v2824_v33, %v6858_v28 }
 0x653   :  { %v2800_v44 = vpop.f32.mrf.mxu0 }
 0x654   :  { %v2838_v3 = vadd.f32 %v2837_v42, %v2825_v30 }
 0x656   :  { %v3816_v50 = vmul.f32 -1.442695, %v2838_v3  ;;  %v2891_v34 = vpop.f32.mrf.mxu3 }
 0x658   :  { %v4179_v12 = vpop.eup %4178  ;;  %4180 = vpow2.f32 %v3816_v50  ;;  %v2985_v27 = vpop.f32.mrf.mxu1 }
 0x659   :  { %v5940_v19 = vadd.f32 1.0, %v4179_v12  ;;  %v3016_v9 = vadd.f32 %v2985_v27, %v190_v60  ;;  %v2826_v41 = vpop.f32.mrf.mxu2 }
 0x65b   :  { %4182 = vrcp.f32 %v5940_v19  ;;  %v3819_v11 = vmul.f32 -1.442695, %v3016_v9  ;;  %v2850_v37 = vpop.f32.mrf.mxu0  ;;  %vm2902_vm15 = vweird.f32 %v5940_v19  ;;  %v2908_v47 = vand.u32 2147483648, %v5940_v19 }
 0x65c   :  { %v2851_v52 = vadd.f32 %v2850_v37, %v6491_v2 }
 0x65d   :  { %4184 = vpow2.f32 %v3819_v11  ;;  %v2909_v34 = vor.u32 1.1754944e-38, %v2908_v47 }
 0x65e   :  { %v4181_v5 = vpop.eup %4180  ;;  %v2864_v26 = vadd.f32 %v2863_v54, %v2851_v52  ;;  %v2906_v54 = vand.u32 2147483647, %v5940_v19 }
 0x65f   :  { %v2915_v58 = vadd.f32 1.0, %v4181_v5 }
 0x660   :  { %v3011_v21 = vpop.f32.mrf.mxu3  ;;  %v2987_v57 = vpop.f32.mrf.mxu1  ;;  %vm2907_vm4 = vcmp.eq.f32.partialorder %v2906_v54, 8.507059e+37 }
 0x661   :  { %v4183_v63 = vpop.eup %4182  ;;  %4186 = vrcp.f32 %v2915_v58  ;;  %v2876_v18 = vpop.f32.mrf.mxu2  ;;  %v3018_v35 = vadd.f32 %v3011_v21, %v272_v62  ;;  %v2927_v32 = vand.u32 2147483648, %v2915_v58  ;;  %v2925_v45 = vand.u32 2147483647, %v2915_v58 }
 0x662   :  { %v2898_v17 = vmul.f32 %v4183_v63, %v5940_v19  ;;  %v2877_v0 = vadd.f32 %v2876_v18, %v6567_v8  ;;  %vm2903_vm13 = vweird.f32 %v4183_v63  ;;  %vm2921_vm0 = vweird.f32 %v2915_v58  ;;  %v6866_v18 = vld [vmem:[#allocation72_spill] sm:$0xff] }
 0x663   :  { %v2852_v43 = vpop.f32.mrf.mxu0  ;;  %v4185_v38 = vpop.eup %4184  ;;  %v3820_v53 = vmul.f32 -1.442695, %v3018_v35  ;;  %vm5955_vm1 = vmor %vm2902_vm15, %vm2903_vm13  ;;  %v2928_v55 = vor.u32 1.1754944e-38, %v2927_v32  ;;  %vm2926_vm3 = vcmp.eq.f32.partialorder %v2925_v45, 8.507059e+37 }
 0x664   :  { %v2899_v4 = vsub.f32 1.0, %v2898_v17  ;;  %v2890_v23 = vadd.f32 %v2889_v20, %v2877_v0  ;;  %v5948_v29 = vadd.f32 1.0, %v4185_v38  ;;  %v6867_v17 = vld [vmem:[#allocation124_spill] sm:$0xff] }
 0x665   :  { %v231_v35 = vadd.f32 %v6867_v17, %v6866_v18  ;;  %v3957_v18 = vld [vmem:[%s6034_s6 + $0x28] sm:$0xff] }
 0x666   :  { %v3817_v51 = vmul.f32 -1.442695, %v2890_v23  ;;  %v2900_v48 = vmul.f32 %v4183_v63, %v2899_v4  ;;  %vm3047_vm10 = vweird.f32 %v5948_v29 }
 0x667   :  { %v4187_v46 = vpop.eup %4186 }
 0x668   :  { %v3013_v15 = vpop.f32.mrf.mxu3  ;;  %v2917_v49 = vmul.f32 %v4187_v46, %v2915_v58  ;;  %4188 = vpow2.f32 %v3817_v51  ;;  %vm2922_vm14 = vweird.f32 %v4187_v46  ;;  %v2901_v56 = vadd.f32 %v4183_v63, %v2900_v48 }
 0x669   :  { %v2878_v10 = vpop.f32.mrf.mxu2  ;;  %4190 = vpow2.f32 %v3820_v53  ;;  %vm2923_vm2 = vmor %vm2921_vm0, %vm2922_vm14  ;;  %v3053_v15 = vand.u32 2147483648, %v5948_v29 }
 0x66a   :  { %v2918_v13 = vsub.f32 1.0, %v2917_v49  ;;  %4192 = vrcp.f32 %v5948_v29  ;;  %v2905_v30 = vsel %vm5955_vm1, %v4183_v63, %v2901_v56 }
 0x66b   :  { %v2972_v42 = vpop.f32.mrf.mxu0  ;;  %4194 = vtanh.f32 %v2864_v26  ;;  %v2910_v60 = vsel %vm2907_vm4, %v2909_v34, %v2905_v30 }
 0x66c   :  { %v2919_v31 = vmul.f32 %v4187_v46, %v2918_v13  ;;  %v3015_v22 = vadd.f32 %v2972_v42, %v149_v1  ;;  %v3051_v1 = vand.u32 2147483647, %v5948_v29 }
 0x66e   :  { %v2920_v14 = vadd.f32 %v4187_v46, %v2919_v31  ;;  %v3818_v20 = vmul.f32 -1.442695, %v3015_v22  ;;  %v4189_v7 = vpop.eup %4188  ;;  %v3054_v22 = vor.u32 1.1754944e-38, %v3053_v15  ;;  %vm3052_vm14 = vcmp.eq.f32.partialorder %v3051_v1, 8.507059e+37  ;;  %v3954_v15 = vld [vmem:[%s6034_s6 + $0x10] sm:$0xff] }
 0x66f   :  { %v4191_v33 = vpop.eup %4190  ;;  %v2935_v3 = vadd.f32 1.0, %v4189_v7 }
 0x670   :  { %v2924_v44 = vsel %vm2923_vm2, %v4187_v46, %v2920_v14  ;;  %4196 = vpow2.f32 %v3818_v20  ;;  %v5962_v50 = vpop.eup %4192  ;;  %v5967_v9 = vadd.f32 1.0, %v4191_v33 }
 0x671   :  { %v2929_v16 = vsel %vm2926_vm3, %v2928_v55, %v2924_v44  ;;  %4198 = vrcp.f32 %v2935_v3  ;;  %v3043_v27 = vmul.f32 %v5962_v50, %v5948_v29  ;;  %v4195_v41 = vpop.eup %4194  ;;  %v2945_v43 = vand.u32 2147483647, %v2935_v3 }
 0x672   :  { %v2951_v19 = vmul.f32 %v2929_v16, %v5807_v61  ;;  %v2952_v37 = vmul.f32 %v4195_v41, %v2910_v60  ;;  %4200 = vrcp.f32 %v5967_v9  ;;  %v2947_v61 = vand.u32 2147483648, %v2935_v3 }
 0x673   :  { %v2974_v12 = vpop.f32.mrf.mxu0  ;;  %v3044_v21 = vsub.f32 1.0, %v3043_v27  ;;  %vm2941_vm6 = vweird.f32 %v2935_v3  ;;  %vm3048_vm7 = vweird.f32 %v5962_v50  ;;  %vm2946_vm9 = vcmp.eq.f32.partialorder %v2945_v43, 8.507059e+37 }
 0x674   :  { %v5969_v24 = vadd.f32 %v2952_v37, %v2951_v19  ;;  %v2948_v51 = vor.u32 1.1754944e-38, %v2947_v61  ;;  %vm5982_vm11 = vmor %vm3047_vm10, %vm3048_vm7  ;;  %v3073_v34 = vand.u32 2147483648, %v5967_v9  ;;  %vm3067_vm2 = vweird.f32 %v5967_v9 }
 0x675   :  { %v2998_v39 = vpop.f32.mrf.mxu2  ;;  %v3045_v63 = vmul.f32 %v5962_v50, %v3044_v21  ;;  %v3071_v16 = vand.u32 2147483647, %v5967_v9 }
 0x676   :  { %v4197_v11 = vpop.eup %4196  ;;  %v3017_v23 = vadd.f32 %v2998_v39, %v231_v35  ;;  %v3074_v60 = vor.u32 1.1754944e-38, %v3073_v34 }
 0x677   :  { %v3022_v5 = vadd.f32 1.0, %v4197_v11  ;;  %v4199_v58 = vpop.eup %4198  ;;  %v3046_v46 = vadd.f32 %v5962_v50, %v3045_v63  ;;  %vm3072_vm4 = vcmp.eq.f32.partialorder %v3071_v16, 8.507059e+37 }
 0x678   :  { %v2937_v6 = vmul.f32 %v4199_v58, %v2935_v3  ;;  %vm2942_vm5 = vweird.f32 %v4199_v58  ;;  %v4201_v38 = vpop.eup %4200 }
 0x679   :  { %4202 = vrcp.f32 %v3022_v5  ;;  %vm2943_vm8 = vmor %vm2941_vm6, %vm2942_vm5  ;;  %v3063_v49 = vmul.f32 %v4201_v38, %v5967_v9  ;;  %v3034_v32 = vand.u32 2147483648, %v3022_v5  ;;  %v3032_v31 = vand.u32 2147483647, %v3022_v5  ;;  %v3959_v9 = vld [vmem:[%s6034_s6 + $0x38] sm:$0xff] }
 0x67a   :  { %v2938_v57 = vsub.f32 1.0, %v2937_v6  ;;  %4204 = vtanh.f32 %v5969_v24  ;;  %v3050_v56 = vsel %vm5982_vm11, %v5962_v50, %v3046_v46  ;;  %vm3028_vm13 = vweird.f32 %v3022_v5 }
 0x67b   :  { %4206 = vtanh.f32 %v3017_v23  ;;  %v3064_v47 = vsub.f32 1.0, %v3063_v49  ;;  %v3035_v29 = vor.u32 1.1754944e-38, %v3034_v32  ;;  %v3055_v14 = vsel %vm3052_vm14, %v3054_v22, %v3050_v56  ;;  %v3952_v32 = vld [vmem:[%s6034_s6] sm:$0xff] }
 0x67c   :  { %v2939_v0 = vmul.f32 %v4199_v58, %v2938_v57  ;;  %vm3033_vm0 = vcmp.eq.f32.partialorder %v3032_v31, 8.507059e+37  ;;  %v3077_v30 = vmul.f32 %v3055_v14, %v5835_v59  ;;  %vm3068_vm1 = vweird.f32 %v4201_v38 }
 0x67d   :  { %v3000_v62 = vpop.f32.mrf.mxu2  ;;  %v3065_v55 = vmul.f32 %v4201_v38, %v3064_v47  ;;  %vm3069_vm3 = vmor %vm3067_vm2, %vm3068_vm1  ;;  %vm3333_vm1 = vcmask 48128  }
 0x67e   :  { %v2940_v52 = vadd.f32 %v4199_v58, %v2939_v0  ;;  %v3958_v62 = vld [vmem:[%s6034_s6 + $0x30] sm:$0xff] }
 0x67f   :  { %v4203_v4 = vpop.eup %4202  ;;  %v3066_v50 = vadd.f32 %v4201_v38, %v3065_v55 }
 0x680   :  { %v3024_v53 = vmul.f32 %v4203_v4, %v3022_v5  ;;  %v2944_v48 = vsel %vm2943_vm8, %v4199_v58, %v2940_v52  ;;  %v4205_v10 = vpop.eup %4204  ;;  %vm3029_vm12 = vweird.f32 %v4203_v4 }
 0x681   :  { %v2949_v13 = vsel %vm2946_vm9, %v2948_v51, %v2944_v48  ;;  %vm3030_vm15 = vmor %vm3028_vm13, %vm3029_vm12  ;;  %v4207_v7 = vpop.eup %4206  ;;  %v3070_v39 = vsel %vm3069_vm3, %v4201_v38, %v3066_v50  ;;  %v3956_v38 = vld [vmem:[%s6034_s6 + $0x20] sm:$0xff]  ;;  %v3953_v48 = vld [vmem:[%s6034_s6 + $0x8] sm:$0xff] }
 0x682   :  { %v3025_v40 = vsub.f32 1.0, %v3024_v53  ;;  %v2955_v45 = vmul.f32 %v4205_v10, %v2949_v13  ;;  %v3075_v27 = vsel %vm3072_vm4, %v3074_v60, %v3070_v39  ;;  %v3955_v53 = vld [vmem:[%s6034_s6 + $0x18] sm:$0xff] }
 0x684   :  { %v3026_v42 = vmul.f32 %v4203_v4, %v3025_v40  ;;  %v3083_v36 = vpack.c.bf16 %v2955_v45, %v2955_v45 }
 0x686   :  { %v3027_v54 = vadd.f32 %v4203_v4, %v3026_v42  ;;  %3105 = vmatmul.bf16.vlgmr.msra.gmra.mxu1 %v3083_v36  ;;  %3131 = vmatmul.bf16.vlgmr.msra.gmra.mxu3 %v3083_v36 }
 0x688   :  { %v3031_v20 = vsel %vm3030_vm15, %v4203_v4, %v3027_v54 }
 0x689   :  { %v3036_v33 = vsel %vm3033_vm0, %v3035_v29, %v3031_v20 }
 0x68a   :  { %v3078_v44 = vmul.f32 %v4207_v7, %v3036_v33 }
 0x68c   :  { %v3079_v3 = vadd.f32 %v3078_v44, %v3077_v30 }
 0x68e   :  { %4208 = vtanh.f32 %v3079_v3 }
 0x694   :  { %v4209_v12 = vpop.eup %4208 }
 0x695   :  { %v3081_v19 = vmul.f32 %v4209_v12, %v3075_v27 }
 0x696   :  { %3157 = vmatmul.bf16.vlgmr.msrb.gmra.mxu1 %v3083_v36  ;;  %3183 = vmatmul.bf16.vlgmr.msrb.gmra.mxu3 %v3083_v36 }
 0x697   :  { %v3082_v59 = vpack.c.bf16 %v3081_v19, %v3081_v19 }
 0x699   :  { %3092 = vmatmul.bf16.vlgmr.msrb.gmra.mxu0 %v3082_v59  ;;  %3118 = vmatmul.bf16.vlgmr.msra.gmra.mxu2 %v3082_v59 }
 0x69a   :  { %3320 = vmatpush.bf16.msrb.mxu0 %v3959_v9 }
 0x69e   :  { %3321 = vmatpush.bf16.msrb.mxu0 %v3958_v62 }
 0x6a2   :  { %3322 = vmatpush.bf16.msrb.mxu0 %v3957_v18 }
 0x6a6   :  { %3323 = vmatpush.bf16.msrb.mxu0 %v3956_v38 }
 0x6a9   :  { %3144 = vmatmul.bf16.vlgmr.msra.gmra.mxu0 %v3082_v59  ;;  %3170 = vmatmul.bf16.vlgmr.msrb.gmra.mxu2 %v3082_v59 }
 0x6aa   :  { %3324 = vmatpush.bf16.msrb.mxu0 %v3955_v53 }
 0x6ae   :  { %3325 = vmatpush.bf16.msrb.mxu0 %v3954_v15 }
 0x6b2   :  { %3326 = vmatpush.bf16.msrb.mxu0 %v3953_v48 }
 0x6b6   :  { %3327 = vmatpush.bf16.msrb.mxu0 %v3952_v32 }
 0x703   :  { %v3106_v41 = vpop.f32.mrf.mxu1 }
 0x709   :  { %v3132_v11 = vpop.f32.mrf.mxu3 }
 0x70b   :  { %v3108_v37 = vpop.f32.mrf.mxu1 }
 0x711   :  { %v3134_v5 = vpop.f32.mrf.mxu3 }
 0x713   :  { %v3158_v58 = vpop.f32.mrf.mxu1 }
 0x716   :  { %v3093_v21 = vpop.f32.mrf.mxu0 }
 0x717   :  { %v3094_v6 = vadd.f32 %v3093_v21, %v6857_v25 }
 0x719   :  { %v3107_v57 = vadd.f32 %v3106_v41, %v3094_v6  ;;  %v3184_v63 = vpop.f32.mrf.mxu3 }
 0x71b   :  { %v3821_v61 = vmul.f32 -1.442695, %v3107_v57  ;;  %v3160_v17 = vpop.f32.mrf.mxu1 }
 0x71c   :  { %v3119_v35 = vpop.f32.mrf.mxu2 }
 0x71d   :  { %4210 = vpow2.f32 %v3821_v61  ;;  %v3120_v0 = vadd.f32 %v3119_v35, %v6858_v28  ;;  %v3969_v35 = vld [vmem:[%s6035_s7] ss:$0 sm:$0xff] }
 0x71e   :  { %v3095_v43 = vpop.f32.mrf.mxu0 }
 0x71f   :  { %v3133_v25 = vadd.f32 %v3132_v11, %v3120_v0 }
 0x721   :  { %v3822_v4 = vmul.f32 -1.442695, %v3133_v25  ;;  %v3186_v23 = vpop.f32.mrf.mxu3 }
 0x723   :  { %v4211_v52 = vpop.eup %4210  ;;  %4212 = vpow2.f32 %v3822_v4 }
 0x724   :  { %v3191_v46 = vadd.f32 1.0, %v4211_v52  ;;  %v3121_v51 = vpop.f32.mrf.mxu2 }
 0x726   :  { %4214 = vrcp.f32 %v3191_v46  ;;  %v3145_v28 = vpop.f32.mrf.mxu0  ;;  %v3203_v33 = vand.u32 2147483648, %v3191_v46  ;;  %vm3197_vm7 = vweird.f32 %v3191_v46  ;;  %v3201_v44 = vand.u32 2147483647, %v3191_v46 }
 0x727   :  { %v3146_v56 = vadd.f32 %v3145_v28, %v6491_v2 }
 0x728   :  { %v3204_v39 = vor.u32 1.1754944e-38, %v3203_v33  ;;  %vm3202_vm12 = vcmp.eq.f32.partialorder %v3201_v44, 8.507059e+37 }
 0x729   :  { %v4213_v49 = vpop.eup %4212  ;;  %v3159_v20 = vadd.f32 %v3158_v58, %v3146_v56 }
 0x72a   :  { %v3210_v10 = vadd.f32 1.0, %v4213_v49 }
 0x72c   :  { %v4215_v40 = vpop.eup %4214  ;;  %4216 = vrcp.f32 %v3210_v10  ;;  %v3171_v1 = vpop.f32.mrf.mxu2  ;;  %v3220_v30 = vand.u32 2147483647, %v3210_v10  ;;  %vm3216_vm8 = vweird.f32 %v3210_v10 }
 0x72d   :  { %v3193_v13 = vmul.f32 %v4215_v40, %v3191_v46  ;;  %v3172_v26 = vadd.f32 %v3171_v1, %v6567_v8  ;;  %v3222_v8 = vand.u32 2147483648, %v3210_v10  ;;  %vm3198_vm5 = vweird.f32 %v4215_v40 }
 0x72e   :  { %v3147_v45 = vpop.f32.mrf.mxu0  ;;  %vm3199_vm9 = vmor %vm3197_vm7, %vm3198_vm5  ;;  %vm3221_vm11 = vcmp.eq.f32.partialorder %v3220_v30, 8.507059e+37 }
 0x72f   :  { %v3194_v42 = vsub.f32 1.0, %v3193_v13  ;;  %v3185_v31 = vadd.f32 %v3184_v63, %v3172_v26  ;;  %v3223_v50 = vor.u32 1.1754944e-38, %v3222_v8 }
 0x731   :  { %v3823_v22 = vmul.f32 -1.442695, %v3185_v31  ;;  %v3195_v36 = vmul.f32 %v4215_v40, %v3194_v42 }
 0x732   :  { %v4217_v47 = vpop.eup %4216 }
 0x733   :  { %v3212_v54 = vmul.f32 %v4217_v47, %v3210_v10  ;;  %4218 = vpow2.f32 %v3823_v22  ;;  %v3196_v7 = vadd.f32 %v4215_v40, %v3195_v36  ;;  %vm3217_vm6 = vweird.f32 %v4217_v47 }
 0x734   :  { %v3173_v29 = vpop.f32.mrf.mxu2  ;;  %4220 = vtanh.f32 %v3159_v20  ;;  %vm3218_vm10 = vmor %vm3216_vm8, %vm3217_vm6 }
 0x735   :  { %v3213_v14 = vsub.f32 1.0, %v3212_v54  ;;  %v3200_v34 = vsel %vm3199_vm9, %v4215_v40, %v3196_v7 }
 0x736   :  { %v3205_v27 = vsel %vm3202_vm12, %v3204_v39, %v3200_v34 }
 0x737   :  { %v3214_v55 = vmul.f32 %v4217_v47, %v3213_v14 }
 0x739   :  { %v4219_v3 = vpop.eup %4218  ;;  %v3215_v2 = vadd.f32 %v4217_v47, %v3214_v55 }
 0x73a   :  { %v3230_v16 = vadd.f32 1.0, %v4219_v3  ;;  %v4221_v59 = vpop.eup %4220 }
 0x73b   :  { %v3219_v60 = vsel %vm3218_vm10, %v4217_v47, %v3215_v2  ;;  %v3247_v41 = vmul.f32 %v4221_v59, %v3205_v27 }
 0x73c   :  { %v3224_v12 = vsel %vm3221_vm11, %v3223_v50, %v3219_v60  ;;  %4222 = vrcp.f32 %v3230_v16  ;;  %v3242_v58 = vand.u32 2147483648, %v3230_v16  ;;  %v3240_v6 = vand.u32 2147483647, %v3230_v16 }
 0x73d   :  { %v3246_v19 = vmul.f32 %v3224_v12, %v5969_v24  ;;  %vm3236_vm14 = vweird.f32 %v3230_v16 }
 0x73e   :  { %v3243_v57 = vor.u32 1.1754944e-38, %v3242_v58  ;;  %vm3241_vm0 = vcmp.eq.f32.partialorder %v3240_v6, 8.507059e+37 }
 0x73f   :  { %v3248_v37 = vadd.f32 %v3247_v41, %v3246_v19 }
 0x741   :  { %4224 = vtanh.f32 %v3248_v37 }
 0x742   :  { %v4223_v11 = vpop.eup %4222 }
 0x743   :  { %v3232_v5 = vmul.f32 %v4223_v11, %v3230_v16  ;;  %vm3237_vm13 = vweird.f32 %v4223_v11 }
 0x744   :  { %vm3238_vm15 = vmor %vm3236_vm14, %vm3237_vm13 }
 0x745   :  { %v3233_v9 = vsub.f32 1.0, %v3232_v5 }
 0x747   :  { %v3234_v21 = vmul.f32 %v4223_v11, %v3233_v9  ;;  %v4225_v61 = vpop.eup %4224 }
 0x749   :  { %v3235_v62 = vadd.f32 %v4223_v11, %v3234_v21 }
 0x74b   :  { %v3239_v63 = vsel %vm3238_vm15, %v4223_v11, %v3235_v62 }
 0x74c   :  { %v3244_v18 = vsel %vm3241_vm0, %v3243_v57, %v3239_v63 }
 0x74d   :  { %v3250_v24 = vmul.f32 %v4225_v61, %v3244_v18 }
 0x74f   :  { %v3251_v17 = vpack.c.bf16 %v3250_v24, %v3250_v24 }
 0x751   :  { %3328 = vmatmul.bf16.vlgmr.msrb.gmra.mxu0 %v3251_v17 }
 0x7ce   :  { %v3329_v0 = vpop.f32.mrf.mxu0 }
 0x7cf   :  { %v3330_v43 = vadd.f32 %v3969_v35, %v3329_v0 }
 0x7d1   :  { %3334 = vst.msk [vmem:[#allocation8] sm:$0xff] %vm3333_vm1, %v3330_v43 }
 0x7d2   :  { %3345 = dma.vmem_to_hbm [thread:$0]  %s3341_s10, 128, %s3343_s13, [#allocation5]  }
 0x7d6   :  { %v3331_v25 = vpop.f32.mrf.mxu0 }
 0x7d7   :  { %4302 = dma.done.wait [#allocation5], 128  }
 0x7d8   :  { %4303 = vsyncadd [#allocation5], 4294967168 }
 0x7d9   :  { %3350 = vsyncpa [#allocation4], 1 }
 0x7da   :  { %3351 = vsyncpa [#allocation7], 1 }
 0x7db   :  { %3352 = vsyncpa [#allocation5], 1 }

</bundles_post_ra>
